<compile_context>
chip_gen: v7x
topology: tpu7x:2x2x1
jax: 0.10.0
libtpu: 0.0.40
codegen_flags: <defaults>
</compile_context>

<pallas_src>
import functools

import jax
import jax.numpy as jnp
from jax.experimental import pallas as pl
from jax.experimental.pallas import tpu as pltpu


GP = 256          # per-gate lane-padded width (multiple of 128)
G4 = 4 * GP       # concatenated gate width; kernel gate order (i, f, o, g)


# ----------------------------------------------------------------------------
# Fused kernel: one grid step == one LSTM layer (+ final Linear on last step).
# ----------------------------------------------------------------------------
def char_lstm_kernel(x_ref, wih_ref, whh_ref, b_ref, fcw_ref, fcb_ref, o_ref,
                     seq_scr, *, batch, seq_len, hidden):
    """Refs (per grid step = per layer):

    x_ref:   (T*B, H)   time-major layer-0 input (features zero-padded to H), bf16
    wih_ref: (H, 4*GP)  this layer's input->gate weights, bf16, gate order (i,f,o,g)
    whh_ref: (H, 4*GP)  this layer's hidden->gate weights, bf16
    b_ref:   (1, 4*GP)  combined bias (b_ih + b_hh), f32
    fcw_ref: (H, C)     final linear weight, bf16
    fcb_ref: (1, C)     final linear bias, f32
    o_ref:   (B, C)     logits, f32 (written only on the last grid step)
    seq_scr: (T*B, H)   bf16 sequence carried layer -> layer (persistent scratch)
    """
    B, T, H = batch, seq_len, hidden
    layer = pl.program_id(0)
    n_layers = pl.num_programs(0)

    # Layer 0: seed the sequence scratch with the input.
    @pl.when(layer == 0)
    def _():
        seq_scr[...] = x_ref[...]

    # Hoisted input projection for the whole sequence: one (T*B,H)@(H,4*GP)
    # matmul, bias folded in.  Kept as register values (sliced per step below).
    gin = jnp.dot(seq_scr[...], wih_ref[...],
                  preferred_element_type=jnp.float32) + b_ref[...]      # (T*B, 4*GP) f32

    # Loop-invariant recurrent weight for the unrolled time loop.
    whh = whh_ref[...]                                                  # (H, 4*GP) bf16

    h = jnp.zeros((B, H), jnp.float32)
    c = jnp.zeros((B, H), jnp.float32)
    outs = []

    for t in range(T):                                  # static unroll (T = 8)
        # Single recurrent matmul per step on the serial path.
        g = gin[t * B:(t + 1) * B, :] + jnp.dot(
            h.astype(jnp.bfloat16), whh, preferred_element_type=jnp.float32)
        # Fused activations: one sigmoid over the contiguous (i, f, o) slab and
        # one tanh over the real lanes of g; all slice starts are k*256 (aligned).
        s = jax.nn.sigmoid(g[:, :3 * GP])
        i_g = s[:, 0 * GP:0 * GP + H]
        f_g = s[:, 1 * GP:1 * GP + H]
        o_g = s[:, 2 * GP:2 * GP + H]
        g_g = jnp.tanh(g[:, 3 * GP:3 * GP + H])
        c = f_g * c + i_g * g_g
        h = o_g * jnp.tanh(c)
        outs.append(h.astype(jnp.bfloat16))             # stays in registers

    # One contiguous writeback per layer (off the serial path); skipped on the
    # last layer, which only needs its final h.
    @pl.when(layer < n_layers - 1)
    def _():
        seq_scr[...] = jnp.concatenate(outs, axis=0)

    # Final Linear on the last timestep of the last layer (== out[:, -1, :]).
    @pl.when(layer == n_layers - 1)
    def _():
        o_ref[...] = (jnp.dot(outs[-1], fcw_ref[...],
                              preferred_element_type=jnp.float32)
                      + fcb_ref[...])


# ----------------------------------------------------------------------------
# Wrapper
# ----------------------------------------------------------------------------
@jax.jit
def char_lstm_forward(x_btd, wih, whh, b, fc_w, fc_b):
    """x_btd: (B, T, input_size) float32, like PyTorch batch_first=True."""
    B, T, D = x_btd.shape
    L, H, _ = wih.shape
    C = fc_w.shape[-1]

    # Time-major, flatten (T, B) into rows, zero-pad features to H (layer 0's
    # padded weight rows are zero), cast the matmul operand to bf16.
    x = jnp.transpose(x_btd, (1, 0, 2)).reshape(T * B, D)
    x = jnp.pad(x, ((0, 0), (0, H - D))).astype(jnp.bfloat16)

    kernel = functools.partial(char_lstm_kernel, batch=B, seq_len=T, hidden=H)

    return pl.pallas_call(
        kernel,
        out_shape=jax.ShapeDtypeStruct((B, C), jnp.float32),
        grid=(L,),
        in_specs=[
            pl.BlockSpec((T * B, H), lambda l: (0, 0)),        # input (resident)
            pl.BlockSpec((None, H, G4), lambda l: (l, 0, 0)),  # per-layer W_ih
            pl.BlockSpec((None, H, G4), lambda l: (l, 0, 0)),  # per-layer W_hh
            pl.BlockSpec((None, 1, G4), lambda l: (l, 0, 0)),  # per-layer bias
            pl.BlockSpec((H, C), lambda l: (0, 0)),            # fc weight
            pl.BlockSpec((1, C), lambda l: (0, 0)),            # fc bias
        ],
        out_specs=pl.BlockSpec((B, C), lambda l: (0, 0)),
        scratch_shapes=[
            pltpu.VMEM((T * B, H), jnp.bfloat16),              # layer sequence
        ],
        compiler_params=pltpu.CompilerParams(
            # Layers are serialized through seq_scr -> must stay "arbitrary".
            dimension_semantics=("arbitrary",),
            vmem_limit_bytes=32 * 1024 * 1024,
        ),
    )(x, wih, whh, b, fc_w, fc_b)


# ----------------------------------------------------------------------------
# Parameter init (PyTorch-style uniform(-1/sqrt(H), 1/sqrt(H))) producing both
# the packed kernel layout and the raw PyTorch layout (for the exact reference).
# ----------------------------------------------------------------------------
def _pack_gate_cols(w, H):
    """w: (4H, D), PyTorch gate row order (i, f, g, o) -> (D, 4*GP), kernel gate
    order (i, f, o, g), each gate block zero-padded to GP lanes."""
    i_w, f_w, g_w, o_w = (w[k * H:(k + 1) * H, :].T for k in range(4))
    out = jnp.zeros((w.shape[1], G4), jnp.float32)
    for k, blk in enumerate((i_w, f_w, o_w, g_w)):
        out = out.at[:, k * GP:k * GP + H].set(blk)
    return out


def _pack_gate_bias(bvec, H):
    i_b, f_b, g_b, o_b = (bvec[k * H:(k + 1) * H] for k in range(4))
    out = jnp.zeros((G4,), jnp.float32)
    for k, blk in enumerate((i_b, f_b, o_b, g_b)):
        out = out.at[k * GP:k * GP + H].set(blk)
    return out.reshape(1, G4)


def init_params(key, input_size, hidden_size, num_layers, num_classes):
    H = hidden_size
    assert H <= GP
    bound = 1.0 / float(H) ** 0.5
    wih_l, whh_l, b_l, raw_layers = [], [], [], []
    for layer in range(num_layers):
        D = input_size if layer == 0 else H
        key, k1, k2, k3, k4 = jax.random.split(key, 5)
        w_ih = jax.random.uniform(k1, (4 * H, D), jnp.float32, -bound, bound)
        w_hh = jax.random.uniform(k2, (4 * H, H), jnp.float32, -bound, bound)
        b_ih = jax.random.uniform(k3, (4 * H,), jnp.float32, -bound, bound)
        b_hh = jax.random.uniform(k4, (4 * H,), jnp.float32, -bound, bound)
        raw_layers.append((w_ih, w_hh, b_ih, b_hh))

        wih = _pack_gate_cols(w_ih, H)                       # (D, 4*GP)
        if D < H:
            wih = jnp.pad(wih, ((0, H - D), (0, 0)))         # zero-pad layer-0 rows
        whh = _pack_gate_cols(w_hh, H)                       # (H, 4*GP)
        b = _pack_gate_bias(b_ih + b_hh, H)                  # (1, 4*GP)
        wih_l.append(wih)
        whh_l.append(whh)
        b_l.append(b)

    key, k1, k2 = jax.random.split(key, 3)
    fc_w = jax.random.uniform(k1, (num_classes, H), jnp.float32, -bound, bound)
    fc_b = jax.random.uniform(k2, (num_classes,), jnp.float32, -bound, bound)

    packed = (jnp.stack(wih_l, axis=0).astype(jnp.bfloat16),   # (L, H, 4*GP)
              jnp.stack(whh_l, axis=0).astype(jnp.bfloat16),   # (L, H, 4*GP)
              jnp.stack(b_l, axis=0),                          # (L, 1, 4*GP) f32
              fc_w.T.astype(jnp.bfloat16),                     # (H, C)
              fc_b.reshape(1, num_classes))                    # (1, C) f32
    return packed, raw_layers, (fc_w, fc_b)


# ----------------------------------------------------------------------------
# References
# ----------------------------------------------------------------------------
def reference_forward_packed(x_btd, wih, whh, b, fc_w, fc_b):
    """Same math as the kernel (bf16 matmul operands, f32 accum/state)."""
    B, T, D = x_btd.shape
    L, H, _ = whh.shape
    seq = jnp.transpose(x_btd, (1, 0, 2)).reshape(T * B, D)
    seq = jnp.pad(seq, ((0, 0), (0, H - D))).astype(jnp.bfloat16)
    h = None
    for layer in range(L):
        gin = jnp.dot(seq, wih[layer], preferred_element_type=jnp.float32) + b[layer]
        h = jnp.zeros((B, H), jnp.float32)
        c = jnp.zeros((B, H), jnp.float32)
        outs = []
        for t in range(T):
            g = gin[t * B:(t + 1) * B, :] + jnp.dot(
                h.astype(jnp.bfloat16), whh[layer], preferred_element_type=jnp.float32)
            i_g = jax.nn.sigmoid(g[:, 0 * GP:0 * GP + H])
            f_g = jax.nn.sigmoid(g[:, 1 * GP:1 * GP + H])
            o_g = jax.nn.sigmoid(g[:, 2 * GP:2 * GP + H])
            g_g = jnp.tanh(g[:, 3 * GP:3 * GP + H])
            c = f_g * c + i_g * g_g
            h = o_g * jnp.tanh(c)
            outs.append(h.astype(jnp.bfloat16))
        seq = jnp.concatenate(outs, axis=0)
    return jnp.dot(h.astype(jnp.bfloat16), fc_w,
                   preferred_element_type=jnp.float32) + fc_b


def reference_forward_f32(x_btd, raw_layers, fc_w, fc_b):
    """Exact PyTorch semantics (f32 everywhere, PyTorch gate order (i,f,g,o))."""
    B, T, _ = x_btd.shape
    seq = x_btd
    h = None
    for (w_ih, w_hh, b_ih, b_hh) in raw_layers:
        H = w_hh.shape[1]
        h = jnp.zeros((B, H), jnp.float32)
        c = jnp.zeros((B, H), jnp.float32)
        outs = []
        for t in range(T):
            g = seq[:, t, :] @ w_ih.T + b_ih + h @ w_hh.T + b_hh
            i_g = jax.nn.sigmoid(g[:, 0 * H:1 * H])
            f_g = jax.nn.sigmoid(g[:, 1 * H:2 * H])
            g_g = jnp.tanh(g[:, 2 * H:3 * H])
            o_g = jax.nn.sigmoid(g[:, 3 * H:4 * H])
            c = f_g * c + i_g * g_g
            h = o_g * jnp.tanh(c)
            outs.append(h)
        seq = jnp.stack(outs, axis=1)
    return h @ fc_w.T + fc_b


# ----------------------------------------------------------------------------
if __name__ == "__main__":
    # Small shapes consistent with the module: batch=2, seq=8, input_size=32,
    # hidden_size=160 (module default), num_layers=6 (module default), classes=16.
    B, T, INPUT_SIZE = 2, 8, 32
    HIDDEN, LAYERS, NUM_CLASSES = 160, 6, 16

    key = jax.random.PRNGKey(0)
    key, kx, kp = jax.random.split(key, 3)
    x = jax.random.normal(kx, (B, T, INPUT_SIZE), jnp.float32)

    packed, raw_layers, (fc_w_raw, fc_b_raw) = init_params(
        kp, INPUT_SIZE, HIDDEN, LAYERS, NUM_CLASSES)

    out = jax.block_until_ready(char_lstm_forward(x, *packed))
    assert out.shape == (B, NUM_CLASSES), out.shape

    # 1) Tight check vs. a reference with identical precision choices.
    ref_packed = reference_forward_packed(x, *packed)
    err_packed = float(jnp.max(jnp.abs(out - ref_packed)))
    assert jnp.allclose(out, ref_packed, rtol=2e-3, atol=2e-3), \
        f"kernel vs packed reference: max abs err {err_packed}"

    # 2) Loose check vs. the exact f32 PyTorch-semantics reference (tolerates
    #    bf16 operand quantization; catches gate-order / packing bugs).
    ref_f32 = reference_forward_f32(x, raw_layers, fc_w_raw, fc_b_raw)
    err_f32 = float(jnp.max(jnp.abs(out - ref_f32)))
    assert jnp.allclose(out, ref_f32, rtol=5e-2, atol=5e-2), \
        f"kernel vs f32 reference: max abs err {err_f32}"

    print("KERNEL_OK")
</pallas_src>

<mosaic_0001>
module attributes {stable_mosaic.version = 11 : i64} {
  func.func @char_lstm_kernel(%arg0: i32, %arg1: memref<16x160xbf16, #tpu.memory_space<vmem>>, %arg2: memref<1x160x1024xbf16, #tpu.memory_space<vmem>>, %arg3: memref<1x160x1024xbf16, #tpu.memory_space<vmem>>, %arg4: memref<1x1x1024xf32, #tpu.memory_space<vmem>>, %arg5: memref<160x16xbf16, #tpu.memory_space<vmem>>, %arg6: memref<1x16xf32, #tpu.memory_space<vmem>>, %arg7: memref<2x16xf32, #tpu.memory_space<vmem>>, %arg8: memref<16x160xbf16, #tpu.memory_space<vmem>>) attributes {dimension_semantics = [#tpu.dimension_semantics<arbitrary>], iteration_bounds = array<i64: 6>, scalar_prefetch = 0 : i64, scratch_operands = 1 : i64, tpu.core_type = #tpu.core_type<tc>, window_params = [{pipeline_mode = #tpu.pipeline_mode<synchronous>, transform_indices = @transform_0, window_bounds = array<i64: 16, 160>}, {transform_indices = @transform_1, window_bounds = array<i64: 1, 160, 1024>}, {transform_indices = @transform_2, window_bounds = array<i64: 1, 160, 1024>}, {transform_indices = @transform_3, window_bounds = array<i64: 1, 1, 1024>}, {pipeline_mode = #tpu.pipeline_mode<synchronous>, transform_indices = @transform_4, window_bounds = array<i64: 160, 16>}, {pipeline_mode = #tpu.pipeline_mode<synchronous>, transform_indices = @transform_5, window_bounds = array<i64: 1, 16>}, {pipeline_mode = #tpu.pipeline_mode<synchronous>, transform_indices = @transform_6, window_bounds = array<i64: 2, 16>}]} {
    %c0_i32 = arith.constant 0 : i32
    %0 = arith.cmpi eq, %arg0, %c0_i32 : i32
    %1 = arith.extui %0 : i1 to i32
    %c0_i32_0 = arith.constant 0 : i32
    %2 = arith.cmpi ne, %1, %c0_i32_0 : i32
    scf.if %2 {
      %c0_32 = arith.constant 0 : index
      %c0_33 = arith.constant 0 : index
      %189 = vector.load %arg1[%c0_32, %c0_33] : memref<16x160xbf16, #tpu.memory_space<vmem>>, vector<16x160xbf16>
      %c0_34 = arith.constant 0 : index
      %c0_35 = arith.constant 0 : index
      %190 = vector.load %arg8[%c0_34, %c0_35] : memref<16x160xbf16, #tpu.memory_space<vmem>>, vector<16x160xbf16>
      tpu.vector_store %arg8[%c0_34, %c0_35], %189 {strides = array<i32>} : memref<16x160xbf16, #tpu.memory_space<vmem>>, vector<16x160xbf16>,
    } else {
    }
    %c0 = arith.constant 0 : index
    %c0_1 = arith.constant 0 : index
    %3 = vector.load %arg8[%c0, %c0_1] : memref<16x160xbf16, #tpu.memory_space<vmem>>, vector<16x160xbf16>
    %c0_2 = arith.constant 0 : index
    %c0_3 = arith.constant 0 : index
    %c0_4 = arith.constant 0 : index
    %4 = vector.load %arg2[%c0_2, %c0_3, %c0_4] : memref<1x160x1024xbf16, #tpu.memory_space<vmem>>, vector<1x160x1024xbf16>
    %5 = vector.shape_cast %4 : vector<1x160x1024xbf16> to vector<160x1024xbf16>
    %cst = arith.constant dense<0.000000e+00> : vector<16x1024xf32>
    %6 = tpu.matmul %3, %5, %cst {dimension_numbers = #tpu.dot_dimension_numbers<[1], [0], [0], [1], [0, 0, 1, 1], [], []>} : vector<16x160xbf16>, vector<160x1024xbf16>, vector<16x1024xf32> -> vector<16x1024xf32>
    %c0_5 = arith.constant 0 : index
    %c0_6 = arith.constant 0 : index
    %c0_7 = arith.constant 0 : index
    %7 = vector.load %arg4[%c0_5, %c0_6, %c0_7] : memref<1x1x1024xf32, #tpu.memory_space<vmem>>, vector<1x1x1024xf32>
    %8 = vector.shape_cast %7 : vector<1x1x1024xf32> to vector<1x1024xf32>
    %9 = vector.broadcast %8 : vector<1x1024xf32> to vector<16x1024xf32>
    %10 = arith.addf %6, %9 : vector<16x1024xf32>
    %c0_8 = arith.constant 0 : index
    %c0_9 = arith.constant 0 : index
    %c0_10 = arith.constant 0 : index
    %11 = vector.load %arg3[%c0_8, %c0_9, %c0_10] : memref<1x160x1024xbf16, #tpu.memory_space<vmem>>, vector<1x160x1024xbf16>
    %12 = vector.shape_cast %11 : vector<1x160x1024xbf16> to vector<160x1024xbf16>
    %cst_11 = arith.constant 0.000000e+00 : f32
    %13 = vector.broadcast %cst_11 : f32 to vector<2x160xf32>
    %cst_12 = arith.constant 0.000000e+00 : f32
    %14 = vector.broadcast %cst_12 : f32 to vector<2x160xf32>
    %15 = vector.extract_strided_slice %10 {offsets = [0, 0], sizes = [2, 1024], strides = [1, 1]} : vector<16x1024xf32> to vector<2x1024xf32>
    %16 = arith.truncf %13 : vector<2x160xf32> to vector<2x160xbf16>
    %cst_13 = arith.constant dense<0.000000e+00> : vector<2x1024xf32>
    %17 = tpu.matmul %16, %12, %cst_13 {dimension_numbers = #tpu.dot_dimension_numbers<[1], [0], [0], [1], [0, 0, 1, 1], [], []>} : vector<2x160xbf16>, vector<160x1024xbf16>, vector<2x1024xf32> -> vector<2x1024xf32>
    %18 = arith.addf %15, %17 : vector<2x1024xf32>
    %19 = vector.extract_strided_slice %18 {offsets = [0, 0], sizes = [2, 768], strides = [1, 1]} : vector<2x1024xf32> to vector<2x768xf32>
    %20 = arith.negf %19 : vector<2x768xf32>
    %21 = math.exp %20 : vector<2x768xf32>
    %cst_14 = arith.constant 1.000000e+00 : f32
    %22 = vector.broadcast %cst_14 : f32 to vector<2x768xf32>
    %23 = arith.addf %22, %21 : vector<2x768xf32>
    %24 = arith.divf %22, %23 : vector<2x768xf32>
    %25 = vector.extract_strided_slice %24 {offsets = [0, 0], sizes = [2, 160], strides = [1, 1]} : vector<2x768xf32> to vector<2x160xf32>
    %26 = vector.extract_strided_slice %24 {offsets = [0, 256], sizes = [2, 160], strides = [1, 1]} : vector<2x768xf32> to vector<2x160xf32>
    %27 = vector.extract_strided_slice %24 {offsets = [0, 512], sizes = [2, 160], strides = [1, 1]} : vector<2x768xf32> to vector<2x160xf32>
    %28 = vector.extract_strided_slice %18 {offsets = [0, 768], sizes = [2, 160], strides = [1, 1]} : vector<2x1024xf32> to vector<2x160xf32>
    %29 = math.tanh %28 : vector<2x160xf32>
    %30 = arith.mulf %26, %14 : vector<2x160xf32>
    %31 = arith.mulf %25, %29 : vector<2x160xf32>
    %32 = arith.addf %30, %31 : vector<2x160xf32>
    %33 = math.tanh %32 : vector<2x160xf32>
    %34 = arith.mulf %27, %33 : vector<2x160xf32>
    %35 = arith.truncf %34 : vector<2x160xf32> to vector<2x160xbf16>
    %36 = vector.extract_strided_slice %10 {offsets = [2, 0], sizes = [2, 1024], strides = [1, 1]} : vector<16x1024xf32> to vector<2x1024xf32>
    %37 = arith.truncf %34 : vector<2x160xf32> to vector<2x160xbf16>
    %cst_15 = arith.constant dense<0.000000e+00> : vector<2x1024xf32>
    %38 = tpu.matmul %37, %12, %cst_15 {dimension_numbers = #tpu.dot_dimension_numbers<[1], [0], [0], [1], [0, 0, 1, 1], [], []>} : vector<2x160xbf16>, vector<160x1024xbf16>, vector<2x1024xf32> -> vector<2x1024xf32>
    %39 = arith.addf %36, %38 : vector<2x1024xf32>
    %40 = vector.extract_strided_slice %39 {offsets = [0, 0], sizes = [2, 768], strides = [1, 1]} : vector<2x1024xf32> to vector<2x768xf32>
    %41 = arith.negf %40 : vector<2x768xf32>
    %42 = math.exp %41 : vector<2x768xf32>
    %cst_16 = arith.constant 1.000000e+00 : f32
    %43 = vector.broadcast %cst_16 : f32 to vector<2x768xf32>
    %44 = arith.addf %43, %42 : vector<2x768xf32>
    %45 = arith.divf %43, %44 : vector<2x768xf32>
    %46 = vector.extract_strided_slice %45 {offsets = [0, 0], sizes = [2, 160], strides = [1, 1]} : vector<2x768xf32> to vector<2x160xf32>
    %47 = vector.extract_strided_slice %45 {offsets = [0, 256], sizes = [2, 160], strides = [1, 1]} : vector<2x768xf32> to vector<2x160xf32>
    %48 = vector.extract_strided_slice %45 {offsets = [0, 512], sizes = [2, 160], strides = [1, 1]} : vector<2x768xf32> to vector<2x160xf32>
    %49 = vector.extract_strided_slice %39 {offsets = [0, 768], sizes = [2, 160], strides = [1, 1]} : vector<2x1024xf32> to vector<2x160xf32>
    %50 = math.tanh %49 : vector<2x160xf32>
    %51 = arith.mulf %47, %32 : vector<2x160xf32>
    %52 = arith.mulf %46, %50 : vector<2x160xf32>
    %53 = arith.addf %51, %52 : vector<2x160xf32>
    %54 = math.tanh %53 : vector<2x160xf32>
    %55 = arith.mulf %48, %54 : vector<2x160xf32>
    %56 = arith.truncf %55 : vector<2x160xf32> to vector<2x160xbf16>
    %57 = vector.extract_strided_slice %10 {offsets = [4, 0], sizes = [2, 1024], strides = [1, 1]} : vector<16x1024xf32> to vector<2x1024xf32>
    %58 = arith.truncf %55 : vector<2x160xf32> to vector<2x160xbf16>
    %cst_17 = arith.constant dense<0.000000e+00> : vector<2x1024xf32>
    %59 = tpu.matmul %58, %12, %cst_17 {dimension_numbers = #tpu.dot_dimension_numbers<[1], [0], [0], [1], [0, 0, 1, 1], [], []>} : vector<2x160xbf16>, vector<160x1024xbf16>, vector<2x1024xf32> -> vector<2x1024xf32>
    %60 = arith.addf %57, %59 : vector<2x1024xf32>
    %61 = vector.extract_strided_slice %60 {offsets = [0, 0], sizes = [2, 768], strides = [1, 1]} : vector<2x1024xf32> to vector<2x768xf32>
    %62 = arith.negf %61 : vector<2x768xf32>
    %63 = math.exp %62 : vector<2x768xf32>
    %cst_18 = arith.constant 1.000000e+00 : f32
    %64 = vector.broadcast %cst_18 : f32 to vector<2x768xf32>
    %65 = arith.addf %64, %63 : vector<2x768xf32>
    %66 = arith.divf %64, %65 : vector<2x768xf32>
    %67 = vector.extract_strided_slice %66 {offsets = [0, 0], sizes = [2, 160], strides = [1, 1]} : vector<2x768xf32> to vector<2x160xf32>
    %68 = vector.extract_strided_slice %66 {offsets = [0, 256], sizes = [2, 160], strides = [1, 1]} : vector<2x768xf32> to vector<2x160xf32>
    %69 = vector.extract_strided_slice %66 {offsets = [0, 512], sizes = [2, 160], strides = [1, 1]} : vector<2x768xf32> to vector<2x160xf32>
    %70 = vector.extract_strided_slice %60 {offsets = [0, 768], sizes = [2, 160], strides = [1, 1]} : vector<2x1024xf32> to vector<2x160xf32>
    %71 = math.tanh %70 : vector<2x160xf32>
    %72 = arith.mulf %68, %53 : vector<2x160xf32>
    %73 = arith.mulf %67, %71 : vector<2x160xf32>
    %74 = arith.addf %72, %73 : vector<2x160xf32>
    %75 = math.tanh %74 : vector<2x160xf32>
    %76 = arith.mulf %69, %75 : vector<2x160xf32>
    %77 = arith.truncf %76 : vector<2x160xf32> to vector<2x160xbf16>
    %78 = vector.extract_strided_slice %10 {offsets = [6, 0], sizes = [2, 1024], strides = [1, 1]} : vector<16x1024xf32> to vector<2x1024xf32>
    %79 = arith.truncf %76 : vector<2x160xf32> to vector<2x160xbf16>
    %cst_19 = arith.constant dense<0.000000e+00> : vector<2x1024xf32>
    %80 = tpu.matmul %79, %12, %cst_19 {dimension_numbers = #tpu.dot_dimension_numbers<[1], [0], [0], [1], [0, 0, 1, 1], [], []>} : vector<2x160xbf16>, vector<160x1024xbf16>, vector<2x1024xf32> -> vector<2x1024xf32>
    %81 = arith.addf %78, %80 : vector<2x1024xf32>
    %82 = vector.extract_strided_slice %81 {offsets = [0, 0], sizes = [2, 768], strides = [1, 1]} : vector<2x1024xf32> to vector<2x768xf32>
    %83 = arith.negf %82 : vector<2x768xf32>
    %84 = math.exp %83 : vector<2x768xf32>
    %cst_20 = arith.constant 1.000000e+00 : f32
    %85 = vector.broadcast %cst_20 : f32 to vector<2x768xf32>
    %86 = arith.addf %85, %84 : vector<2x768xf32>
    %87 = arith.divf %85, %86 : vector<2x768xf32>
    %88 = vector.extract_strided_slice %87 {offsets = [0, 0], sizes = [2, 160], strides = [1, 1]} : vector<2x768xf32> to vector<2x160xf32>
    %89 = vector.extract_strided_slice %87 {offsets = [0, 256], sizes = [2, 160], strides = [1, 1]} : vector<2x768xf32> to vector<2x160xf32>
    %90 = vector.extract_strided_slice %87 {offsets = [0, 512], sizes = [2, 160], strides = [1, 1]} : vector<2x768xf32> to vector<2x160xf32>
    %91 = vector.extract_strided_slice %81 {offsets = [0, 768], sizes = [2, 160], strides = [1, 1]} : vector<2x1024xf32> to vector<2x160xf32>
    %92 = math.tanh %91 : vector<2x160xf32>
    %93 = arith.mulf %89, %74 : vector<2x160xf32>
    %94 = arith.mulf %88, %92 : vector<2x160xf32>
    %95 = arith.addf %93, %94 : vector<2x160xf32>
    %96 = math.tanh %95 : vector<2x160xf32>
    %97 = arith.mulf %90, %96 : vector<2x160xf32>
    %98 = arith.truncf %97 : vector<2x160xf32> to vector<2x160xbf16>
    %99 = vector.extract_strided_slice %10 {offsets = [8, 0], sizes = [2, 1024], strides = [1, 1]} : vector<16x1024xf32> to vector<2x1024xf32>
    %100 = arith.truncf %97 : vector<2x160xf32> to vector<2x160xbf16>
    %cst_21 = arith.constant dense<0.000000e+00> : vector<2x1024xf32>
    %101 = tpu.matmul %100, %12, %cst_21 {dimension_numbers = #tpu.dot_dimension_numbers<[1], [0], [0], [1], [0, 0, 1, 1], [], []>} : vector<2x160xbf16>, vector<160x1024xbf16>, vector<2x1024xf32> -> vector<2x1024xf32>
    %102 = arith.addf %99, %101 : vector<2x1024xf32>
    %103 = vector.extract_strided_slice %102 {offsets = [0, 0], sizes = [2, 768], strides = [1, 1]} : vector<2x1024xf32> to vector<2x768xf32>
    %104 = arith.negf %103 : vector<2x768xf32>
    %105 = math.exp %104 : vector<2x768xf32>
    %cst_22 = arith.constant 1.000000e+00 : f32
    %106 = vector.broadcast %cst_22 : f32 to vector<2x768xf32>
    %107 = arith.addf %106, %105 : vector<2x768xf32>
    %108 = arith.divf %106, %107 : vector<2x768xf32>
    %109 = vector.extract_strided_slice %108 {offsets = [0, 0], sizes = [2, 160], strides = [1, 1]} : vector<2x768xf32> to vector<2x160xf32>
    %110 = vector.extract_strided_slice %108 {offsets = [0, 256], sizes = [2, 160], strides = [1, 1]} : vector<2x768xf32> to vector<2x160xf32>
    %111 = vector.extract_strided_slice %108 {offsets = [0, 512], sizes = [2, 160], strides = [1, 1]} : vector<2x768xf32> to vector<2x160xf32>
    %112 = vector.extract_strided_slice %102 {offsets = [0, 768], sizes = [2, 160], strides = [1, 1]} : vector<2x1024xf32> to vector<2x160xf32>
    %113 = math.tanh %112 : vector<2x160xf32>
    %114 = arith.mulf %110, %95 : vector<2x160xf32>
    %115 = arith.mulf %109, %113 : vector<2x160xf32>
    %116 = arith.addf %114, %115 : vector<2x160xf32>
    %117 = math.tanh %116 : vector<2x160xf32>
    %118 = arith.mulf %111, %117 : vector<2x160xf32>
    %119 = arith.truncf %118 : vector<2x160xf32> to vector<2x160xbf16>
    %120 = vector.extract_strided_slice %10 {offsets = [10, 0], sizes = [2, 1024], strides = [1, 1]} : vector<16x1024xf32> to vector<2x1024xf32>
    %121 = arith.truncf %118 : vector<2x160xf32> to vector<2x160xbf16>
    %cst_23 = arith.constant dense<0.000000e+00> : vector<2x1024xf32>
    %122 = tpu.matmul %121, %12, %cst_23 {dimension_numbers = #tpu.dot_dimension_numbers<[1], [0], [0], [1], [0, 0, 1, 1], [], []>} : vector<2x160xbf16>, vector<160x1024xbf16>, vector<2x1024xf32> -> vector<2x1024xf32>
    %123 = arith.addf %120, %122 : vector<2x1024xf32>
    %124 = vector.extract_strided_slice %123 {offsets = [0, 0], sizes = [2, 768], strides = [1, 1]} : vector<2x1024xf32> to vector<2x768xf32>
    %125 = arith.negf %124 : vector<2x768xf32>
    %126 = math.exp %125 : vector<2x768xf32>
    %cst_24 = arith.constant 1.000000e+00 : f32
    %127 = vector.broadcast %cst_24 : f32 to vector<2x768xf32>
    %128 = arith.addf %127, %126 : vector<2x768xf32>
    %129 = arith.divf %127, %128 : vector<2x768xf32>
    %130 = vector.extract_strided_slice %129 {offsets = [0, 0], sizes = [2, 160], strides = [1, 1]} : vector<2x768xf32> to vector<2x160xf32>
    %131 = vector.extract_strided_slice %129 {offsets = [0, 256], sizes = [2, 160], strides = [1, 1]} : vector<2x768xf32> to vector<2x160xf32>
    %132 = vector.extract_strided_slice %129 {offsets = [0, 512], sizes = [2, 160], strides = [1, 1]} : vector<2x768xf32> to vector<2x160xf32>
    %133 = vector.extract_strided_slice %123 {offsets = [0, 768], sizes = [2, 160], strides = [1, 1]} : vector<2x1024xf32> to vector<2x160xf32>
    %134 = math.tanh %133 : vector<2x160xf32>
    %135 = arith.mulf %131, %116 : vector<2x160xf32>
    %136 = arith.mulf %130, %134 : vector<2x160xf32>
    %137 = arith.addf %135, %136 : vector<2x160xf32>
    %138 = math.tanh %137 : vector<2x160xf32>
    %139 = arith.mulf %132, %138 : vector<2x160xf32>
    %140 = arith.truncf %139 : vector<2x160xf32> to vector<2x160xbf16>
    %141 = vector.extract_strided_slice %10 {offsets = [12, 0], sizes = [2, 1024], strides = [1, 1]} : vector<16x1024xf32> to vector<2x1024xf32>
    %142 = arith.truncf %139 : vector<2x160xf32> to vector<2x160xbf16>
    %cst_25 = arith.constant dense<0.000000e+00> : vector<2x1024xf32>
    %143 = tpu.matmul %142, %12, %cst_25 {dimension_numbers = #tpu.dot_dimension_numbers<[1], [0], [0], [1], [0, 0, 1, 1], [], []>} : vector<2x160xbf16>, vector<160x1024xbf16>, vector<2x1024xf32> -> vector<2x1024xf32>
    %144 = arith.addf %141, %143 : vector<2x1024xf32>
    %145 = vector.extract_strided_slice %144 {offsets = [0, 0], sizes = [2, 768], strides = [1, 1]} : vector<2x1024xf32> to vector<2x768xf32>
    %146 = arith.negf %145 : vector<2x768xf32>
    %147 = math.exp %146 : vector<2x768xf32>
    %cst_26 = arith.constant 1.000000e+00 : f32
    %148 = vector.broadcast %cst_26 : f32 to vector<2x768xf32>
    %149 = arith.addf %148, %147 : vector<2x768xf32>
    %150 = arith.divf %148, %149 : vector<2x768xf32>
    %151 = vector.extract_strided_slice %150 {offsets = [0, 0], sizes = [2, 160], strides = [1, 1]} : vector<2x768xf32> to vector<2x160xf32>
    %152 = vector.extract_strided_slice %150 {offsets = [0, 256], sizes = [2, 160], strides = [1, 1]} : vector<2x768xf32> to vector<2x160xf32>
    %153 = vector.extract_strided_slice %150 {offsets = [0, 512], sizes = [2, 160], strides = [1, 1]} : vector<2x768xf32> to vector<2x160xf32>
    %154 = vector.extract_strided_slice %144 {offsets = [0, 768], sizes = [2, 160], strides = [1, 1]} : vector<2x1024xf32> to vector<2x160xf32>
    %155 = math.tanh %154 : vector<2x160xf32>
    %156 = arith.mulf %152, %137 : vector<2x160xf32>
    %157 = arith.mulf %151, %155 : vector<2x160xf32>
    %158 = arith.addf %156, %157 : vector<2x160xf32>
    %159 = math.tanh %158 : vector<2x160xf32>
    %160 = arith.mulf %153, %159 : vector<2x160xf32>
    %161 = arith.truncf %160 : vector<2x160xf32> to vector<2x160xbf16>
    %162 = vector.extract_strided_slice %10 {offsets = [14, 0], sizes = [2, 1024], strides = [1, 1]} : vector<16x1024xf32> to vector<2x1024xf32>
    %163 = arith.truncf %160 : vector<2x160xf32> to vector<2x160xbf16>
    %cst_27 = arith.constant dense<0.000000e+00> : vector<2x1024xf32>
    %164 = tpu.matmul %163, %12, %cst_27 {dimension_numbers = #tpu.dot_dimension_numbers<[1], [0], [0], [1], [0, 0, 1, 1], [], []>} : vector<2x160xbf16>, vector<160x1024xbf16>, vector<2x1024xf32> -> vector<2x1024xf32>
    %165 = arith.addf %162, %164 : vector<2x1024xf32>
    %166 = vector.extract_strided_slice %165 {offsets = [0, 0], sizes = [2, 768], strides = [1, 1]} : vector<2x1024xf32> to vector<2x768xf32>
    %167 = arith.negf %166 : vector<2x768xf32>
    %168 = math.exp %167 : vector<2x768xf32>
    %cst_28 = arith.constant 1.000000e+00 : f32
    %169 = vector.broadcast %cst_28 : f32 to vector<2x768xf32>
    %170 = arith.addf %169, %168 : vector<2x768xf32>
    %171 = arith.divf %169, %170 : vector<2x768xf32>
    %172 = vector.extract_strided_slice %171 {offsets = [0, 0], sizes = [2, 160], strides = [1, 1]} : vector<2x768xf32> to vector<2x160xf32>
    %173 = vector.extract_strided_slice %171 {offsets = [0, 256], sizes = [2, 160], strides = [1, 1]} : vector<2x768xf32> to vector<2x160xf32>
    %174 = vector.extract_strided_slice %171 {offsets = [0, 512], sizes = [2, 160], strides = [1, 1]} : vector<2x768xf32> to vector<2x160xf32>
    %175 = vector.extract_strided_slice %165 {offsets = [0, 768], sizes = [2, 160], strides = [1, 1]} : vector<2x1024xf32> to vector<2x160xf32>
    %176 = math.tanh %175 : vector<2x160xf32>
    %177 = arith.mulf %173, %158 : vector<2x160xf32>
    %178 = arith.mulf %172, %176 : vector<2x160xf32>
    %179 = arith.addf %177, %178 : vector<2x160xf32>
    %180 = math.tanh %179 : vector<2x160xf32>
    %181 = arith.mulf %174, %180 : vector<2x160xf32>
    %182 = arith.truncf %181 : vector<2x160xf32> to vector<2x160xbf16>
    %c5_i32 = arith.constant 5 : i32
    %183 = arith.cmpi slt, %arg0, %c5_i32 : i32
    %184 = arith.extui %183 : i1 to i32
    %c0_i32_29 = arith.constant 0 : i32
    %185 = arith.cmpi ne, %184, %c0_i32_29 : i32
    scf.if %185 {
      %189 = tpu.concatenate %35, %56, %77, %98, %119, %140, %161, %182 in 0 : vector<2x160xbf16>, vector<2x160xbf16>, vector<2x160xbf16>, vector<2x160xbf16>, vector<2x160xbf16>, vector<2x160xbf16>, vector<2x160xbf16>, vector<2x160xbf16> -> vector<16x160xbf16>
      %c0_32 = arith.constant 0 : index
      %c0_33 = arith.constant 0 : index
      %190 = vector.load %arg8[%c0_32, %c0_33] : memref<16x160xbf16, #tpu.memory_space<vmem>>, vector<16x160xbf16>
      tpu.vector_store %arg8[%c0_32, %c0_33], %189 {strides = array<i32>} : memref<16x160xbf16, #tpu.memory_space<vmem>>, vector<16x160xbf16>,
    } else {
    }
    %c5_i32_30 = arith.constant 5 : i32
    %186 = arith.cmpi eq, %arg0, %c5_i32_30 : i32
    %187 = arith.extui %186 : i1 to i32
    %c0_i32_31 = arith.constant 0 : i32
    %188 = arith.cmpi ne, %187, %c0_i32_31 : i32
    scf.if %188 {
      %c0_32 = arith.constant 0 : index
      %c0_33 = arith.constant 0 : index
      %189 = vector.load %arg5[%c0_32, %c0_33] : memref<160x16xbf16, #tpu.memory_space<vmem>>, vector<160x16xbf16>
      %cst_34 = arith.constant dense<0.000000e+00> : vector<2x16xf32>
      %190 = tpu.matmul %182, %189, %cst_34 {dimension_numbers = #tpu.dot_dimension_numbers<[1], [0], [0], [1], [0, 0, 1, 1], [], []>} : vector<2x160xbf16>, vector<160x16xbf16>, vector<2x16xf32> -> vector<2x16xf32>
      %c0_35 = arith.constant 0 : index
      %c0_36 = arith.constant 0 : index
      %191 = vector.load %arg6[%c0_35, %c0_36] : memref<1x16xf32, #tpu.memory_space<vmem>>, vector<1x16xf32>
      %192 = vector.broadcast %191 : vector<1x16xf32> to vector<2x16xf32>
      %193 = arith.addf %190, %192 : vector<2x16xf32>
      %c0_37 = arith.constant 0 : index
      %c0_38 = arith.constant 0 : index
      %194 = vector.load %arg7[%c0_37, %c0_38] : memref<2x16xf32, #tpu.memory_space<vmem>>, vector<2x16xf32>
      tpu.vector_store %arg7[%c0_37, %c0_38], %193 {strides = array<i32>} : memref<2x16xf32, #tpu.memory_space<vmem>>, vector<2x16xf32>,
    } else {
    }
    return
  }
  func.func @transform_0(%arg0: i32) -> (i32, i32) {
    %c0_i32 = arith.constant 0 : i32
    %c0_i32_0 = arith.constant 0 : i32
    %c0_i32_1 = arith.constant 0 : i32
    return %c0_i32, %c0_i32_0 : i32, i32
  }
  func.func @transform_1(%arg0: i32) -> (i32, i32, i32) {
    %c0_i32 = arith.constant 0 : i32
    %c0_i32_0 = arith.constant 0 : i32
    %c0_i32_1 = arith.constant 0 : i32
    return %arg0, %c0_i32, %c0_i32_0 : i32, i32, i32
  }
  func.func @transform_2(%arg0: i32) -> (i32, i32, i32) {
    %c0_i32 = arith.constant 0 : i32
    %c0_i32_0 = arith.constant 0 : i32
    %c0_i32_1 = arith.constant 0 : i32
    return %arg0, %c0_i32, %c0_i32_0 : i32, i32, i32
  }
  func.func @transform_3(%arg0: i32) -> (i32, i32, i32) {
    %c0_i32 = arith.constant 0 : i32
    %c0_i32_0 = arith.constant 0 : i32
    %c0_i32_1 = arith.constant 0 : i32
    return %arg0, %c0_i32, %c0_i32_0 : i32, i32, i32
  }
  func.func @transform_4(%arg0: i32) -> (i32, i32) {
    %c0_i32 = arith.constant 0 : i32
    %c0_i32_0 = arith.constant 0 : i32
    %c0_i32_1 = arith.constant 0 : i32
    return %c0_i32, %c0_i32_0 : i32, i32
  }
  func.func @transform_5(%arg0: i32) -> (i32, i32) {
    %c0_i32 = arith.constant 0 : i32
    %c0_i32_0 = arith.constant 0 : i32
    %c0_i32_1 = arith.constant 0 : i32
    return %c0_i32, %c0_i32_0 : i32, i32
  }
  func.func @transform_6(%arg0: i32) -> (i32, i32) {
    %c0_i32 = arith.constant 0 : i32
    %c0_i32_0 = arith.constant 0 : i32
    %c0_i32_1 = arith.constant 0 : i32
    return %c0_i32, %c0_i32_0 : i32, i32
  }
}

</mosaic_0001>

<bundles_post_ra>
// kernel: char_lstm_forward.1
= control target key start
LH: loop header
LB: loop body
LE: loop exit
PB: predicated region body
PF: predicated region fallthrough
CT: control target
= control target key end

     0   :  { %s6265_s0 = inlined_call_operand.vmem [shape: bf16[16,160], index: 0, kind: input, shape index: {}]   ;;  %s6266_s1 = inlined_call_operand.hbm [shape: bf16[6,160,1024], index: 1, kind: input, shape index: {}]   ;;  %s6267_s2 = inlined_call_operand.hbm [shape: bf16[6,160,1024], index: 2, kind: input, shape index: {}]   ;;  %s6268_s3 = inlined_call_operand.hbm [shape: f32[6,1,1024], index: 3, kind: input, shape index: {}]   ;;  %s6269_s4 = inlined_call_operand.vmem [shape: bf16[160,16], index: 4, kind: input, shape index: {}]   ;;  %s6270_s5 = inlined_call_operand.hbm [shape: f32[1,16], index: 5, kind: input, shape index: {}]   ;;  %s6271_s6 = inlined_call_operand.hbm [shape: f32[2,16], index: 6, kind: output, shape index: {}]  }
   0x1   :  { %6440 = sst [smem:[#allocation95_spill]] %s6266_s1 }
   0x2   :  { %6441 = sst [smem:[#allocation96_spill]] %s6267_s2 }
   0x3   :  { %11 = vsyncpa [#allocation4], 0 }
   0x4   :  { %13 = vsyncpa [#allocation4 + $0x1], 0 }
   0x5   :  { %14 = vsyncpa [#allocation7], 0 }
   0x6   :  { %16 = vsyncpa [#allocation7 + $0x1], 0 }
   0x7   :  { %17 = vsyncpa [#allocation10], 0 }
   0x8   :  { %18 = vsyncpa [#allocation5], 0  ;;  %s4719_s21 = smov 0   ;;  %s4721_s22 = smov 0  }
   0x9   :  { %s4723_s23 = smov 0   ;;  %s4725_s24 = smov 0  }
   0xa LB: > { %s4740_s25 = sadd.s32 1, %s4673_s24   ;;  %s52_s26 = sadd.s32 1, %s4669_s23  ;;  %s4673_s24 = sphi %s4725_s24, %s6850_s24   ;;  %s4669_s23 = sphi %s4723_s23, %s6849_s23   ;;  %s4665_s22 = sphi %s4721_s22, %s6848_s22   ;;  %s4661_s21 = sphi %s4719_s21, %s6847_s21  }
   0xb   : > { %s49_s27 = ssub.s32 %s4673_s24, %s4740_s25  ;;  %p59_p0 = scmp.ne.s32.totalorder %s4669_s23, %s4665_s22 }
   0xc   : > { %p50_p1 = scmp.eq.s32.totalorder %s49_s27, 0  ;;  %p60_p2 = scmp.eq.s32.totalorder %s4673_s24, 0 }
   0xd   : > { %p4172_p3 = scmp.lt.s32.totalorder %s4673_s24, 6  ;;  %s4753_s29 = sand.u32 1, %s4669_s23  }
   0xe   : > { %s4750_s28 = scalar_select %p50_p1, %s4669_s23, %s52_s26  }
   0xf   : > { %p61_p4 = por %p60_p2, %p59_p0  ;;  %s4138_s30 = smul.u32 640, %s4753_s29 }
  0x10   : > { %6442 = sst [smem:[#allocation16_spill]] %s4750_s28  ;;  %s4139_s7 = smul.u32 10240, %s4673_s24 }
  0x11   : > { %p4757_p5 = pnand %p4172_p3, %p61_p4  ;;  %s242_s9 = sand.u32 1, %s4673_s24  }
  0x12   : > { %s6444_s2 = sld [smem:[#allocation96_spill]]  ;;  %s246_s13 = scalar_lea.vmem [#allocation6], %s4138_s30 }
  0x13   : > { %s6443_s8 = scalar_select %p4757_p5, 1, 0 }
  0x14   : > { %s253_s14 = sshll.u32 %s246_s13, 4  ;;  %s4773_s15 = scalar_lea.sflag [#allocation7], %s242_s9  ;;  %s4771_s14 = int_to_ptr.vmem [resolvable:$true] %s253_s14 }
  0x15   : > { %p4779_p7 = pneg %p4757_p5 }
  0x18   : > { %s4767_s12 = scalar_lea.hbm %s6444_s2, %s4139_s7  ;;  %s4488_s20 = scalar_lea.hbm %s6444_s2, 61440 }
  0x19   : > { %s4483_s16 = scalar_lea.hbm %s4767_s12, 10240  ;;  %p4489_p10 = scmp.lt.u32.totalorder %s4767_s12, %s6444_s2 }
  0x1a   : > { %p4484_p6 = scmp.ne.s32.totalorder %s4767_s12, %s4483_s16  ;;  %p4490_p11 = scmp.lt.u32.totalorder %s4488_s20, %s4483_s16 }
  0x1b   : > { %p4492_p13 = scmp.lt.u32.totalorder %s4483_s16, %s4767_s12 }
  0x1c   : > { %p4486_p8 = pnand %p4779_p7, %p4484_p6  ;;  %p4491_p12 = por %p4490_p11, %p4489_p10 }
  0x1e   : > { %p4487_p9 = pneg %p4486_p8  ;;  %p4493_p0 = por %p4492_p13, %p4491_p12 }
  0x20   : > { %p4494_p1 = pnand %p4493_p0, %p4487_p9 }
  0x22   : > { %4497 = shalt.err (!%p4494_p1)
}
  0x23   : > { %s4498_s9 = scalar_lea.vmem %s4771_s14, 10240  ;;  %s4675_s10 = smov [#allocation6]  }
  0x24   : > { %p4499_p2 = scmp.ne.s32.totalorder %s4771_s14, %s4498_s9  ;;  %s4503_s11 = sshll.u32 %s4675_s10, 4  ;;  %s4504_s11 = int_to_ptr.vmem [resolvable:$false] %s4503_s11 }
  0x25   : > { %s4505_s13 = scalar_lea.vmem %s4504_s11, 20480  ;;  %p4506_p6 = scmp.lt.s32.totalorder %s4771_s14, %s4504_s11 }
  0x26   : > { %p4501_p3 = pnand %p4499_p2, %p4779_p7  ;;  %p4507_p8 = scmp.lt.s32.totalorder %s4505_s13, %s4498_s9 }
  0x28   : > { %p4502_p4 = pneg %p4501_p3  ;;  %p4508_p10 = por %p4507_p8, %p4506_p6 }
  0x2a   : > { %p4509_p11 = pnand %p4508_p10, %p4502_p4 }
  0x2c   : > { %4512 = shalt.err (!%p4509_p11)
}
  0x2d   : > { %s6272_s16 = smov 512   ;;  %s6273_s18 = smov 32  }
  0x2e   : > { %4167 = dma.hbm_to_vmem [thread:$0]  (!%p4757_p5), %s4767_s12, 10240, %s4771_s14, %s4773_s15, %s6272_s16, %s6272_s16, %s6273_s18  }
  0x2f   : > { %s4807_s19 = sadd.s32 4294967295, %s4673_s24   ;;  %p65_p9 = scmp.ne.s32.totalorder %s4665_s22, %s4661_s21 }
  0x30   : > { %p6274_p12 = scmp.eq.s32.totalorder %s4807_s19, 0  ;;  %p3865_p13 = scmp.ge.s32.totalorder %s4673_s24, 1 }
  0x31   : > { %p191_p0 = scmp.lt.s32.totalorder %s4673_s24, 7  ;;  %s4678_s14 = smov [#allocation9]  }
  0x32   : > { %p4817_p2 = por %p6274_p12, %p65_p9  ;;  %s210_s26 = sshll.u32 %s4678_s14, 4  ;;  %s4825_s26 = int_to_ptr.vmem [resolvable:$true] %s210_s26 }
  0x33   : > { %p4821_p3 = pnand %p3865_p13, %p191_p0  ;;  %s6448_s1 = sld [smem:[#allocation95_spill]] }
  0x34   : > { %s6446_s20 = scalar_select %p4817_p2, 1, 0 }
  0x35   : > { %s6447_s12 = scalar_select %p4821_p3, 1, 0 }
  0x36   : > { %p4157_p4 = pneg %p4821_p3  ;;  %s225_s10 = scalar_lea.vmem [#allocation3], %s4138_s30 }
  0x37   : > { %s232_s11 = sshll.u32 %s225_s10, 4  ;;  %s222_s14 = scalar_lea.sflag [#allocation4], %s4753_s29  ;;  %s4844_s11 = int_to_ptr.vmem [resolvable:$true] %s232_s11 }
  0x38   : > { %p4840_p6 = pnand %p4157_p4, %p6274_p12 }
  0x39   : > { %s4834_s9 = scalar_lea.hbm %s6448_s1, %s4139_s7  ;;  %s4518_s27 = scalar_lea.hbm %s6448_s1, 61440 }
  0x3a   : > { %s6449_s13 = scalar_select %p4840_p6, 1, 0 }
  0x3b   : > { %s4513_s16 = scalar_lea.hbm %s4834_s9, 10240  ;;  %p4519_p9 = scmp.lt.u32.totalorder %s4834_s9, %s6448_s1 }
  0x3c   : > { %p4514_p8 = scmp.ne.s32.totalorder %s4834_s9, %s4513_s16  ;;  %p4520_p13 = scmp.lt.u32.totalorder %s4518_s27, %s4513_s16 }
  0x3d   : > { %p4522_p4 = scmp.lt.u32.totalorder %s4513_s16, %s4834_s9 }
  0x3e   : > { %p4516_p10 = pnand %p4514_p8, %p4779_p7  ;;  %p4521_p0 = por %p4520_p13, %p4519_p9 }
  0x40   : > { %p4517_p11 = pneg %p4516_p10  ;;  %p4523_p1 = por %p4522_p4, %p4521_p0 }
  0x42   : > { %p4524_p12 = pnand %p4523_p1, %p4517_p11 }
  0x44   : > { %4527 = shalt.err (!%p4524_p12)
}
  0x45   : > { %s4528_s10 = scalar_lea.vmem %s4844_s11, 10240  ;;  %s4679_s7 = smov [#allocation3]  }
  0x46   : > { %p4529_p8 = scmp.ne.s32.totalorder %s4844_s11, %s4528_s10  ;;  %s4533_s21 = sshll.u32 %s4679_s7, 4  ;;  %s4534_s21 = int_to_ptr.vmem [resolvable:$false] %s4533_s21 }
  0x47   : > { %s4535_s18 = scalar_lea.vmem %s4534_s21, 20480  ;;  %p4536_p3 = scmp.lt.s32.totalorder %s4844_s11, %s4534_s21 }
  0x48   : > { %p4531_p10 = pnand %p4529_p8, %p4779_p7  ;;  %p4537_p6 = scmp.lt.s32.totalorder %s4535_s18, %s4528_s10 }
  0x4a   : > { %p4532_p2 = pneg %p4531_p10  ;;  %p4538_p9 = por %p4537_p6, %p4536_p3 }
  0x4c   : > { %p4539_p13 = pnand %p4538_p9, %p4532_p2 }
  0x4e   : > { %4542 = shalt.err (!%p4539_p13)
}
  0x4f   : > { %s6450_s16 = smov 32   ;;  %s6451_s27 = smov 512  }
  0x50   : > { %4164 = dma.hbm_to_vmem [thread:$0]  (!%p4757_p5), %s4834_s9, 10240, %s4844_s11, %s222_s14, %s6451_s27, %s6451_s27, %s6450_s16  }
  0x51   : > { %s3870_s30 = sshll.u32 %s4753_s29, 3  ;;  %s4543_s10 = scalar_lea.hbm %s6270_s5, 16 }
  0x52   : > { %p4544_p12 = scmp.ne.s32.totalorder %s6270_s5, %s4543_s10  ;;  %p6452_p1 = scmp.ne.s32.totalorder %s6449_s13, 0 }
  0x53   : > { %p4550_p11 = scmp.lt.u32.totalorder %s4543_s10, %s6270_s5 }
  0x54   : > { %p4545_p2 = pneg %p6452_p1 }
  0x56   : > { %p4546_p3 = pnand %p4545_p2, %p4544_p12 }
  0x58   : > { %p4547_p6 = pneg %p4546_p3 }
  0x5a   : > { %p4552_p0 = pnand %p4550_p11, %p4547_p6 }
  0x5c   : > { %4555 = shalt.err (!%p4552_p0)
}
  0x5d   : > { %s4556_s1 = scalar_lea.vmem %s4825_s26, 16  ;;  %s4563_s29 = scalar_lea.vmem %s4825_s26, 32 }
  0x5e   : > { %p4557_p4 = scmp.ne.s32.totalorder %s4825_s26, %s4556_s1  ;;  %p4564_p9 = scmp.lt.s32.totalorder %s4825_s26, %s4825_s26 }
  0x5f   : > { %p4565_p13 = scmp.lt.s32.totalorder %s4563_s29, %s4556_s1 }
  0x60   : > { %p4559_p8 = pnand %p4557_p4, %p4545_p2 }
  0x61   : > { %p4566_p12 = por %p4565_p13, %p4564_p9 }
  0x62   : > { %p4560_p10 = pneg %p4559_p8 }
  0x64   : > { %p4567_p3 = pnand %p4566_p12, %p4560_p10 }
  0x66   : > { %4570 = shalt.err (!%p4567_p3)
}
  0x67   : > { %4160 = dma.hbm_to_vmem [thread:$0]  (!%p6452_p1), %s6270_s5, 16, %s4825_s26, [#allocation10]  }
  0x68   : > { %s4137_s9 = sshll.u32 %s4673_s24, 7  ;;  %s267_s27 = scalar_lea.vmem [#allocation8], %s3870_s30 }
  0x69   : > { %s4900_s16 = scalar_lea.hbm %s6268_s3, %s4137_s9  ;;  %s275_s7 = sshll.u32 %s267_s27, 4  ;;  %s276_s7 = int_to_ptr.vmem [resolvable:$true] %s275_s7 }
  0x6a   : > { %s4571_s13 = scalar_lea.hbm %s4900_s16, 128  ;;  %s4576_s24 = scalar_lea.hbm %s6268_s3, 768 }
  0x6b   : > { %p4572_p2 = scmp.ne.s32.totalorder %s4900_s16, %s4571_s13  ;;  %p4577_p1 = scmp.lt.u32.totalorder %s4900_s16, %s6268_s3 }
  0x6c   : > { %p4578_p0 = scmp.lt.u32.totalorder %s4576_s24, %s4571_s13  ;;  %p4580_p8 = scmp.lt.u32.totalorder %s4571_s13, %s4900_s16 }
  0x6d   : > { %p4574_p6 = pnand %p4572_p2, %p4779_p7 }
  0x6e   : > { %p4579_p4 = por %p4578_p0, %p4577_p1 }
  0x6f   : > { %p4575_p11 = pneg %p4574_p6 }
  0x70   : > { %p4581_p10 = por %p4580_p8, %p4579_p4 }
  0x72   : > { %p4582_p9 = pnand %p4581_p10, %p4575_p11 }
  0x74   : > { %4585 = shalt.err (!%p4582_p9)
}
  0x75   : > { %s4586_s30 = scalar_lea.vmem %s276_s7, 128  ;;  %s4680_s1 = smov [#allocation8]  }
  0x76   : > { %p4587_p13 = scmp.ne.s32.totalorder %s276_s7, %s4586_s30  ;;  %s4591_s29 = sshll.u32 %s4680_s1, 4  ;;  %s4592_s29 = int_to_ptr.vmem [resolvable:$false] %s4591_s29 }
  0x77   : > { %s4593_s2 = scalar_lea.vmem %s4592_s29, 256  ;;  %p4594_p2 = scmp.lt.s32.totalorder %s276_s7, %s4592_s29 }
  0x78   : > { %p4589_p12 = pnand %p4587_p13, %p4779_p7  ;;  %p4595_p6 = scmp.lt.s32.totalorder %s4593_s2, %s4586_s30 }
  0x7a   : > { %p4590_p3 = pneg %p4589_p12  ;;  %p4596_p5 = por %p4595_p6, %p4594_p2 }
  0x7c   : > { %p4597_p0 = pnand %p4596_p5, %p4590_p3 }
  0x7e   : > { %4600 = shalt.err (!%p4597_p0)
}
  0x7f   : > { %p6453_p1 = scmp.ne.s32.totalorder %s6443_s8, 0  ;;  %p6454_p11 = scmp.ne.s32.totalorder %s6447_s12, 0 }
  0x81   : > { %4170 = dma.hbm_to_vmem [thread:$0]  (!%p6453_p1), %s4900_s16, 128, %s276_s7, %s4773_s15  }
  0x82   : > { %284 = sbr.rel (%p6454_p11) target bundleno = 2893 (0xb4d), region = 44 }
  0x89   : > { %s286_s17 = sand.u32 1, %s4665_s22   ;;  %p6455_p7 = scmp.ne.s32.totalorder %s6446_s20, 0 }
  0x8a   : > { %s4142_s28 = smul.u32 640, %s286_s17  ;;  %s287_s9 = scalar_lea.sflag [#allocation4], %s286_s17 }
  0x8c   : > { %s4923_s11 = scalar_lea.vmem [#allocation3], %s4142_s28 }
  0x8d   : > { %4644 = dma.done.wait (%p6455_p7), %s287_s9, 10240  }
  0x8e   : > { %4646 = vsyncadd (%p6455_p7), %s287_s9, 4294957056  ;;  %s295_s8 = sand.u32 1, %s4807_s19   ;;  %s4930_s15 = scalar_lea.vmem [#allocation6], %s4142_s28 }
  0x8f   : > { %s296_s14 = scalar_lea.sflag [#allocation7], %s295_s8 }
  0x90   : > { %4648 = dma.done.wait (%p6455_p7), %s296_s14, 10368  }
  0x91   : > { %4650 = vsyncadd (%p6455_p7), %s296_s14, 4294956928  ;;  %s3874_s12 = sshll.u32 %s286_s17, 3  ;;  %p6456_p5 = scmp.eq.s32.totalorder %s4807_s19, 0 }
  0x92   : > { %s4936_s16 = scalar_lea.vmem [#allocation8], %s3874_s12 }
  0x93   : > { %4652 = dma.done.wait (%p6456_p5), [#allocation10], 16   ;;  %p6457_p4 = pmov %p6456_p5 }
  0x94   : > { %p6458_p8 = scmp.ne.s32.totalorder %s4807_s19, 0 }
  0x95   : > { %4654 = vsyncadd (%p6457_p4), [#allocation10], 4294967280  ;;  %v4214_v0 = vld [vmem:[%s6265_s0] ss:$8 sps:$4 sm:$0xff] (!%p6458_p8)   ;;  %vm364_vm0 = vcmask (!%p6458_p8), 261120  }
  0x96   : > { %350 = sbr.rel (%p6458_p8) target bundleno = 157 (0x9d), region = 64  ;;  %v4216_v1 = vld [vmem:[%s6265_s0 + $0x4] ss:$8 sps:$4 sm:$0xff] (!%p6458_p8)   ;;  %363 = vst [vmem:[#allocation2] sm:$0xff] (!%p6458_p8), %v4214_v0 }
  0x97   : > { %365 = vst.msk [vmem:[#allocation2 + $0x8] sm:$0xff] (!%p6458_p8), %vm364_vm0, %v4216_v1 }
  0x9d PF: > { %v368_v2 = vld [vmem:[%s4923_s11] sm:$0xff]  ;;  %v369_v4 = vld [vmem:[%s4923_s11 + $0x8] sm:$0xff]  ;;  %vm890_vm1 = vcmask 261120   ;;  %p4119_p10 = scmp.ge.s32.totalorder %s4807_s19, 5 }
  0x9e   : > { %v372_v3 = vld [vmem:[%s4923_s11 + $0x20] sm:$0xff]  ;;  %v373_v6 = vld [vmem:[%s4923_s11 + $0x28] sm:$0xff]  ;;  %v4970_v39 = vld [vmem:[#allocation2 + $0x8] sm:$0xff]  ;;  %vm3573_vm2 = vcmask (!%p4119_p10), 1040384   ;;  %vm3579_vm3 = vcmask (!%p4119_p10), 1041408   ;;  %vm3584_vm4 = vcmask (!%p4119_p10), 1042432  }
  0x9f   : > { %v3880_v5 = vcombine.high %v368_v2, %v372_v3  ;;  %v3879_v7 = vcombine.low %v368_v2, %v372_v3  ;;  %v376_v8 = vld [vmem:[%s4923_s11 + $0x40] sm:$0xff]  ;;  %v3882_v10 = vcombine.high %v369_v4, %v373_v6  ;;  %v3881_v11 = vcombine.low %v369_v4, %v373_v6  ;;  %v377_v13 = vld [vmem:[%s4923_s11 + $0x48] sm:$0xff]  ;;  %3959 = vmatprep.mubr.msk.bf16.mxu0 %vm890_vm1, %v4970_v39 }
  0xa0   : > { %v380_v9 = vld [vmem:[%s4923_s11 + $0x60] sm:$0xff]  ;;  %v381_v14 = vld [vmem:[%s4923_s11 + $0x68] sm:$0xff]  ;;  %3960 = vmatprep.mubr.msk.bf16.mxu1 %vm890_vm1, %v4970_v39  ;;  %vm3589_vm5 = vcmask (!%p4119_p10), 1043456   ;;  %vm3594_vm6 = vcmask (!%p4119_p10), 1044480   ;;  %vm3599_vm7 = vcmask (!%p4119_p10), 1045504   ;;  %vm3604_vm8 = vcmask (!%p4119_p10), 1046528  }
  0xa1   : > { %v3888_v12 = vcombine.high %v376_v8, %v380_v9  ;;  %v384_v15 = vld [vmem:[%s4923_s11 + $0x80] sm:$0xff]  ;;  %894 = vmatprep.subr.bf16.mxu0 %v3880_v5  ;;  %v3890_v16 = vcombine.high %v377_v13, %v381_v14  ;;  %v385_v18 = vld [vmem:[%s4923_s11 + $0x88] sm:$0xff]  ;;  %937 = vmatprep.subr.bf16.mxu1 %v3882_v10  ;;  %v3887_v20 = vcombine.low %v376_v8, %v380_v9 }
  0xa2   : > { %v388_v17 = vld [vmem:[%s4923_s11 + $0xa0] sm:$0xff]  ;;  %v389_v19 = vld [vmem:[%s4923_s11 + $0xa8] sm:$0xff]  ;;  %895 = vmatpush1.bf16.msra.mxu0 %v3879_v7  ;;  %938 = vmatpush1.bf16.msra.mxu1 %v3881_v11  ;;  %v3889_v21 = vcombine.low %v377_v13, %v381_v14 }
  0xa3   : > { %896 = vmatprep.subr.bf16.mxu0 %v3888_v12  ;;  %v3896_v22 = vcombine.high %v384_v15, %v388_v17  ;;  %939 = vmatprep.subr.bf16.mxu1 %v3890_v16  ;;  %v3898_v23 = vcombine.high %v385_v18, %v389_v19  ;;  %v392_v24 = vld [vmem:[%s4923_s11 + $0xc0] sm:$0xff]  ;;  %v393_v26 = vld [vmem:[%s4923_s11 + $0xc8] sm:$0xff]  ;;  %v3895_v28 = vcombine.low %v384_v15, %v388_v17  ;;  %v370_v17 = vld [vmem:[%s4923_s11 + $0x10] sm:$0xff] }
  0xa4   : > { %v396_v25 = vld [vmem:[%s4923_s11 + $0xe0] sm:$0xff]  ;;  %v397_v27 = vld [vmem:[%s4923_s11 + $0xe8] sm:$0xff]  ;;  %v3897_v29 = vcombine.low %v385_v18, %v389_v19  ;;  %v374_v18 = vld [vmem:[%s4923_s11 + $0x30] sm:$0xff] }
  0xa5   : > { %v3904_v30 = vcombine.high %v392_v24, %v396_v25  ;;  %v3906_v31 = vcombine.high %v393_v26, %v397_v27  ;;  %v400_v32 = vld [vmem:[%s4923_s11 + $0x100] sm:$0xff]  ;;  %v401_v34 = vld [vmem:[%s4923_s11 + $0x108] sm:$0xff]  ;;  %v3903_v36 = vcombine.low %v392_v24, %v396_v25  ;;  %v3905_v37 = vcombine.low %v393_v26, %v397_v27  ;;  %v371_v19 = vld [vmem:[%s4923_s11 + $0x18] sm:$0xff] }
  0xa6   : > { %897 = vmatpush1.bf16.msra.mxu0 %v3887_v20  ;;  %940 = vmatpush1.bf16.msra.mxu1 %v3889_v21  ;;  %v404_v33 = vld [vmem:[%s4923_s11 + $0x120] sm:$0xff]  ;;  %v405_v35 = vld [vmem:[%s4923_s11 + $0x128] sm:$0xff]  ;;  %v375_v20 = vld [vmem:[%s4923_s11 + $0x38] sm:$0xff] }
  0xa7   : > { %898 = vmatprep.subr.bf16.mxu0 %v3896_v22  ;;  %941 = vmatprep.subr.bf16.mxu1 %v3898_v23  ;;  %v3912_v38 = vcombine.high %v400_v32, %v404_v33  ;;  %v3914_v40 = vcombine.high %v401_v34, %v405_v35  ;;  %v408_v41 = vld [vmem:[%s4923_s11 + $0x140] sm:$0xff]  ;;  %v409_v43 = vld [vmem:[%s4923_s11 + $0x148] sm:$0xff]  ;;  %v3911_v45 = vcombine.low %v400_v32, %v404_v33  ;;  %v378_v25 = vld [vmem:[%s4923_s11 + $0x50] sm:$0xff] }
  0xa8   : > { %v412_v42 = vld [vmem:[%s4923_s11 + $0x160] sm:$0xff]  ;;  %v413_v44 = vld [vmem:[%s4923_s11 + $0x168] sm:$0xff]  ;;  %v3913_v46 = vcombine.low %v401_v34, %v405_v35  ;;  %v3884_v23 = vcombine.high %v370_v17, %v374_v18  ;;  %v3886_v24 = vcombine.high %v371_v19, %v375_v20  ;;  %v382_v26 = vld [vmem:[%s4923_s11 + $0x70] sm:$0xff] }
  0xa9   : > { %v3920_v47 = vcombine.high %v408_v41, %v412_v42  ;;  %v3922_v48 = vcombine.high %v409_v43, %v413_v44  ;;  %v416_v49 = vld [vmem:[%s4923_s11 + $0x180] sm:$0xff]  ;;  %v417_v51 = vld [vmem:[%s4923_s11 + $0x188] sm:$0xff]  ;;  %v3919_v53 = vcombine.low %v408_v41, %v412_v42  ;;  %v3921_v54 = vcombine.low %v409_v43, %v413_v44  ;;  %v379_v27 = vld [vmem:[%s4923_s11 + $0x58] sm:$0xff] }
  0xaa   : > { %899 = vmatpush1.bf16.msra.mxu0 %v3895_v28  ;;  %942 = vmatpush1.bf16.msra.mxu1 %v3897_v29  ;;  %v420_v50 = vld [vmem:[%s4923_s11 + $0x1a0] sm:$0xff]  ;;  %v421_v52 = vld [vmem:[%s4923_s11 + $0x1a8] sm:$0xff]  ;;  %v383_v28 = vld [vmem:[%s4923_s11 + $0x78] sm:$0xff]  ;;  %v3892_v32 = vcombine.high %v378_v25, %v382_v26 }
  0xab   : > { %900 = vmatprep.subr.bf16.mxu0 %v3904_v30  ;;  %943 = vmatprep.subr.bf16.mxu1 %v3906_v31  ;;  %v3928_v55 = vcombine.high %v416_v49, %v420_v50  ;;  %v3930_v56 = vcombine.high %v417_v51, %v421_v52  ;;  %v424_v57 = vld [vmem:[%s4923_s11 + $0x1c0] sm:$0xff]  ;;  %v425_v59 = vld [vmem:[%s4923_s11 + $0x1c8] sm:$0xff]  ;;  %v3927_v61 = vcombine.low %v416_v49, %v420_v50  ;;  %v5004_v29 = vld [vmem:[#allocation2] sm:$0xff] }
  0xac   : > { %v428_v58 = vld [vmem:[%s4923_s11 + $0x1e0] sm:$0xff]  ;;  %v429_v60 = vld [vmem:[%s4923_s11 + $0x1e8] sm:$0xff]  ;;  %v3929_v62 = vcombine.low %v417_v51, %v421_v52  ;;  %v3883_v30 = vcombine.low %v370_v17, %v374_v18  ;;  %v3885_v31 = vcombine.low %v371_v19, %v375_v20  ;;  %v3894_v33 = vcombine.high %v379_v27, %v383_v28  ;;  %v386_v34 = vld [vmem:[%s4923_s11 + $0x90] sm:$0xff] }
  0xad   : > { %v3936_v63 = vcombine.high %v424_v57, %v428_v58  ;;  %v3938_v0 = vcombine.high %v425_v59, %v429_v60  ;;  %v432_v1 = vld [vmem:[%s4923_s11 + $0x200] sm:$0xff]  ;;  %v433_v3 = vld [vmem:[%s4923_s11 + $0x208] sm:$0xff]  ;;  %v3935_v5 = vcombine.low %v424_v57, %v428_v58  ;;  %v3937_v6 = vcombine.low %v425_v59, %v429_v60  ;;  %v390_v35 = vld [vmem:[%s4923_s11 + $0xb0] sm:$0xff] }
  0xae   : > { %901 = vmatpush1.bf16.msra.mxu0 %v3903_v36  ;;  %944 = vmatpush1.bf16.msra.mxu1 %v3905_v37  ;;  %v436_v2 = vld [vmem:[%s4923_s11 + $0x220] sm:$0xff]  ;;  %v437_v4 = vld [vmem:[%s4923_s11 + $0x228] sm:$0xff]  ;;  %v387_v36 = vld [vmem:[%s4923_s11 + $0x98] sm:$0xff]  ;;  %v3900_v41 = vcombine.high %v386_v34, %v390_v35 }
  0xaf   : > { %902 = vmatprep.subr.bf16.mxu0 %v3912_v38  ;;  %945 = vmatprep.subr.bf16.mxu1 %v3914_v40  ;;  %v3944_v7 = vcombine.high %v432_v1, %v436_v2  ;;  %v3946_v8 = vcombine.high %v433_v3, %v437_v4  ;;  %v440_v9 = vld [vmem:[%s4923_s11 + $0x240] sm:$0xff]  ;;  %v441_v11 = vld [vmem:[%s4923_s11 + $0x248] sm:$0xff]  ;;  %v3943_v13 = vcombine.low %v432_v1, %v436_v2  ;;  %v391_v37 = vld [vmem:[%s4923_s11 + $0xb8] sm:$0xff] }
  0xb0   : > { %v444_v10 = vld [vmem:[%s4923_s11 + $0x260] sm:$0xff]  ;;  %v445_v12 = vld [vmem:[%s4923_s11 + $0x268] sm:$0xff]  ;;  %v3945_v14 = vcombine.low %v433_v3, %v437_v4  ;;  %v3891_v38 = vcombine.low %v378_v25, %v382_v26  ;;  %v3893_v40 = vcombine.low %v379_v27, %v383_v28  ;;  %v3902_v42 = vcombine.high %v387_v36, %v391_v37  ;;  %v394_v43 = vld [vmem:[%s4923_s11 + $0xd0] sm:$0xff] }
  0xb1   : > { %v3952_v15 = vcombine.high %v440_v9, %v444_v10  ;;  %v3954_v16 = vcombine.high %v441_v11, %v445_v12  ;;  %v3951_v21 = vcombine.low %v440_v9, %v444_v10  ;;  %v3953_v22 = vcombine.low %v441_v11, %v445_v12  ;;  %v398_v44 = vld [vmem:[%s4923_s11 + $0xf0] sm:$0xff]  ;;  %v411_v60 = vld [vmem:[%s4923_s11 + $0x158] sm:$0xff] }
  0xb2   : > { %903 = vmatpush1.bf16.msra.mxu0 %v3911_v45  ;;  %946 = vmatpush1.bf16.msra.mxu1 %v3913_v46  ;;  %v395_v45 = vld [vmem:[%s4923_s11 + $0xd8] sm:$0xff]  ;;  %v3908_v49 = vcombine.high %v394_v43, %v398_v44  ;;  %v402_v51 = vld [vmem:[%s4923_s11 + $0x110] sm:$0xff] }
  0xb3   : > { %904 = vmatprep.subr.bf16.mxu0 %v3920_v47  ;;  %947 = vmatprep.subr.bf16.mxu1 %v3922_v48  ;;  %v399_v46 = vld [vmem:[%s4923_s11 + $0xf8] sm:$0xff]  ;;  %v3899_v47 = vcombine.low %v386_v34, %v390_v35  ;;  %v3901_v48 = vcombine.low %v387_v36, %v391_v37  ;;  %v406_v52 = vld [vmem:[%s4923_s11 + $0x130] sm:$0xff]  ;;  %v1066_v35 = vld [vmem:[%s4930_s15] sm:$0xff] }
  0xb4   : > { %v3910_v50 = vcombine.high %v395_v45, %v399_v46  ;;  %v410_v58 = vld [vmem:[%s4923_s11 + $0x150] sm:$0xff]  ;;  %v419_v4 = vld [vmem:[%s4923_s11 + $0x198] sm:$0xff]  ;;  %v1070_v36 = vld [vmem:[%s4930_s15 + $0x20] sm:$0xff] }
  0xb5   : > { %v414_v59 = vld [vmem:[%s4923_s11 + $0x170] sm:$0xff]  ;;  %v427_v12 = vld [vmem:[%s4923_s11 + $0x1d8] sm:$0xff]  ;;  %v1067_v37 = vld [vmem:[%s4930_s15 + $0x8] sm:$0xff] }
  0xb6   : > { %905 = vmatpush1.bf16.msra.mxu0 %v3919_v53  ;;  %948 = vmatpush1.bf16.msra.mxu1 %v3921_v54  ;;  %v403_v53 = vld [vmem:[%s4923_s11 + $0x118] sm:$0xff]  ;;  %v418_v2 = vld [vmem:[%s4923_s11 + $0x190] sm:$0xff] }
  0xb7   : > { %906 = vmatprep.subr.bf16.mxu0 %v3928_v55  ;;  %949 = vmatprep.subr.bf16.mxu1 %v3930_v56  ;;  %v407_v54 = vld [vmem:[%s4923_s11 + $0x138] sm:$0xff]  ;;  %v3907_v55 = vcombine.low %v394_v43, %v398_v44  ;;  %v3916_v56 = vcombine.high %v402_v51, %v406_v52  ;;  %v422_v3 = vld [vmem:[%s4923_s11 + $0x1b0] sm:$0xff]  ;;  %v1074_v44 = vld [vmem:[%s4930_s15 + $0x40] sm:$0xff] }
  0xb8   : > { %v3918_v57 = vcombine.high %v403_v53, %v407_v54  ;;  %v426_v10 = vld [vmem:[%s4923_s11 + $0x1d0] sm:$0xff]  ;;  %v435_v20 = vld [vmem:[%s4923_s11 + $0x218] sm:$0xff] }
  0xb9   : > { %v430_v11 = vld [vmem:[%s4923_s11 + $0x1f0] sm:$0xff]  ;;  %v443_v28 = vld [vmem:[%s4923_s11 + $0x258] sm:$0xff] }
  0xba   : > { %907 = vmatpush1.bf16.msra.mxu0 %v3927_v61  ;;  %950 = vmatpush1.bf16.msra.mxu1 %v3929_v62  ;;  %v415_v61 = vld [vmem:[%s4923_s11 + $0x178] sm:$0xff]  ;;  %v3915_v62 = vcombine.low %v402_v51, %v406_v52  ;;  %v434_v18 = vld [vmem:[%s4923_s11 + $0x210] sm:$0xff]  ;;  %v1082_v52 = vld [vmem:[%s4930_s15 + $0x80] sm:$0xff] }
  0xbb   : > { %908 = vmatprep.subr.bf16.mxu0 %v3936_v63  ;;  %951 = vmatprep.subr.bf16.mxu1 %v3938_v0  ;;  %v3917_v63 = vcombine.low %v403_v53, %v407_v54  ;;  %v3924_v0 = vcombine.high %v410_v58, %v414_v59  ;;  %v3926_v1 = vcombine.high %v411_v60, %v415_v61  ;;  %v438_v19 = vld [vmem:[%s4923_s11 + $0x230] sm:$0xff]  ;;  %v1086_v53 = vld [vmem:[%s4930_s15 + $0xa0] sm:$0xff]  ;;  %v1083_v54 = vld [vmem:[%s4930_s15 + $0x88] sm:$0xff] }
  0xbc   : > { %v442_v26 = vld [vmem:[%s4923_s11 + $0x250] sm:$0xff] }
  0xbd   : > { %v446_v27 = vld [vmem:[%s4923_s11 + $0x270] sm:$0xff] }
  0xbe   : > { %909 = vmatpush1.bf16.msra.mxu0 %v3935_v5  ;;  %952 = vmatpush1.bf16.msra.mxu1 %v3937_v6  ;;  %v423_v5 = vld [vmem:[%s4923_s11 + $0x1b8] sm:$0xff]  ;;  %v3923_v6 = vcombine.low %v410_v58, %v414_v59  ;;  %v1090_v59 = vld [vmem:[%s4930_s15 + $0xc0] sm:$0xff] }
  0xbf   : > { %910 = vmatprep.subr.bf16.mxu0 %v3944_v7  ;;  %953 = vmatprep.subr.bf16.mxu1 %v3946_v8  ;;  %v3925_v7 = vcombine.low %v411_v60, %v415_v61  ;;  %v3932_v8 = vcombine.high %v418_v2, %v422_v3  ;;  %v3934_v9 = vcombine.high %v419_v4, %v423_v5  ;;  %v6279_v60 = vmov 0   ;;  %v1091_v61 = vld [vmem:[%s4930_s15 + $0xc8] sm:$0xff] }
  0xc2   : > { %911 = vmatpush1.bf16.msra.mxu0 %v3943_v13  ;;  %954 = vmatpush1.bf16.msra.mxu1 %v3945_v14  ;;  %v431_v13 = vld [vmem:[%s4923_s11 + $0x1f8] sm:$0xff]  ;;  %v3931_v14 = vcombine.low %v418_v2, %v422_v3  ;;  %v1098_v3 = vld [vmem:[%s4930_s15 + $0x100] sm:$0xff] }
  0xc3   : > { %912 = vmatprep.subr.bf16.mxu0 %v3952_v15  ;;  %955 = vmatprep.subr.bf16.mxu1 %v3954_v16  ;;  %v3933_v15 = vcombine.low %v419_v4, %v423_v5  ;;  %v3940_v16 = vcombine.high %v426_v10, %v430_v11  ;;  %v3942_v17 = vcombine.high %v427_v12, %v431_v13  ;;  %v1102_v4 = vld [vmem:[%s4930_s15 + $0x120] sm:$0xff]  ;;  %v1099_v5 = vld [vmem:[%s4930_s15 + $0x108] sm:$0xff] }
  0xc6   : > { %913 = vmatpush1.bf16.msra.mxu0 %v3951_v21  ;;  %956 = vmatpush1.bf16.msra.mxu1 %v3953_v22  ;;  %v439_v21 = vld [vmem:[%s4923_s11 + $0x238] sm:$0xff]  ;;  %v3939_v22 = vcombine.low %v426_v10, %v430_v11  ;;  %v1106_v11 = vld [vmem:[%s4930_s15 + $0x140] sm:$0xff] }
  0xc7   : > { %980 = vmatprep.subr.bf16.mxu0 %v3884_v23  ;;  %1023 = vmatprep.subr.bf16.mxu1 %v3886_v24  ;;  %v3941_v23 = vcombine.low %v427_v12, %v431_v13  ;;  %v3948_v24 = vcombine.high %v434_v18, %v438_v19  ;;  %v3950_v25 = vcombine.high %v435_v20, %v439_v21  ;;  %v1110_v12 = vld [vmem:[%s4930_s15 + $0x160] sm:$0xff]  ;;  %v1107_v13 = vld [vmem:[%s4930_s15 + $0x148] sm:$0xff] }
  0xc9   : > { %927 = vmatmul.mubr.bf16.vlgmr.msra.gmra.mrb[0].mxu0 %v5004_v29  ;;  %970 = vmatmul.mubr.bf16.vlgmr.msra.gmra.mrb[0].mxu1 %v5004_v29 }
  0xca   : > { %981 = vmatpush1.bf16.msra.mxu0 %v3883_v30  ;;  %1024 = vmatpush1.bf16.msra.mxu1 %v3885_v31  ;;  %v447_v30 = vld [vmem:[%s4923_s11 + $0x278] sm:$0xff]  ;;  %v3947_v31 = vcombine.low %v434_v18, %v438_v19  ;;  %v1114_v19 = vld [vmem:[%s4930_s15 + $0x180] sm:$0xff] }
  0xcb   : > { %982 = vmatprep.subr.bf16.mxu0 %v3892_v32  ;;  %1025 = vmatprep.subr.bf16.mxu1 %v3894_v33  ;;  %v3949_v32 = vcombine.low %v435_v20, %v439_v21  ;;  %v3956_v33 = vcombine.high %v442_v26, %v446_v27  ;;  %v3958_v34 = vcombine.high %v443_v28, %v447_v30  ;;  %v1118_v20 = vld [vmem:[%s4930_s15 + $0x1a0] sm:$0xff]  ;;  %v1115_v21 = vld [vmem:[%s4930_s15 + $0x188] sm:$0xff] }
  0xcc   : > { %3961 = vmatprep.mubr.msk.bf16.mxu0 %vm890_vm1, %v4970_v39  ;;  %3962 = vmatprep.mubr.msk.bf16.mxu1 %vm890_vm1, %v4970_v39  ;;  %v3909_v39 = vcombine.low %v395_v45, %v399_v46  ;;  %v1078_v45 = vld [vmem:[%s4930_s15 + $0x60] sm:$0xff]  ;;  %v1075_v46 = vld [vmem:[%s4930_s15 + $0x48] sm:$0xff] }
  0xce   : > { %983 = vmatpush1.bf16.msra.mxu0 %v3891_v38  ;;  %1026 = vmatpush1.bf16.msra.mxu1 %v3893_v40  ;;  %v1071_v38 = vld [vmem:[%s4930_s15 + $0x28] sm:$0xff]  ;;  %v3955_v40 = vcombine.low %v442_v26, %v446_v27  ;;  %v1122_v27 = vld [vmem:[%s4930_s15 + $0x1c0] sm:$0xff] }
  0xcf   : > { %984 = vmatprep.subr.bf16.mxu0 %v3900_v41  ;;  %1027 = vmatprep.subr.bf16.mxu1 %v3902_v42  ;;  %v3957_v41 = vcombine.low %v443_v28, %v447_v30  ;;  %v5048_v42 = vcombine.high %v1066_v35, %v1070_v36  ;;  %v5050_v43 = vcombine.high %v1067_v37, %v1071_v38  ;;  %v1126_v28 = vld [vmem:[%s4930_s15 + $0x1e0] sm:$0xff]  ;;  %v1123_v30 = vld [vmem:[%s4930_s15 + $0x1c8] sm:$0xff] }
  0xd1   : > { %6459 = vst [vmem:[#allocation17_spill] sm:$0xff] %v5048_v42  ;;  %6460 = vst [vmem:[#allocation18_spill] sm:$0xff] %v5050_v43 }
  0xd2   : > { %985 = vmatpush1.bf16.msra.mxu0 %v3899_v47  ;;  %1028 = vmatpush1.bf16.msra.mxu1 %v3901_v48  ;;  %v1079_v47 = vld [vmem:[%s4930_s15 + $0x68] sm:$0xff]  ;;  %v5056_v48 = vcombine.low %v1066_v35, %v1070_v36  ;;  %v1130_v36 = vld [vmem:[%s4930_s15 + $0x200] sm:$0xff] }
  0xd3   : > { %986 = vmatprep.subr.bf16.mxu0 %v3908_v49  ;;  %1029 = vmatprep.subr.bf16.mxu1 %v3910_v50  ;;  %v5059_v49 = vcombine.low %v1067_v37, %v1071_v38  ;;  %v5061_v50 = vcombine.high %v1074_v44, %v1078_v45  ;;  %v5064_v51 = vcombine.high %v1075_v46, %v1079_v47  ;;  %v1134_v37 = vld [vmem:[%s4930_s15 + $0x220] sm:$0xff]  ;;  %v1131_v38 = vld [vmem:[%s4930_s15 + $0x208] sm:$0xff] }
  0xd4   : > { %6461 = vst [vmem:[#allocation19_spill] sm:$0xff] %v5056_v48 }
  0xd5   : > { %6462 = vst [vmem:[#allocation20_spill] sm:$0xff] %v5059_v49  ;;  %6463 = vst [vmem:[#allocation21_spill] sm:$0xff] %v5061_v50 }
  0xd6   : > { %987 = vmatpush1.bf16.msra.mxu0 %v3907_v55  ;;  %1030 = vmatpush1.bf16.msra.mxu1 %v3909_v39  ;;  %6464 = vst [vmem:[#allocation22_spill] sm:$0xff] %v5064_v51  ;;  %v1087_v55 = vld [vmem:[%s4930_s15 + $0xa8] sm:$0xff]  ;;  %v5073_v39 = vcombine.low %v1074_v44, %v1078_v45  ;;  %v5177_v45 = vcombine.high %v1130_v36, %v1134_v37 }
  0xd7   : > { %988 = vmatprep.subr.bf16.mxu0 %v3916_v56  ;;  %1031 = vmatprep.subr.bf16.mxu1 %v3918_v57  ;;  %v5077_v56 = vcombine.low %v1075_v46, %v1079_v47  ;;  %v5079_v57 = vcombine.high %v1082_v52, %v1086_v53  ;;  %v5082_v58 = vcombine.high %v1083_v54, %v1087_v55  ;;  %v1138_v47 = vld [vmem:[%s4930_s15 + $0x240] sm:$0xff] }
  0xd8   : > { %6465 = vst [vmem:[#allocation23_spill] sm:$0xff] %v5073_v39  ;;  %6491 = vst [vmem:[#allocation49_spill] sm:$0xff] %v5177_v45 }
  0xd9   : > { %6466 = vst [vmem:[#allocation24_spill] sm:$0xff] %v5077_v56  ;;  %6467 = vst [vmem:[#allocation25_spill] sm:$0xff] %v5079_v57 }
  0xda   : > { %989 = vmatpush1.bf16.msra.mxu0 %v3915_v62  ;;  %1032 = vmatpush1.bf16.msra.mxu1 %v3917_v63  ;;  %6468 = vst [vmem:[#allocation26_spill] sm:$0xff] %v5082_v58  ;;  %v1095_v62 = vld [vmem:[%s4930_s15 + $0xe8] sm:$0xff]  ;;  %v5091_v63 = vcombine.low %v1082_v52, %v1086_v53  ;;  %v1142_v52 = vld [vmem:[%s4930_s15 + $0x260] sm:$0xff] }
  0xdb   : > { %990 = vmatprep.subr.bf16.mxu0 %v3924_v0  ;;  %1033 = vmatprep.subr.bf16.mxu1 %v3926_v1  ;;  %v5095_v0 = vcombine.low %v1083_v54, %v1087_v55  ;;  %v5100_v2 = vcombine.high %v1091_v61, %v1095_v62  ;;  %v1139_v53 = vld [vmem:[%s4930_s15 + $0x248] sm:$0xff]  ;;  %v5187_v55 = vcombine.low %v1130_v36, %v1134_v37  ;;  %v1088_v36 = vld [vmem:[%s4930_s15 + $0xb0] sm:$0xff]  ;;  %v1085_v37 = vld [vmem:[%s4930_s15 + $0x98] sm:$0xff] }
  0xdc   : > { %6469 = vst [vmem:[#allocation27_spill] sm:$0xff] %v5091_v63  ;;  %v1143_v54 = vld [vmem:[%s4930_s15 + $0x268] sm:$0xff] }
  0xdd   : > { %6470 = vst [vmem:[#allocation28_spill] sm:$0xff] %v5095_v0  ;;  %6472 = vst [vmem:[#allocation30_spill] sm:$0xff] %v5100_v2 }
  0xde   : > { %991 = vmatpush1.bf16.msra.mxu0 %v3923_v6  ;;  %1034 = vmatpush1.bf16.msra.mxu1 %v3925_v7  ;;  %v1103_v6 = vld [vmem:[%s4930_s15 + $0x128] sm:$0xff]  ;;  %6493 = vst [vmem:[#allocation51_spill] sm:$0xff] %v5187_v55 }
  0xdf   : > { %992 = vmatprep.subr.bf16.mxu0 %v3932_v8  ;;  %1035 = vmatprep.subr.bf16.mxu1 %v3934_v9  ;;  %v5111_v8 = vcombine.low %v1091_v61, %v1095_v62  ;;  %v5113_v9 = vcombine.high %v1098_v3, %v1102_v4  ;;  %v5116_v10 = vcombine.high %v1099_v5, %v1103_v6  ;;  %v1068_v62 = vld [vmem:[%s4930_s15 + $0x10] sm:$0xff] }
  0xe0   : > { %v5196_v61 = vcombine.high %v1139_v53, %v1143_v54 }
  0xe1   : > { %6474 = vst [vmem:[#allocation32_spill] sm:$0xff] %v5111_v8  ;;  %6475 = vst [vmem:[#allocation33_spill] sm:$0xff] %v5113_v9 }
  0xe2   : > { %993 = vmatpush1.bf16.msra.mxu0 %v3931_v14  ;;  %1036 = vmatpush1.bf16.msra.mxu1 %v3933_v15  ;;  %6476 = vst [vmem:[#allocation34_spill] sm:$0xff] %v5116_v10  ;;  %v1111_v14 = vld [vmem:[%s4930_s15 + $0x168] sm:$0xff]  ;;  %v5123_v15 = vcombine.low %v1098_v3, %v1102_v4  ;;  %6496 = vst [vmem:[#allocation54_spill] sm:$0xff] %v5196_v61  ;;  %v1072_v3 = vld [vmem:[%s4930_s15 + $0x30] sm:$0xff] }
  0xe3   : > { %994 = vmatprep.subr.bf16.mxu0 %v3940_v16  ;;  %1037 = vmatprep.subr.bf16.mxu1 %v3942_v17  ;;  %v5127_v16 = vcombine.low %v1099_v5, %v1103_v6  ;;  %v5129_v17 = vcombine.high %v1106_v11, %v1110_v12  ;;  %v5132_v18 = vcombine.high %v1107_v13, %v1111_v14  ;;  %v1069_v4 = vld [vmem:[%s4930_s15 + $0x18] sm:$0xff] }
  0xe4   : > { %6477 = vst [vmem:[#allocation35_spill] sm:$0xff] %v5123_v15  ;;  %v1073_v5 = vld [vmem:[%s4930_s15 + $0x38] sm:$0xff]  ;;  %v5203_v6 = vcombine.low %v1138_v47, %v1142_v52 }
  0xe5   : > { %6478 = vst [vmem:[#allocation36_spill] sm:$0xff] %v5127_v16  ;;  %6479 = vst [vmem:[#allocation37_spill] sm:$0xff] %v5129_v17 }
  0xe6   : > { %995 = vmatpush1.bf16.msra.mxu0 %v3939_v22  ;;  %1038 = vmatpush1.bf16.msra.mxu1 %v3941_v23  ;;  %6480 = vst [vmem:[#allocation38_spill] sm:$0xff] %v5132_v18  ;;  %v1119_v22 = vld [vmem:[%s4930_s15 + $0x1a8] sm:$0xff]  ;;  %v5139_v23 = vcombine.low %v1106_v11, %v1110_v12  ;;  %6497 = vst [vmem:[#allocation55_spill] sm:$0xff] %v5203_v6  ;;  %v5207_v11 = vcombine.low %v1139_v53, %v1143_v54  ;;  %v1092_v54 = vld [vmem:[%s4930_s15 + $0xd0] sm:$0xff] }
  0xe7   : > { %996 = vmatprep.subr.bf16.mxu0 %v3948_v24  ;;  %1039 = vmatprep.subr.bf16.mxu1 %v3950_v25  ;;  %v5143_v24 = vcombine.low %v1107_v13, %v1111_v14  ;;  %v5145_v25 = vcombine.high %v1114_v19, %v1118_v20  ;;  %v5148_v26 = vcombine.high %v1115_v21, %v1119_v22  ;;  %v1076_v14 = vld [vmem:[%s4930_s15 + $0x50] sm:$0xff] }
  0xe8   : > { %6481 = vst [vmem:[#allocation39_spill] sm:$0xff] %v5139_v23  ;;  %6498 = vst [vmem:[#allocation56_spill] sm:$0xff] %v5207_v11  ;;  %v5209_v12 = vcombine.high %v1068_v62, %v1072_v3  ;;  %v5212_v13 = vcombine.high %v1069_v4, %v1073_v5 }
  0xe9   : > { %6482 = vst [vmem:[#allocation40_spill] sm:$0xff] %v5143_v24  ;;  %6483 = vst [vmem:[#allocation41_spill] sm:$0xff] %v5145_v25 }
  0xea   : > { %997 = vmatpush1.bf16.msra.mxu0 %v3947_v31  ;;  %1040 = vmatpush1.bf16.msra.mxu1 %v3949_v32  ;;  %6484 = vst [vmem:[#allocation42_spill] sm:$0xff] %v5148_v26  ;;  %v1127_v31 = vld [vmem:[%s4930_s15 + $0x1e8] sm:$0xff]  ;;  %v5155_v32 = vcombine.low %v1114_v19, %v1118_v20  ;;  %6499 = vst [vmem:[#allocation57_spill] sm:$0xff] %v5209_v12  ;;  %v1080_v19 = vld [vmem:[%s4930_s15 + $0x70] sm:$0xff] }
  0xeb   : > { %998 = vmatprep.subr.bf16.mxu0 %v3956_v33  ;;  %1041 = vmatprep.subr.bf16.mxu1 %v3958_v34  ;;  %v5159_v33 = vcombine.low %v1115_v21, %v1119_v22  ;;  %v5161_v34 = vcombine.high %v1122_v27, %v1126_v28  ;;  %v5164_v35 = vcombine.high %v1123_v30, %v1127_v31  ;;  %v1077_v20 = vld [vmem:[%s4930_s15 + $0x58] sm:$0xff] }
  0xec   : > { %6485 = vst [vmem:[#allocation43_spill] sm:$0xff] %v5155_v32  ;;  %v5175_v44 = vcombine.low %v1123_v30, %v1127_v31  ;;  %6500 = vst [vmem:[#allocation58_spill] sm:$0xff] %v5212_v13  ;;  %v1081_v21 = vld [vmem:[%s4930_s15 + $0x78] sm:$0xff]  ;;  %v5219_v22 = vcombine.low %v1068_v62, %v1072_v3  ;;  %v1084_v31 = vld [vmem:[%s4930_s15 + $0x90] sm:$0xff] }
  0xed   : > { %6486 = vst [vmem:[#allocation44_spill] sm:$0xff] %v5159_v33  ;;  %6487 = vst [vmem:[#allocation45_spill] sm:$0xff] %v5161_v34  ;;  %v5228_v30 = vcombine.high %v1077_v20, %v1081_v21  ;;  %v1096_v62 = vld [vmem:[%s4930_s15 + $0xf0] sm:$0xff]  ;;  %v1093_v3 = vld [vmem:[%s4930_s15 + $0xd8] sm:$0xff] }
  0xee   : > { %999 = vmatpush1.bf16.msra.mxu0 %v3955_v40  ;;  %1042 = vmatpush1.bf16.msra.mxu1 %v3957_v41  ;;  %6488 = vst [vmem:[#allocation46_spill] sm:$0xff] %v5164_v35  ;;  %v1135_v40 = vld [vmem:[%s4930_s15 + $0x228] sm:$0xff]  ;;  %v5171_v41 = vcombine.low %v1122_v27, %v1126_v28  ;;  %6490 = vst [vmem:[#allocation48_spill] sm:$0xff] %v5175_v44  ;;  %v5223_v27 = vcombine.low %v1069_v4, %v1073_v5  ;;  %v1097_v4 = vld [vmem:[%s4930_s15 + $0xf8] sm:$0xff] }
  0xef   : > { %1549 = vmatprep.subr.bf16.mxu0 %v5048_v42  ;;  %1590 = vmatprep.subr.bf16.mxu1 %v5050_v43  ;;  %v5180_v46 = vcombine.high %v1131_v38, %v1135_v40  ;;  %v5225_v28 = vcombine.high %v1076_v14, %v1080_v19  ;;  %6502 = vst [vmem:[#allocation60_spill] sm:$0xff] %v5228_v30 }
  0xf0   : > { %6489 = vst [vmem:[#allocation47_spill] sm:$0xff] %v5171_v41  ;;  %v5255_v5 = vcombine.low %v1084_v31, %v1088_v36 }
  0xf1   : > { %1013 = vmatmul.mubr.bf16.vlgmr.msra.gmra.mrb[4].mxu0 %v5004_v29  ;;  %1056 = vmatmul.mubr.bf16.vlgmr.msra.gmra.mrb[4].mxu1 %v5004_v29  ;;  %v1094_v29 = vld [vmem:[%s4930_s15 + $0xe0] sm:$0xff]  ;;  %6492 = vst [vmem:[#allocation50_spill] sm:$0xff] %v5180_v46  ;;  %6501 = vst [vmem:[#allocation59_spill] sm:$0xff] %v5225_v28 }
  0xf2   : > { %1550 = vmatpush1.bf16.msra.mxu0 %v5056_v48  ;;  %1591 = vmatpush1.bf16.msra.mxu1 %v5059_v49  ;;  %v5097_v1 = vcombine.high %v1090_v59, %v1094_v29  ;;  %v5107_v7 = vcombine.low %v1090_v59, %v1094_v29  ;;  %v5191_v59 = vcombine.low %v1131_v38, %v1135_v40  ;;  %v1089_v38 = vld [vmem:[%s4930_s15 + $0xb8] sm:$0xff] }
  0xf3   : > { %1551 = vmatprep.subr.bf16.mxu0 %v5061_v50  ;;  %1592 = vmatprep.subr.bf16.mxu1 %v5064_v51  ;;  %v5193_v29 = vcombine.high %v1138_v47, %v1142_v52  ;;  %v5237_v40 = vcombine.low %v1076_v14, %v1080_v19  ;;  %v5241_v47 = vcombine.low %v1077_v20, %v1081_v21  ;;  %v1100_v21 = vld [vmem:[%s4930_s15 + $0x110] sm:$0xff] }
  0xf4   : > { %1581 = vmatprep.mubr.bf16.mxu0 %v6279_v60  ;;  %1622 = vmatprep.mubr.bf16.mxu1 %v6279_v60  ;;  %6471 = vst [vmem:[#allocation29_spill] sm:$0xff] %v5097_v1  ;;  %6473 = vst [vmem:[#allocation31_spill] sm:$0xff] %v5107_v7  ;;  %v5243_v52 = vcombine.high %v1084_v31, %v1088_v36  ;;  %v5246_v53 = vcombine.high %v1085_v37, %v1089_v38  ;;  %v1101_v31 = vld [vmem:[%s4930_s15 + $0x118] sm:$0xff] }
  0xf5   : > { %6494 = vst [vmem:[#allocation52_spill] sm:$0xff] %v5191_v59  ;;  %6495 = vst [vmem:[#allocation53_spill] sm:$0xff] %v5193_v29  ;;  %v5259_v14 = vcombine.low %v1085_v37, %v1089_v38  ;;  %v5261_v19 = vcombine.high %v1092_v54, %v1096_v62  ;;  %v5264_v20 = vcombine.high %v1093_v3, %v1097_v4  ;;  %v1105_v36 = vld [vmem:[%s4930_s15 + $0x138] sm:$0xff] }
  0xf6   : > { %1552 = vmatpush1.bf16.msra.mxu0 %v5073_v39  ;;  %1593 = vmatpush1.bf16.msra.mxu1 %v5077_v56  ;;  %6503 = vst [vmem:[#allocation61_spill] sm:$0xff] %v5237_v40  ;;  %6504 = vst [vmem:[#allocation62_spill] sm:$0xff] %v5241_v47  ;;  %v5275_v37 = vcombine.low %v1093_v3, %v1097_v4  ;;  %v5291_v3 = vcombine.low %v1101_v31, %v1105_v36 }
  0xf7   : > { %1553 = vmatprep.subr.bf16.mxu0 %v5079_v57  ;;  %1594 = vmatprep.subr.bf16.mxu1 %v5082_v58  ;;  %6505 = vst [vmem:[#allocation63_spill] sm:$0xff] %v5243_v52  ;;  %6506 = vst [vmem:[#allocation64_spill] sm:$0xff] %v5246_v53 }
  0xf8   : > { %6507 = vst [vmem:[#allocation65_spill] sm:$0xff] %v5255_v5  ;;  %6508 = vst [vmem:[#allocation66_spill] sm:$0xff] %v5259_v14 }
  0xf9   : > { %6509 = vst [vmem:[#allocation67_spill] sm:$0xff] %v5261_v19  ;;  %6510 = vst [vmem:[#allocation68_spill] sm:$0xff] %v5264_v20 }
  0xfa   : > { %1554 = vmatpush1.bf16.msra.mxu0 %v5091_v63  ;;  %1595 = vmatpush1.bf16.msra.mxu1 %v5095_v0  ;;  %6512 = vst [vmem:[#allocation70_spill] sm:$0xff] %v5275_v37  ;;  %6516 = vst [vmem:[#allocation74_spill] sm:$0xff] %v5291_v3 }
  0xfb   : > { %1555 = vmatprep.subr.bf16.mxu0 %v5097_v1  ;;  %1596 = vmatprep.subr.bf16.mxu1 %v5100_v2 }
  0xfe   : > { %1556 = vmatpush1.bf16.msra.mxu0 %v5107_v7  ;;  %1597 = vmatpush1.bf16.msra.mxu1 %v5111_v8 }
  0xff   : > { %1557 = vmatprep.subr.bf16.mxu0 %v5113_v9  ;;  %1598 = vmatprep.subr.bf16.mxu1 %v5116_v10 }
 0x102   : > { %1558 = vmatpush1.bf16.msra.mxu0 %v5123_v15  ;;  %1599 = vmatpush1.bf16.msra.mxu1 %v5127_v16 }
 0x103   : > { %1559 = vmatprep.subr.bf16.mxu0 %v5129_v17  ;;  %1600 = vmatprep.subr.bf16.mxu1 %v5132_v18 }
 0x106   : > { %1560 = vmatpush1.bf16.msra.mxu0 %v5139_v23  ;;  %1601 = vmatpush1.bf16.msra.mxu1 %v5143_v24 }
 0x107   : > { %1561 = vmatprep.subr.bf16.mxu0 %v5145_v25  ;;  %1602 = vmatprep.subr.bf16.mxu1 %v5148_v26 }
 0x10a   : > { %1562 = vmatpush1.bf16.msra.mxu0 %v5155_v32  ;;  %1603 = vmatpush1.bf16.msra.mxu1 %v5159_v33 }
 0x10b   : > { %1563 = vmatprep.subr.bf16.mxu0 %v5161_v34  ;;  %1604 = vmatprep.subr.bf16.mxu1 %v5164_v35 }
 0x10e   : > { %1564 = vmatpush1.bf16.msra.mxu0 %v5171_v41  ;;  %1605 = vmatpush1.bf16.msra.mxu1 %v5175_v44 }
 0x10f   : > { %1565 = vmatprep.subr.bf16.mxu0 %v5177_v45  ;;  %1606 = vmatprep.subr.bf16.mxu1 %v5180_v46 }
 0x112   : > { %1566 = vmatpush1.bf16.msra.mxu0 %v5187_v55  ;;  %1607 = vmatpush1.bf16.msra.mxu1 %v5191_v59 }
 0x113   : > { %1567 = vmatprep.subr.bf16.mxu0 %v5193_v29  ;;  %1608 = vmatprep.subr.bf16.mxu1 %v5196_v61 }
 0x116   : > { %1568 = vmatpush1.bf16.msra.mxu0 %v5203_v6  ;;  %1609 = vmatpush1.bf16.msra.mxu1 %v5207_v11 }
 0x117   : > { %1631 = vmatprep.subr.bf16.mxu0 %v5209_v12  ;;  %1672 = vmatprep.subr.bf16.mxu1 %v5212_v13 }
 0x119   : > { %1582 = vmatmul.mubr.bf16.vlgmr.msra.gmra.mrb[8].mxu0 %v6279_v60  ;;  %1623 = vmatmul.mubr.bf16.vlgmr.msra.gmra.mrb[8].mxu1 %v6279_v60 }
 0x11a   : > { %1632 = vmatpush1.bf16.msra.mxu0 %v5219_v22  ;;  %1673 = vmatpush1.bf16.msra.mxu1 %v5223_v27 }
 0x11b   : > { %1633 = vmatprep.subr.bf16.mxu0 %v5225_v28  ;;  %1674 = vmatprep.subr.bf16.mxu1 %v5228_v30  ;;  %v1141_v30 = vld [vmem:[%s4930_s15 + $0x258] sm:$0xff] }
 0x11c   : > { %1663 = vmatprep.mubr.bf16.mxu0 %v6279_v60  ;;  %1704 = vmatprep.mubr.bf16.mxu1 %v6279_v60  ;;  %v1104_v60 = vld [vmem:[%s4930_s15 + $0x130] sm:$0xff]  ;;  %v1145_v28 = vld [vmem:[%s4930_s15 + $0x278] sm:$0xff] }
 0x11d   : > { %v5277_v38 = vcombine.high %v1100_v21, %v1104_v60 }
 0x11e   : > { %1634 = vmatpush1.bf16.msra.mxu0 %v5237_v40  ;;  %1675 = vmatpush1.bf16.msra.mxu1 %v5241_v47  ;;  %v5271_v47 = vcombine.low %v1092_v54, %v1096_v62  ;;  %v1109_v54 = vld [vmem:[%s4930_s15 + $0x158] sm:$0xff]  ;;  %v1144_v40 = vld [vmem:[%s4930_s15 + $0x270] sm:$0xff] }
 0x11f   : > { %1635 = vmatprep.subr.bf16.mxu0 %v5243_v52  ;;  %1676 = vmatprep.subr.bf16.mxu1 %v5246_v53  ;;  %6513 = vst [vmem:[#allocation71_spill] sm:$0xff] %v5277_v38  ;;  %v5280_v53 = vcombine.high %v1101_v31, %v1105_v36  ;;  %v1108_v52 = vld [vmem:[%s4930_s15 + $0x150] sm:$0xff]  ;;  %v1113_v62 = vld [vmem:[%s4930_s15 + $0x178] sm:$0xff] }
 0x120   : > { %6511 = vst [vmem:[#allocation69_spill] sm:$0xff] %v5271_v47  ;;  %v5307_v31 = vcombine.low %v1109_v54, %v1113_v62 }
 0x121   : > { %6514 = vst [vmem:[#allocation72_spill] sm:$0xff] %v5280_v53 }
 0x122   : > { %1636 = vmatpush1.bf16.msra.mxu0 %v5255_v5  ;;  %1677 = vmatpush1.bf16.msra.mxu1 %v5259_v14  ;;  %v1112_v5 = vld [vmem:[%s4930_s15 + $0x170] sm:$0xff]  ;;  %v5287_v14 = vcombine.low %v1100_v21, %v1104_v60  ;;  %v1117_v60 = vld [vmem:[%s4930_s15 + $0x198] sm:$0xff]  ;;  %6520 = vst [vmem:[#allocation78_spill] sm:$0xff] %v5307_v31 }
 0x123   : > { %1637 = vmatprep.subr.bf16.mxu0 %v5261_v19  ;;  %1678 = vmatprep.subr.bf16.mxu1 %v5264_v20  ;;  %v5293_v4 = vcombine.high %v1108_v52, %v1112_v5  ;;  %v5296_v20 = vcombine.high %v1109_v54, %v1113_v62  ;;  %v1116_v19 = vld [vmem:[%s4930_s15 + $0x190] sm:$0xff]  ;;  %v1121_v21 = vld [vmem:[%s4930_s15 + $0x1b8] sm:$0xff] }
 0x124   : > { %6515 = vst [vmem:[#allocation73_spill] sm:$0xff] %v5287_v14  ;;  %v5323_v54 = vcombine.low %v1117_v60, %v1121_v21 }
 0x125   : > { %6517 = vst [vmem:[#allocation75_spill] sm:$0xff] %v5293_v4  ;;  %6518 = vst [vmem:[#allocation76_spill] sm:$0xff] %v5296_v20 }
 0x126   : > { %1638 = vmatpush1.bf16.msra.mxu0 %v5271_v47  ;;  %1679 = vmatpush1.bf16.msra.mxu1 %v5275_v37  ;;  %v1120_v47 = vld [vmem:[%s4930_s15 + $0x1b0] sm:$0xff]  ;;  %v5303_v37 = vcombine.low %v1108_v52, %v1112_v5  ;;  %v1125_v52 = vld [vmem:[%s4930_s15 + $0x1d8] sm:$0xff] }
 0x127   : > { %1639 = vmatprep.subr.bf16.mxu0 %v5277_v38  ;;  %1680 = vmatprep.subr.bf16.mxu1 %v5280_v53  ;;  %v5309_v36 = vcombine.high %v1116_v19, %v1120_v47  ;;  %v5312_v53 = vcombine.high %v1117_v60, %v1121_v21  ;;  %v1124_v38 = vld [vmem:[%s4930_s15 + $0x1d0] sm:$0xff]  ;;  %v1129_v5 = vld [vmem:[%s4930_s15 + $0x1f8] sm:$0xff] }
 0x128   : > { %6519 = vst [vmem:[#allocation77_spill] sm:$0xff] %v5303_v37  ;;  %v5339_v60 = vcombine.low %v1125_v52, %v1129_v5 }
 0x129   : > { %6521 = vst [vmem:[#allocation79_spill] sm:$0xff] %v5309_v36  ;;  %6522 = vst [vmem:[#allocation80_spill] sm:$0xff] %v5312_v53 }
 0x12a   : > { %1640 = vmatpush1.bf16.msra.mxu0 %v5287_v14  ;;  %1681 = vmatpush1.bf16.msra.mxu1 %v5291_v3  ;;  %v1128_v14 = vld [vmem:[%s4930_s15 + $0x1f0] sm:$0xff]  ;;  %v5319_v3 = vcombine.low %v1116_v19, %v1120_v47  ;;  %v1133_v47 = vld [vmem:[%s4930_s15 + $0x218] sm:$0xff] }
 0x12b   : > { %1641 = vmatprep.subr.bf16.mxu0 %v5293_v4  ;;  %1682 = vmatprep.subr.bf16.mxu1 %v5296_v20  ;;  %v5325_v62 = vcombine.high %v1124_v38, %v1128_v14  ;;  %v5328_v20 = vcombine.high %v1125_v52, %v1129_v5  ;;  %v1132_v4 = vld [vmem:[%s4930_s15 + $0x210] sm:$0xff]  ;;  %v1137_v19 = vld [vmem:[%s4930_s15 + $0x238] sm:$0xff]  ;;  %v5360_v5 = vcombine.high %v1141_v30, %v1145_v28 }
 0x12d   : > { %6523 = vst [vmem:[#allocation81_spill] sm:$0xff] %v5328_v20 }
 0x12e   : > { %1642 = vmatpush1.bf16.msra.mxu0 %v5303_v37  ;;  %1683 = vmatpush1.bf16.msra.mxu1 %v5307_v31  ;;  %v1136_v37 = vld [vmem:[%s4930_s15 + $0x230] sm:$0xff]  ;;  %v5335_v31 = vcombine.low %v1124_v38, %v1128_v14  ;;  %v5355_v38 = vcombine.low %v1133_v47, %v1137_v19 }
 0x12f   : > { %1643 = vmatprep.subr.bf16.mxu0 %v5309_v36  ;;  %1684 = vmatprep.subr.bf16.mxu1 %v5312_v53  ;;  %v5341_v21 = vcombine.high %v1132_v4, %v1136_v37  ;;  %v5344_v53 = vcombine.high %v1133_v47, %v1137_v19  ;;  %v1140_v36 = vld [vmem:[%s4930_s15 + $0x250] sm:$0xff]  ;;  %v5351_v14 = vcombine.low %v1132_v4, %v1136_v37  ;;  %v6526_v4 = vmov 0  }
 0x130   : > { %v5357_v52 = vcombine.high %v1140_v36, %v1144_v40  ;;  %v5367_v37 = vcombine.low %v1141_v30, %v1145_v28  ;;  %v450_v28 = vlaneseq }
 0x132   : > { %1644 = vmatpush1.bf16.msra.mxu0 %v5319_v3  ;;  %1685 = vmatpush1.bf16.msra.mxu1 %v5323_v54  ;;  %6525 = vst [vmem:[#allocation83_spill] sm:$0xff] %v5367_v37  ;;  %v451_v30 = vshrl.u32 %v450_v28, 7 }
 0x133   : > { %1645 = vmatprep.subr.bf16.mxu0 %v5325_v62  ;;  %1686 = vmatprep.subr.bf16.mxu1 %v5328_v20  ;;  %v5363_v20 = vcombine.low %v1140_v36, %v1144_v40  ;;  %v448_v36 = vld [vmem:[%s4936_s16] sm:$0xff] }
 0x134   : > { %v452_v40 = vsub.s32 0, %v451_v30  ;;  %v460_v47 = vsub.s32 2, %v451_v30  ;;  %v456_v19 = vsub.s32 1, %v451_v30 }
 0x135   : > { %6524 = vst [vmem:[#allocation82_spill] sm:$0xff] %v5363_v20 }
 0x136   : > { %1646 = vmatpush1.bf16.msra.mxu0 %v5335_v31  ;;  %1687 = vmatpush1.bf16.msra.mxu1 %v5339_v60 }
 0x137   : > { %1647 = vmatprep.subr.bf16.mxu0 %v5341_v21  ;;  %1688 = vmatprep.subr.bf16.mxu1 %v5344_v53 }
 0x13a   : > { %1648 = vmatpush1.bf16.msra.mxu0 %v5351_v14  ;;  %1689 = vmatpush1.bf16.msra.mxu1 %v5355_v38 }
 0x13b   : > { %1649 = vmatprep.subr.bf16.mxu0 %v5357_v52  ;;  %1690 = vmatprep.subr.bf16.mxu1 %v5360_v5 }
 0x13e   : > { %1650 = vmatpush1.bf16.msra.mxu0 %v5363_v20  ;;  %1691 = vmatpush1.bf16.msra.mxu1 %v5367_v37 }
 0x13f   : > { %1774 = vmatprep.subr.bf16.mxu0 %v5048_v42  ;;  %1815 = vmatprep.subr.bf16.mxu1 %v5050_v43 }
 0x141   : > { %1664 = vmatmul.mubr.bf16.vlgmr.msra.gmra.mrb[12].mxu0 %v6526_v4  ;;  %1705 = vmatmul.mubr.bf16.vlgmr.msra.gmra.mrb[12].mxu1 %v6526_v4  ;;  %v453_v4 = vrot.slane %v448_v36, %v452_v40  ;;  %v468_v40 = vsub.s32 4, %v451_v30 }
 0x142   : > { %1775 = vmatpush1.bf16.msra.mxu0 %v5056_v48  ;;  %1816 = vmatpush1.bf16.msra.mxu1 %v5059_v49 }
 0x143   : > { %1776 = vmatprep.subr.bf16.mxu0 %v5061_v50  ;;  %1817 = vmatprep.subr.bf16.mxu1 %v5064_v51 }
 0x146   : > { %1777 = vmatpush1.bf16.msra.mxu0 %v5073_v39  ;;  %1818 = vmatpush1.bf16.msra.mxu1 %v5077_v56 }
 0x147   : > { %1778 = vmatprep.subr.bf16.mxu0 %v5079_v57  ;;  %1819 = vmatprep.subr.bf16.mxu1 %v5082_v58 }
 0x14a   : > { %1779 = vmatpush1.bf16.msra.mxu0 %v5091_v63  ;;  %1820 = vmatpush1.bf16.msra.mxu1 %v5095_v0 }
 0x14b   : > { %1780 = vmatprep.subr.bf16.mxu0 %v5097_v1  ;;  %1821 = vmatprep.subr.bf16.mxu1 %v5100_v2 }
 0x14e   : > { %1781 = vmatpush1.bf16.msra.mxu0 %v5107_v7  ;;  %1822 = vmatpush1.bf16.msra.mxu1 %v5111_v8 }
 0x14f   : > { %1782 = vmatprep.subr.bf16.mxu0 %v5113_v9  ;;  %1823 = vmatprep.subr.bf16.mxu1 %v5116_v10 }
 0x152   : > { %1783 = vmatpush1.bf16.msra.mxu0 %v5123_v15  ;;  %1824 = vmatpush1.bf16.msra.mxu1 %v5127_v16 }
 0x153   : > { %1784 = vmatprep.subr.bf16.mxu0 %v5129_v17  ;;  %1825 = vmatprep.subr.bf16.mxu1 %v5132_v18 }
 0x156   : > { %1785 = vmatpush1.bf16.msra.mxu0 %v5139_v23  ;;  %1826 = vmatpush1.bf16.msra.mxu1 %v5143_v24 }
 0x157   : > { %1786 = vmatprep.subr.bf16.mxu0 %v5145_v25  ;;  %1827 = vmatprep.subr.bf16.mxu1 %v5148_v26  ;;  %v469_v26 = vrot.slane %v448_v36, %v468_v40  ;;  %v480_v25 = vsub.s32 7, %v451_v30 }
 0x159   : > { %v481_v17 = vrot.slane %v448_v36, %v480_v25 }
 0x15a   : > { %1787 = vmatpush1.bf16.msra.mxu0 %v5155_v32  ;;  %1828 = vmatpush1.bf16.msra.mxu1 %v5159_v33  ;;  %v476_v32 = vsub.s32 6, %v451_v30 }
 0x15b   : > { %1788 = vmatprep.subr.bf16.mxu0 %v5161_v34  ;;  %1829 = vmatprep.subr.bf16.mxu1 %v5164_v35 }
 0x15c   : > { %v477_v24 = vrot.slane %v448_v36, %v476_v32 }
 0x15e   : > { %1789 = vmatpush1.bf16.msra.mxu0 %v5171_v41  ;;  %1830 = vmatpush1.bf16.msra.mxu1 %v5175_v44 }
 0x15f   : > { %1790 = vmatprep.subr.bf16.mxu0 %v5177_v45  ;;  %1831 = vmatprep.subr.bf16.mxu1 %v5180_v46  ;;  %v457_v45 = vrot.slane %v448_v36, %v456_v19 }
 0x162   : > { %1791 = vmatpush1.bf16.msra.mxu0 %v5187_v55  ;;  %1832 = vmatpush1.bf16.msra.mxu1 %v5191_v59  ;;  %v464_v59 = vsub.s32 3, %v451_v30 }
 0x163   : > { %1792 = vmatprep.subr.bf16.mxu0 %v5193_v29  ;;  %1833 = vmatprep.subr.bf16.mxu1 %v5196_v61  ;;  %v461_v29 = vrot.slane %v448_v36, %v460_v47  ;;  %v472_v47 = vsub.s32 5, %v451_v30 }
 0x166   : > { %1793 = vmatpush1.bf16.msra.mxu0 %v5203_v6  ;;  %1834 = vmatpush1.bf16.msra.mxu1 %v5207_v11  ;;  %v465_v11 = vrot.slane %v448_v36, %v464_v59 }
 0x167   : > { %1856 = vmatprep.subr.bf16.mxu0 %v5209_v12  ;;  %1897 = vmatprep.subr.bf16.mxu1 %v5212_v13 }
 0x19c   : > { %v928_v55 = vpop.f32.mrb[0].mxu0  ;;  %v971_v46 = vpop.f32.mrb[0].mxu1 }
 0x19d   : > { %v930_v61 = vpop.f32.mrb[1].mxu0  ;;  %v973_v6 = vpop.f32.mrb[1].mxu1  ;;  %v5433_v25 = vadd.f32 %v928_v55, %v453_v4 }
 0x19e   : > { %v932_v44 = vpop.f32.mrb[2].mxu0  ;;  %v975_v12 = vpop.f32.mrb[2].mxu1 }
 0x19f   : > { %v5417_v41 = vadd.f32 %v932_v44, %v453_v4  ;;  %v934_v13 = vpop.f32.mrb[3].mxu0  ;;  %v5419_v35 = vadd.f32 %v975_v12, %v461_v29  ;;  %v977_v34 = vpop.f32.mrb[3].mxu1  ;;  %v473_v44 = vrot.slane %v448_v36, %v472_v47  ;;  %v5437_v36 = vadd.f32 %v930_v61, %v457_v45 }
 0x1a0   : > { %v5421_v28 = vadd.f32 %v934_v13, %v457_v45  ;;  %v5423_v33 = vadd.f32 %v977_v34, %v465_v11 }
 0x1a1   : > { %6527 = vst [vmem:[#allocation84_spill] sm:$0xff] %v5417_v41  ;;  %6528 = vst [vmem:[#allocation85_spill] sm:$0xff] %v5419_v35 }
 0x1a2   : > { %6529 = vst [vmem:[#allocation86_spill] sm:$0xff] %v5421_v28  ;;  %6530 = vst [vmem:[#allocation87_spill] sm:$0xff] %v5423_v33 }
 0x1a3   : > { %6535 = vst [vmem:[#allocation92_spill] sm:$0xff] %v5437_v36 }
 0x1c4   : > { %v1014_v19 = vpop.f32.mrb[4].mxu0  ;;  %v1057_v23 = vpop.f32.mrb[4].mxu1 }
 0x1c5   : > { %v1016_v59 = vpop.f32.mrb[5].mxu0  ;;  %v1059_v41 = vpop.f32.mrb[5].mxu1  ;;  %v5445_v4 = vadd.f32 %v1014_v19, %v469_v26 }
 0x1c6   : > { %v1018_v18 = vpop.f32.mrb[6].mxu0  ;;  %v1061_v13 = vpop.f32.mrb[6].mxu1 }
 0x1c7   : > { %v5425_v12 = vadd.f32 %v1018_v18, %v469_v26  ;;  %v1020_v28 = vpop.f32.mrb[7].mxu0  ;;  %v5427_v35 = vadd.f32 %v1061_v13, %v477_v24  ;;  %v1063_v33 = vpop.f32.mrb[7].mxu1  ;;  %v5435_v18 = vadd.f32 %v971_v46, %v461_v29  ;;  %v5440_v13 = vadd.f32 %v973_v6, %v465_v11 }
 0x1c8   : > { %v5429_v34 = vadd.f32 %v1020_v28, %v473_v44  ;;  %v5431_v16 = vadd.f32 %v1063_v33, %v481_v17 }
 0x1c9   : > { %6531 = vst [vmem:[#allocation88_spill] sm:$0xff] %v5425_v12  ;;  %6532 = vst [vmem:[#allocation89_spill] sm:$0xff] %v5427_v35  ;;  %v6559_v35 = vld [vmem:[#allocation80_spill] sm:$0xff]  ;;  %v6560_v12 = vld [vmem:[#allocation81_spill] sm:$0xff] }
 0x1ca   : > { %6533 = vst [vmem:[#allocation90_spill] sm:$0xff] %v5429_v34  ;;  %6534 = vst [vmem:[#allocation91_spill] sm:$0xff] %v5431_v16 }
 0x1ec   : > { %v1583_v30 = vpop.f32.mrb[8].mxu0  ;;  %v1624_v40 = vpop.f32.mrb[8].mxu1 }
 0x1ed   : > { %v1585_v32 = vpop.f32.mrb[9].mxu0  ;;  %v1626_v15 = vpop.f32.mrb[9].mxu1  ;;  %v1713_v28 = vadd.f32 %v1583_v30, %v5433_v25  ;;  %v1715_v33 = vadd.f32 %v1624_v40, %v5435_v18  ;;  %v5447_v40 = vadd.f32 %v1057_v23, %v477_v24 }
 0x1ee   : > { %v1587_v10 = vpop.f32.mrb[10].mxu0  ;;  %v1628_v47 = vpop.f32.mrb[10].mxu1  ;;  %v1714_v16 = vadd.f32 %v1585_v32, %v5437_v36  ;;  %v1716_v34 = vadd.f32 %v1626_v15, %v5440_v13  ;;  %v5449_v15 = vadd.f32 %v1016_v59, %v473_v44 }
 0x1ef   : > { %v1588_v9 = vpop.f32.mrb[11].mxu0  ;;  %v1629_v8 = vpop.f32.mrb[11].mxu1  ;;  %v4043_v10 = vmul.f32 -1.442695, %v1713_v28  ;;  %v4045_v47 = vmul.f32 -1.442695, %v1715_v33 }
 0x1f0   : > { %v4044_v9 = vmul.f32 -1.442695, %v1714_v16  ;;  %v4046_v8 = vmul.f32 -1.442695, %v1716_v34  ;;  %v5451_v34 = vadd.f32 %v1059_v41, %v481_v17 }
 0x1f1   : > { %4217 = vpow2.f32 %v4043_v10 }
 0x1f2   : > { %4219 = vpow2.f32 %v4045_v47 }
 0x1f3   : > { %4221 = vpow2.f32 %v4044_v9 }
 0x1f4   : > { %4223 = vpow2.f32 %v4046_v8 }
 0x1fb   : > { %v4218_v45 = vpop.eup %4217 }
 0x1fc   : > { %v4220_v46 = vpop.eup %4219  ;;  %v1739_v61 = vadd.f32 1.0, %v4218_v45 }
 0x1fd   : > { %v4222_v55 = vpop.eup %4221  ;;  %v1741_v6 = vadd.f32 1.0, %v4220_v46 }
 0x1fe   : > { %v4224_v29 = vpop.eup %4223  ;;  %v1740_v11 = vadd.f32 1.0, %v4222_v55  ;;  %4225 = vrcp.f32 %v1739_v61 }
 0x1ff   : > { %v1742_v30 = vadd.f32 1.0, %v4224_v29  ;;  %4227 = vrcp.f32 %v1741_v6 }
 0x200   : > { %4229 = vrcp.f32 %v1740_v11 }
 0x201   : > { %4231 = vrcp.f32 %v1742_v30 }
 0x208   : > { %v4226_v9 = vpop.eup %4225 }
 0x209   : > { %v4228_v8 = vpop.eup %4227 }
 0x20a   : > { %v4230_v45 = vpop.eup %4229  ;;  %v1759_v61 = vmul.f32 0.0, %v4228_v8  ;;  %v6539_v8 = vld [vmem:[#allocation60_spill] sm:$0xff] }
 0x20b   : > { %v4232_v46 = vpop.eup %4231 }
 0x214   : > { %v1665_v16 = vpop.f32.mrb[12].mxu0  ;;  %v1706_v28 = vpop.f32.mrb[12].mxu1 }
 0x215   : > { %v1717_v32 = vadd.f32 %v1665_v16, %v5445_v4  ;;  %v1667_v33 = vpop.f32.mrb[13].mxu0  ;;  %v1719_v10 = vadd.f32 %v1706_v28, %v5447_v40  ;;  %v1708_v19 = vpop.f32.mrb[13].mxu1 }
 0x216   : > { %v1718_v26 = vadd.f32 %v1667_v33, %v5449_v15  ;;  %v1669_v47 = vpop.f32.mrb[14].mxu0  ;;  %v1720_v24 = vadd.f32 %v1708_v19, %v5451_v34  ;;  %v1710_v59 = vpop.f32.mrb[14].mxu1  ;;  %v1760_v33 = vmul.f32 0.0, %v4232_v46  ;;  %v6541_v46 = vld [vmem:[#allocation62_spill] sm:$0xff] }
 0x217   : > { %v4047_v23 = vmul.f32 -1.442695, %v1717_v32  ;;  %v1670_v44 = vpop.f32.mrb[15].mxu0  ;;  %4233 = vtanh.f32 %v1719_v10  ;;  %v1711_v41 = vpop.f32.mrb[15].mxu1 }
 0x218   : > { %v4048_v17 = vmul.f32 -1.442695, %v1718_v26 }
 0x219   : > { %4235 = vpow2.f32 %v4047_v23 }
 0x21a   : > { %4237 = vpow2.f32 %v4048_v17 }
 0x21b   : > { %4239 = vtanh.f32 %v1720_v24 }
 0x221   : > { %v4234_v55 = vpop.eup %4233 }
 0x222   : > { %v1761_v6 = vmul.f32 %v4234_v55, %v4226_v9  ;;  %v6538_v9 = vld [vmem:[#allocation59_spill] sm:$0xff] }
 0x223   : > { %v4236_v29 = vpop.eup %4235  ;;  %v6542_v55 = vld [vmem:[#allocation63_spill] sm:$0xff] }
 0x224   : > { %v4238_v11 = vpop.eup %4237  ;;  %v1743_v30 = vadd.f32 1.0, %v4236_v29  ;;  %v5457_v32 = vadd.f32 %v1761_v6, %v1759_v61  ;;  %v6543_v29 = vld [vmem:[#allocation64_spill] sm:$0xff]  ;;  %v6544_v61 = vld [vmem:[#allocation65_spill] sm:$0xff]  ;;  %v6545_v6 = vld [vmem:[#allocation66_spill] sm:$0xff] }
 0x225   : > { %v4240_v16 = vpop.eup %4239  ;;  %v1744_v28 = vadd.f32 1.0, %v4238_v11  ;;  %v6546_v11 = vld [vmem:[#allocation67_spill] sm:$0xff] }
 0x226   : > { %4241 = vrcp.f32 %v1743_v30  ;;  %v1762_v10 = vmul.f32 %v4240_v16, %v4230_v45  ;;  %v6540_v45 = vld [vmem:[#allocation61_spill] sm:$0xff]  ;;  %v6547_v30 = vld [vmem:[#allocation68_spill] sm:$0xff] }
 0x227   : > { %4243 = vtanh.f32 %v5457_v32  ;;  %v6548_v16 = vld [vmem:[#allocation69_spill] sm:$0xff] }
 0x228   : > { %4245 = vrcp.f32 %v1744_v28  ;;  %v5460_v26 = vadd.f32 %v1762_v10, %v1760_v33  ;;  %v6549_v28 = vld [vmem:[#allocation70_spill] sm:$0xff]  ;;  %v6550_v33 = vld [vmem:[#allocation71_spill] sm:$0xff]  ;;  %v6551_v10 = vld [vmem:[#allocation72_spill] sm:$0xff] }
 0x22a   : > { %4247 = vtanh.f32 %v5460_v26 }
 0x230   : > { %v4242_v19 = vpop.eup %4241 }
 0x231   : > { %v4244_v47 = vpop.eup %4243 }
 0x232   : > { %v4246_v23 = vpop.eup %4245  ;;  %v1767_v24 = vmul.f32 %v4244_v47, %v4242_v19  ;;  %v6552_v19 = vld [vmem:[#allocation73_spill] sm:$0xff]  ;;  %v6553_v47 = vld [vmem:[#allocation74_spill] sm:$0xff] }
 0x234   : > { %v4248_v59 = vpop.eup %4247  ;;  %v5465_v41 = vpack.c.bf16 %v1767_v24, %v1767_v24  ;;  %v6555_v24 = vld [vmem:[#allocation76_spill] sm:$0xff] }
 0x235   : > { %v1768_v44 = vmul.f32 %v4248_v59, %v4246_v23  ;;  %v6554_v23 = vld [vmem:[#allocation75_spill] sm:$0xff]  ;;  %v6556_v59 = vld [vmem:[#allocation77_spill] sm:$0xff] }
 0x236   : > { %6537 = vst [vmem:[#allocation94_spill] sm:$0xff] %v5465_v41 }
 0x237   : > { %v5463_v17 = vpack.c.bf16 %v1768_v44, %v1768_v44  ;;  %v6557_v44 = vld [vmem:[#allocation78_spill] sm:$0xff] }
 0x239   : > { %6536 = vst [vmem:[#allocation93_spill] sm:$0xff] %v5463_v17  ;;  %4049 = vmatprep.mubr.msk.bf16.mxu0 %vm890_vm1, %v5463_v17  ;;  %4050 = vmatprep.mubr.msk.bf16.mxu1 %vm890_vm1, %v5463_v17 }
 0x23a   : > { %1807 = vmatmul.mubr.bf16.vlgmr.msra.gmra.mrb[16].mxu0 %v5465_v41  ;;  %1848 = vmatmul.mubr.bf16.vlgmr.msra.gmra.mrb[16].mxu1 %v5465_v41 }
 0x23b   : > { %1857 = vmatpush1.bf16.msra.mxu0 %v5219_v22  ;;  %1898 = vmatpush1.bf16.msra.mxu1 %v5223_v27 }
 0x23c   : > { %4051 = vmatprep.mubr.msk.bf16.mxu0 %vm890_vm1, %v5463_v17  ;;  %4052 = vmatprep.mubr.msk.bf16.mxu1 %vm890_vm1, %v5463_v17  ;;  %v6558_v17 = vld [vmem:[#allocation79_spill] sm:$0xff] }
 0x23d   : > { %1858 = vmatprep.subr.bf16.mxu0 %v6538_v9  ;;  %1899 = vmatprep.subr.bf16.mxu1 %v6539_v8 }
 0x23f   : > { %1859 = vmatpush1.bf16.msra.mxu0 %v6540_v45  ;;  %1900 = vmatpush1.bf16.msra.mxu1 %v6541_v46 }
 0x240   : > { %1860 = vmatprep.subr.bf16.mxu0 %v6542_v55  ;;  %1901 = vmatprep.subr.bf16.mxu1 %v6543_v29 }
 0x243   : > { %1861 = vmatpush1.bf16.msra.mxu0 %v6544_v61  ;;  %1902 = vmatpush1.bf16.msra.mxu1 %v6545_v6 }
 0x244   : > { %1862 = vmatprep.subr.bf16.mxu0 %v6546_v11  ;;  %1903 = vmatprep.subr.bf16.mxu1 %v6547_v30 }
 0x247   : > { %1863 = vmatpush1.bf16.msra.mxu0 %v6548_v16  ;;  %1904 = vmatpush1.bf16.msra.mxu1 %v6549_v28 }
 0x248   : > { %1864 = vmatprep.subr.bf16.mxu0 %v6550_v33  ;;  %1905 = vmatprep.subr.bf16.mxu1 %v6551_v10 }
 0x24b   : > { %1865 = vmatpush1.bf16.msra.mxu0 %v6552_v19  ;;  %1906 = vmatpush1.bf16.msra.mxu1 %v6553_v47 }
 0x24c   : > { %1866 = vmatprep.subr.bf16.mxu0 %v6554_v23  ;;  %1907 = vmatprep.subr.bf16.mxu1 %v6555_v24 }
 0x24f   : > { %1867 = vmatpush1.bf16.msra.mxu0 %v6556_v59  ;;  %1908 = vmatpush1.bf16.msra.mxu1 %v6557_v44 }
 0x250   : > { %1868 = vmatprep.subr.bf16.mxu0 %v6558_v17  ;;  %1909 = vmatprep.subr.bf16.mxu1 %v6559_v35 }
 0x253   : > { %1869 = vmatpush1.bf16.msra.mxu0 %v5319_v3  ;;  %1910 = vmatpush1.bf16.msra.mxu1 %v5323_v54 }
 0x254   : > { %1870 = vmatprep.subr.bf16.mxu0 %v5325_v62  ;;  %1911 = vmatprep.subr.bf16.mxu1 %v6560_v12 }
 0x257   : > { %1871 = vmatpush1.bf16.msra.mxu0 %v5335_v31  ;;  %1912 = vmatpush1.bf16.msra.mxu1 %v5339_v60 }
 0x258   : > { %1872 = vmatprep.subr.bf16.mxu0 %v5341_v21  ;;  %1913 = vmatprep.subr.bf16.mxu1 %v5344_v53 }
 0x25b   : > { %1873 = vmatpush1.bf16.msra.mxu0 %v5351_v14  ;;  %1914 = vmatpush1.bf16.msra.mxu1 %v5355_v38 }
 0x25c   : > { %1874 = vmatprep.subr.bf16.mxu0 %v5357_v52  ;;  %1915 = vmatprep.subr.bf16.mxu1 %v5360_v5 }
 0x25f   : > { %1875 = vmatpush1.bf16.msra.mxu0 %v5363_v20  ;;  %1916 = vmatpush1.bf16.msra.mxu1 %v5367_v37 }
 0x260   : > { %2034 = vmatprep.subr.bf16.mxu0 %v5048_v42  ;;  %2075 = vmatprep.subr.bf16.mxu1 %v5050_v43 }
 0x262   : > { %1889 = vmatmul.mubr.bf16.vlgmr.msra.gmra.mrb[20].mxu0 %v5465_v41  ;;  %1930 = vmatmul.mubr.bf16.vlgmr.msra.gmra.mrb[20].mxu1 %v5465_v41  ;;  %v6561_v41 = vld [vmem:[#allocation32_spill] sm:$0xff] }
 0x263   : > { %2035 = vmatpush1.bf16.msra.mxu0 %v5056_v48  ;;  %2076 = vmatpush1.bf16.msra.mxu1 %v5059_v49 }
 0x264   : > { %2036 = vmatprep.subr.bf16.mxu0 %v5061_v50  ;;  %2077 = vmatprep.subr.bf16.mxu1 %v5064_v51  ;;  %v6562_v51 = vld [vmem:[#allocation33_spill] sm:$0xff] }
 0x267   : > { %2037 = vmatpush1.bf16.msra.mxu0 %v5073_v39  ;;  %2078 = vmatpush1.bf16.msra.mxu1 %v5077_v56  ;;  %v6563_v39 = vld [vmem:[#allocation34_spill] sm:$0xff]  ;;  %v6564_v56 = vld [vmem:[#allocation35_spill] sm:$0xff] }
 0x268   : > { %2038 = vmatprep.subr.bf16.mxu0 %v5079_v57  ;;  %2079 = vmatprep.subr.bf16.mxu1 %v5082_v58  ;;  %v6565_v57 = vld [vmem:[#allocation36_spill] sm:$0xff]  ;;  %v6566_v58 = vld [vmem:[#allocation37_spill] sm:$0xff] }
 0x26b   : > { %2039 = vmatpush1.bf16.msra.mxu0 %v5091_v63  ;;  %2080 = vmatpush1.bf16.msra.mxu1 %v5095_v0  ;;  %v6567_v63 = vld [vmem:[#allocation38_spill] sm:$0xff]  ;;  %v6568_v0 = vld [vmem:[#allocation39_spill] sm:$0xff] }
 0x26c   : > { %2040 = vmatprep.subr.bf16.mxu0 %v5097_v1  ;;  %2081 = vmatprep.subr.bf16.mxu1 %v5100_v2  ;;  %v6569_v1 = vld [vmem:[#allocation40_spill] sm:$0xff]  ;;  %v6570_v2 = vld [vmem:[#allocation41_spill] sm:$0xff] }
 0x26f   : > { %2041 = vmatpush1.bf16.msra.mxu0 %v5107_v7  ;;  %2082 = vmatpush1.bf16.msra.mxu1 %v6561_v41  ;;  %v6571_v7 = vld [vmem:[#allocation42_spill] sm:$0xff]  ;;  %v6572_v41 = vld [vmem:[#allocation43_spill] sm:$0xff] }
 0x270   : > { %2042 = vmatprep.subr.bf16.mxu0 %v6562_v51  ;;  %2083 = vmatprep.subr.bf16.mxu1 %v6563_v39  ;;  %v6573_v51 = vld [vmem:[#allocation44_spill] sm:$0xff]  ;;  %v6574_v39 = vld [vmem:[#allocation45_spill] sm:$0xff] }
 0x273   : > { %2043 = vmatpush1.bf16.msra.mxu0 %v6564_v56  ;;  %2084 = vmatpush1.bf16.msra.mxu1 %v6565_v57  ;;  %v6575_v56 = vld [vmem:[#allocation46_spill] sm:$0xff]  ;;  %v6576_v57 = vld [vmem:[#allocation47_spill] sm:$0xff] }
 0x274   : > { %2044 = vmatprep.subr.bf16.mxu0 %v6566_v58  ;;  %2085 = vmatprep.subr.bf16.mxu1 %v6567_v63  ;;  %v6577_v58 = vld [vmem:[#allocation48_spill] sm:$0xff]  ;;  %v6578_v63 = vld [vmem:[#allocation49_spill] sm:$0xff] }
 0x277   : > { %2045 = vmatpush1.bf16.msra.mxu0 %v6568_v0  ;;  %2086 = vmatpush1.bf16.msra.mxu1 %v6569_v1  ;;  %v6579_v0 = vld [vmem:[#allocation50_spill] sm:$0xff]  ;;  %v6580_v1 = vld [vmem:[#allocation51_spill] sm:$0xff] }
 0x278   : > { %2046 = vmatprep.subr.bf16.mxu0 %v6570_v2  ;;  %2087 = vmatprep.subr.bf16.mxu1 %v6571_v7  ;;  %v6581_v2 = vld [vmem:[#allocation52_spill] sm:$0xff]  ;;  %v6582_v7 = vld [vmem:[#allocation53_spill] sm:$0xff] }
 0x27b   : > { %2047 = vmatpush1.bf16.msra.mxu0 %v6572_v41  ;;  %2088 = vmatpush1.bf16.msra.mxu1 %v6573_v51  ;;  %v6583_v41 = vld [vmem:[#allocation54_spill] sm:$0xff]  ;;  %v6584_v51 = vld [vmem:[#allocation55_spill] sm:$0xff] }
 0x27c   : > { %2048 = vmatprep.subr.bf16.mxu0 %v6574_v39  ;;  %2089 = vmatprep.subr.bf16.mxu1 %v6575_v56  ;;  %v6585_v39 = vld [vmem:[#allocation56_spill] sm:$0xff]  ;;  %v6586_v56 = vld [vmem:[#allocation57_spill] sm:$0xff] }
 0x27f   : > { %2049 = vmatpush1.bf16.msra.mxu0 %v6576_v57  ;;  %2090 = vmatpush1.bf16.msra.mxu1 %v6577_v58  ;;  %v6587_v57 = vld [vmem:[#allocation58_spill] sm:$0xff] }
 0x280   : > { %2050 = vmatprep.subr.bf16.mxu0 %v6578_v63  ;;  %2091 = vmatprep.subr.bf16.mxu1 %v6579_v0 }
 0x283   : > { %2051 = vmatpush1.bf16.msra.mxu0 %v6580_v1  ;;  %2092 = vmatpush1.bf16.msra.mxu1 %v6581_v2 }
 0x284   : > { %2052 = vmatprep.subr.bf16.mxu0 %v6582_v7  ;;  %2093 = vmatprep.subr.bf16.mxu1 %v6583_v41 }
 0x287   : > { %2053 = vmatpush1.bf16.msra.mxu0 %v6584_v51  ;;  %2094 = vmatpush1.bf16.msra.mxu1 %v6585_v39 }
 0x288   : > { %2116 = vmatprep.subr.bf16.mxu0 %v6586_v56  ;;  %2157 = vmatprep.subr.bf16.mxu1 %v6587_v57 }
 0x30d   : > { %v1808_v58 = vpop.f32.mrb[16].mxu0  ;;  %v1849_v63 = vpop.f32.mrb[16].mxu1 }
 0x30e   : > { %v1948_v50 = vrot.slane %v1849_v63, 6  ;;  %v1810_v0 = vpop.f32.mrb[17].mxu0  ;;  %v1851_v49 = vpop.f32.mrb[17].mxu1  ;;  %v1946_v56 = vrot.slane %v1808_v58, 6 }
 0x30f   : > { %v1949_v1 = vrot.slane %v1851_v49, 6  ;;  %v1812_v48 = vpop.f32.mrb[18].mxu0  ;;  %v1853_v2 = vpop.f32.mrb[18].mxu1  ;;  %v1947_v57 = vrot.slane %v1810_v0, 6 }
 0x310   : > { %v1964_v7 = vadd.f32 %v1948_v50, %v5435_v18  ;;  %v1813_v43 = vpop.f32.mrb[19].mxu0  ;;  %v1854_v41 = vpop.f32.mrb[19].mxu1  ;;  %v1962_v63 = vadd.f32 %v1946_v56, %v5433_v25 }
 0x311   : > { %v1965_v51 = vadd.f32 %v1949_v1, %v5440_v13  ;;  %v1963_v49 = vadd.f32 %v1947_v57, %v5437_v36 }
 0x312   : > { %v4055_v42 = vmul.f32 -1.442695, %v1964_v7  ;;  %v4053_v50 = vmul.f32 -1.442695, %v1962_v63 }
 0x313   : > { %v4056_v39 = vmul.f32 -1.442695, %v1965_v51  ;;  %v4054_v43 = vmul.f32 -1.442695, %v1963_v49  ;;  %v2010_v51 = vrot.slane %v5457_v32, 6 }
 0x314   : > { %4249 = vpow2.f32 %v4055_v42 }
 0x315   : > { %4251 = vpow2.f32 %v4056_v39  ;;  %v2011_v39 = vrot.slane %v5460_v26, 6 }
 0x31e   : > { %v4250_v37 = vpop.eup %4249 }
 0x31f   : > { %v1990_v20 = vadd.f32 1.0, %v4250_v37  ;;  %v4252_v48 = vpop.eup %4251 }
 0x320   : > { %v1991_v2 = vadd.f32 1.0, %v4252_v48 }
 0x321   : > { %4253 = vrcp.f32 %v1990_v20 }
 0x322   : > { %4255 = vrcp.f32 %v1991_v2 }
 0x323   : > { %4257 = vpow2.f32 %v4053_v50 }
 0x324   : > { %4259 = vpow2.f32 %v4054_v43 }
 0x32b   : > { %v4254_v42 = vpop.eup %4253 }
 0x32c   : > { %v2014_v58 = vmul.f32 %v4254_v42, %v2010_v51  ;;  %v4256_v0 = vpop.eup %4255 }
 0x32d   : > { %v2015_v1 = vmul.f32 %v4256_v0, %v2011_v39  ;;  %v4258_v56 = vpop.eup %4257 }
 0x32e   : > { %v4260_v7 = vpop.eup %4259  ;;  %v1988_v37 = vadd.f32 1.0, %v4258_v56 }
 0x32f   : > { %v1989_v57 = vadd.f32 1.0, %v4260_v7 }
 0x330   : > { %4261 = vrcp.f32 %v1988_v37 }
 0x331   : > { %4263 = vrcp.f32 %v1989_v57 }
 0x335   : > { %v1890_v41 = vpop.f32.mrb[20].mxu0  ;;  %v1931_v20 = vpop.f32.mrb[20].mxu1 }
 0x336   : > { %v1950_v48 = vrot.slane %v1890_v41, 6  ;;  %v1952_v63 = vrot.slane %v1931_v20, 6  ;;  %v1892_v49 = vpop.f32.mrb[21].mxu0  ;;  %v1933_v2 = vpop.f32.mrb[21].mxu1 }
 0x337   : > { %v1951_v50 = vrot.slane %v1892_v49, 6  ;;  %v1953_v43 = vrot.slane %v1933_v2, 6  ;;  %v1894_v36 = vpop.f32.mrb[22].mxu0  ;;  %v1935_v32 = vpop.f32.mrb[22].mxu1 }
 0x338   : > { %v1966_v26 = vadd.f32 %v1950_v48, %v5445_v4  ;;  %v1968_v51 = vadd.f32 %v1952_v63, %v5447_v40  ;;  %v1895_v42 = vpop.f32.mrb[23].mxu0  ;;  %v1936_v39 = vpop.f32.mrb[23].mxu1 }
 0x339   : > { %v1967_v0 = vadd.f32 %v1951_v50, %v5449_v15  ;;  %v1969_v56 = vadd.f32 %v1953_v43, %v5451_v34 }
 0x33a   : > { %v4057_v7 = vmul.f32 -1.442695, %v1966_v26  ;;  %4265 = vtanh.f32 %v1968_v51  ;;  %v4262_v36 = vpop.eup %4261 }
 0x33b   : > { %v4058_v41 = vmul.f32 -1.442695, %v1967_v0  ;;  %4267 = vtanh.f32 %v1969_v56  ;;  %v4264_v20 = vpop.eup %4263 }
 0x33c   : > { %4269 = vpow2.f32 %v4057_v7 }
 0x33d   : > { %4271 = vpow2.f32 %v4058_v41 }
 0x344   : > { %v4266_v37 = vpop.eup %4265 }
 0x345   : > { %v4268_v49 = vpop.eup %4267  ;;  %v2016_v48 = vmul.f32 %v4266_v37, %v4262_v36  ;;  %v6591_v37 = vld [vmem:[#allocation83_spill] sm:$0xff] }
 0x346   : > { %v4270_v2 = vpop.eup %4269  ;;  %v2017_v63 = vmul.f32 %v4268_v49, %v4264_v20  ;;  %v6590_v20 = vld [vmem:[#allocation82_spill] sm:$0xff]  ;;  %v6592_v49 = vld [vmem:[#allocation17_spill] sm:$0xff] }
 0x347   : > { %v4272_v32 = vpop.eup %4271  ;;  %v1992_v42 = vadd.f32 1.0, %v4270_v2  ;;  %v5569_v57 = vadd.f32 %v2016_v48, %v2014_v58  ;;  %v6593_v48 = vld [vmem:[#allocation18_spill] sm:$0xff]  ;;  %v6594_v2 = vld [vmem:[#allocation19_spill] sm:$0xff] }
 0x348   : > { %v1993_v50 = vadd.f32 1.0, %v4272_v32  ;;  %v5571_v39 = vadd.f32 %v2017_v63, %v2015_v1  ;;  %v6595_v63 = vld [vmem:[#allocation20_spill] sm:$0xff]  ;;  %v6596_v32 = vld [vmem:[#allocation21_spill] sm:$0xff] }
 0x349   : > { %4273 = vrcp.f32 %v1992_v42  ;;  %v6597_v42 = vld [vmem:[#allocation22_spill] sm:$0xff] }
 0x34a   : > { %4275 = vtanh.f32 %v5569_v57 }
 0x34b   : > { %4277 = vrcp.f32 %v1993_v50  ;;  %v6598_v50 = vld [vmem:[#allocation23_spill] sm:$0xff] }
 0x34c   : > { %4279 = vtanh.f32 %v5571_v39 }
 0x353   : > { %v4274_v43 = vpop.eup %4273 }
 0x354   : > { %v4276_v26 = vpop.eup %4275 }
 0x355   : > { %v4278_v51 = vpop.eup %4277  ;;  %v2022_v0 = vmul.f32 %v4276_v26, %v4274_v43  ;;  %v6599_v43 = vld [vmem:[#allocation24_spill] sm:$0xff]  ;;  %v6600_v26 = vld [vmem:[#allocation25_spill] sm:$0xff] }
 0x356   : > { %v4280_v56 = vpop.eup %4279 }
 0x357   : > { %v2023_v7 = vmul.f32 %v4280_v56, %v4278_v51  ;;  %v5575_v41 = vpack.c.bf16 %v2022_v0, %v2022_v0  ;;  %v6601_v51 = vld [vmem:[#allocation26_spill] sm:$0xff]  ;;  %v6602_v0 = vld [vmem:[#allocation27_spill] sm:$0xff]  ;;  %v6603_v56 = vld [vmem:[#allocation28_spill] sm:$0xff] }
 0x359   : > { %6588 = vst [vmem:[#allocation59_spill] sm:$0xff] %v5575_v41  ;;  %v5577_v36 = vpack.c.bf16 %v2023_v7, %v2023_v7  ;;  %v2028_v1 = vrot.slane %v5575_v41, 1  ;;  %v6604_v7 = vld [vmem:[#allocation29_spill] sm:$0xff] }
 0x35a   : > { %v6608_v41 = vld [vmem:[#allocation33_spill] sm:$0xff] }
 0x35b   : > { %6589 = vst [vmem:[#allocation60_spill] sm:$0xff] %v5577_v36  ;;  %v2029_v58 = vrot.slane %v5577_v36, 1  ;;  %v6607_v36 = vld [vmem:[#allocation32_spill] sm:$0xff] }
 0x35d   : > { %4059 = vmatprep.mubr.msk.bf16.mxu0 %vm890_vm1, %v2029_v58  ;;  %4060 = vmatprep.mubr.msk.bf16.mxu1 %vm890_vm1, %v2029_v58 }
 0x35e   : > { %2067 = vmatmul.mubr.bf16.vlgmr.msra.gmra.mrb[24].mxu0 %v2028_v1  ;;  %2108 = vmatmul.mubr.bf16.vlgmr.msra.gmra.mrb[24].mxu1 %v2028_v1 }
 0x35f   : > { %2117 = vmatpush1.bf16.msra.mxu0 %v5219_v22  ;;  %2158 = vmatpush1.bf16.msra.mxu1 %v5223_v27 }
 0x360   : > { %4061 = vmatprep.mubr.msk.bf16.mxu0 %vm890_vm1, %v2029_v58  ;;  %4062 = vmatprep.mubr.msk.bf16.mxu1 %vm890_vm1, %v2029_v58  ;;  %v6605_v58 = vld [vmem:[#allocation30_spill] sm:$0xff] }
 0x361   : > { %2118 = vmatprep.subr.bf16.mxu0 %v6538_v9  ;;  %2159 = vmatprep.subr.bf16.mxu1 %v6539_v8 }
 0x363   : > { %2119 = vmatpush1.bf16.msra.mxu0 %v6540_v45  ;;  %2160 = vmatpush1.bf16.msra.mxu1 %v6541_v46 }
 0x364   : > { %2120 = vmatprep.subr.bf16.mxu0 %v6542_v55  ;;  %2161 = vmatprep.subr.bf16.mxu1 %v6543_v29 }
 0x367   : > { %2121 = vmatpush1.bf16.msra.mxu0 %v6544_v61  ;;  %2162 = vmatpush1.bf16.msra.mxu1 %v6545_v6 }
 0x368   : > { %2122 = vmatprep.subr.bf16.mxu0 %v6546_v11  ;;  %2163 = vmatprep.subr.bf16.mxu1 %v6547_v30 }
 0x36b   : > { %2123 = vmatpush1.bf16.msra.mxu0 %v6548_v16  ;;  %2164 = vmatpush1.bf16.msra.mxu1 %v6549_v28 }
 0x36c   : > { %2124 = vmatprep.subr.bf16.mxu0 %v6550_v33  ;;  %2165 = vmatprep.subr.bf16.mxu1 %v6551_v10 }
 0x36f   : > { %2125 = vmatpush1.bf16.msra.mxu0 %v6552_v19  ;;  %2166 = vmatpush1.bf16.msra.mxu1 %v6553_v47 }
 0x370   : > { %2126 = vmatprep.subr.bf16.mxu0 %v6554_v23  ;;  %2167 = vmatprep.subr.bf16.mxu1 %v6555_v24 }
 0x373   : > { %2127 = vmatpush1.bf16.msra.mxu0 %v6556_v59  ;;  %2168 = vmatpush1.bf16.msra.mxu1 %v6557_v44 }
 0x374   : > { %2128 = vmatprep.subr.bf16.mxu0 %v6558_v17  ;;  %2169 = vmatprep.subr.bf16.mxu1 %v6559_v35 }
 0x377   : > { %2129 = vmatpush1.bf16.msra.mxu0 %v5319_v3  ;;  %2170 = vmatpush1.bf16.msra.mxu1 %v5323_v54 }
 0x378   : > { %2130 = vmatprep.subr.bf16.mxu0 %v5325_v62  ;;  %2171 = vmatprep.subr.bf16.mxu1 %v6560_v12 }
 0x37b   : > { %2131 = vmatpush1.bf16.msra.mxu0 %v5335_v31  ;;  %2172 = vmatpush1.bf16.msra.mxu1 %v5339_v60 }
 0x37c   : > { %2132 = vmatprep.subr.bf16.mxu0 %v5341_v21  ;;  %2173 = vmatprep.subr.bf16.mxu1 %v5344_v53 }
 0x37f   : > { %2133 = vmatpush1.bf16.msra.mxu0 %v5351_v14  ;;  %2174 = vmatpush1.bf16.msra.mxu1 %v5355_v38 }
 0x380   : > { %2134 = vmatprep.subr.bf16.mxu0 %v5357_v52  ;;  %2175 = vmatprep.subr.bf16.mxu1 %v5360_v5 }
 0x383   : > { %2135 = vmatpush1.bf16.msra.mxu0 %v6590_v20  ;;  %2176 = vmatpush1.bf16.msra.mxu1 %v6591_v37  ;;  %v6634_v20 = vld [vmem:[#allocation92_spill] sm:$0xff] }
 0x384   : > { %2294 = vmatprep.subr.bf16.mxu0 %v6592_v49  ;;  %2335 = vmatprep.subr.bf16.mxu1 %v6593_v48 }
 0x386   : > { %2149 = vmatmul.mubr.bf16.vlgmr.msra.gmra.mrb[28].mxu0 %v2028_v1  ;;  %2190 = vmatmul.mubr.bf16.vlgmr.msra.gmra.mrb[28].mxu1 %v2028_v1  ;;  %v6606_v1 = vld [vmem:[#allocation31_spill] sm:$0xff] }
 0x387   : > { %2295 = vmatpush1.bf16.msra.mxu0 %v6594_v2  ;;  %2336 = vmatpush1.bf16.msra.mxu1 %v6595_v63 }
 0x388   : > { %2296 = vmatprep.subr.bf16.mxu0 %v6596_v32  ;;  %2337 = vmatprep.subr.bf16.mxu1 %v6597_v42 }
 0x38b   : > { %2297 = vmatpush1.bf16.msra.mxu0 %v6598_v50  ;;  %2338 = vmatpush1.bf16.msra.mxu1 %v6599_v43  ;;  %v6609_v50 = vld [vmem:[#allocation34_spill] sm:$0xff]  ;;  %v6610_v43 = vld [vmem:[#allocation35_spill] sm:$0xff] }
 0x38c   : > { %2298 = vmatprep.subr.bf16.mxu0 %v6600_v26  ;;  %2339 = vmatprep.subr.bf16.mxu1 %v6601_v51  ;;  %v6611_v26 = vld [vmem:[#allocation36_spill] sm:$0xff]  ;;  %v6612_v51 = vld [vmem:[#allocation37_spill] sm:$0xff] }
 0x38f   : > { %2299 = vmatpush1.bf16.msra.mxu0 %v6602_v0  ;;  %2340 = vmatpush1.bf16.msra.mxu1 %v6603_v56  ;;  %v6613_v0 = vld [vmem:[#allocation38_spill] sm:$0xff]  ;;  %v6614_v56 = vld [vmem:[#allocation39_spill] sm:$0xff] }
 0x390   : > { %2300 = vmatprep.subr.bf16.mxu0 %v6604_v7  ;;  %2341 = vmatprep.subr.bf16.mxu1 %v6605_v58  ;;  %v6615_v7 = vld [vmem:[#allocation40_spill] sm:$0xff]  ;;  %v6616_v58 = vld [vmem:[#allocation41_spill] sm:$0xff] }
 0x393   : > { %2301 = vmatpush1.bf16.msra.mxu0 %v6606_v1  ;;  %2342 = vmatpush1.bf16.msra.mxu1 %v6607_v36  ;;  %v6617_v1 = vld [vmem:[#allocation42_spill] sm:$0xff]  ;;  %v6618_v36 = vld [vmem:[#allocation43_spill] sm:$0xff] }
 0x394   : > { %2302 = vmatprep.subr.bf16.mxu0 %v6608_v41  ;;  %2343 = vmatprep.subr.bf16.mxu1 %v6609_v50  ;;  %v6619_v41 = vld [vmem:[#allocation44_spill] sm:$0xff]  ;;  %v6620_v50 = vld [vmem:[#allocation45_spill] sm:$0xff] }
 0x397   : > { %2303 = vmatpush1.bf16.msra.mxu0 %v6610_v43  ;;  %2344 = vmatpush1.bf16.msra.mxu1 %v6611_v26  ;;  %v6621_v43 = vld [vmem:[#allocation46_spill] sm:$0xff]  ;;  %v6622_v26 = vld [vmem:[#allocation47_spill] sm:$0xff] }
 0x398   : > { %2304 = vmatprep.subr.bf16.mxu0 %v6612_v51  ;;  %2345 = vmatprep.subr.bf16.mxu1 %v6613_v0  ;;  %v6623_v51 = vld [vmem:[#allocation48_spill] sm:$0xff]  ;;  %v6624_v0 = vld [vmem:[#allocation49_spill] sm:$0xff] }
 0x39b   : > { %2305 = vmatpush1.bf16.msra.mxu0 %v6614_v56  ;;  %2346 = vmatpush1.bf16.msra.mxu1 %v6615_v7  ;;  %v6625_v56 = vld [vmem:[#allocation50_spill] sm:$0xff]  ;;  %v6626_v7 = vld [vmem:[#allocation51_spill] sm:$0xff] }
 0x39c   : > { %2306 = vmatprep.subr.bf16.mxu0 %v6616_v58  ;;  %2347 = vmatprep.subr.bf16.mxu1 %v6617_v1  ;;  %v6627_v58 = vld [vmem:[#allocation52_spill] sm:$0xff]  ;;  %v6628_v1 = vld [vmem:[#allocation53_spill] sm:$0xff] }
 0x39f   : > { %2307 = vmatpush1.bf16.msra.mxu0 %v6618_v36  ;;  %2348 = vmatpush1.bf16.msra.mxu1 %v6619_v41  ;;  %v6629_v36 = vld [vmem:[#allocation54_spill] sm:$0xff]  ;;  %v6630_v41 = vld [vmem:[#allocation55_spill] sm:$0xff] }
 0x3a0   : > { %2308 = vmatprep.subr.bf16.mxu0 %v6620_v50  ;;  %2349 = vmatprep.subr.bf16.mxu1 %v6621_v43  ;;  %v6631_v50 = vld [vmem:[#allocation56_spill] sm:$0xff]  ;;  %v6632_v43 = vld [vmem:[#allocation57_spill] sm:$0xff] }
 0x3a3   : > { %2309 = vmatpush1.bf16.msra.mxu0 %v6622_v26  ;;  %2350 = vmatpush1.bf16.msra.mxu1 %v6623_v51  ;;  %v6633_v26 = vld [vmem:[#allocation58_spill] sm:$0xff] }
 0x3a4   : > { %2310 = vmatprep.subr.bf16.mxu0 %v6624_v0  ;;  %2351 = vmatprep.subr.bf16.mxu1 %v6625_v56 }
 0x3a7   : > { %2311 = vmatpush1.bf16.msra.mxu0 %v6626_v7  ;;  %2352 = vmatpush1.bf16.msra.mxu1 %v6627_v58 }
 0x3a8   : > { %2312 = vmatprep.subr.bf16.mxu0 %v6628_v1  ;;  %2353 = vmatprep.subr.bf16.mxu1 %v6629_v36 }
 0x3ab   : > { %2313 = vmatpush1.bf16.msra.mxu0 %v6630_v41  ;;  %2354 = vmatpush1.bf16.msra.mxu1 %v6631_v50 }
 0x3ac   : > { %2376 = vmatprep.subr.bf16.mxu0 %v6632_v43  ;;  %2417 = vmatprep.subr.bf16.mxu1 %v6633_v26 }
 0x431   : > { %v2068_v51 = vpop.f32.mrb[24].mxu0  ;;  %v2109_v0 = vpop.f32.mrb[24].mxu1 }
 0x432   : > { %v2208_v42 = vrot.slane %v2109_v0, 4  ;;  %v2070_v56 = vpop.f32.mrb[25].mxu0  ;;  %v2111_v32 = vpop.f32.mrb[25].mxu1  ;;  %v2206_v43 = vrot.slane %v2068_v51, 4 }
 0x433   : > { %v2209_v7 = vrot.slane %v2111_v32, 4  ;;  %v2072_v63 = vpop.f32.mrb[26].mxu0  ;;  %v2113_v58 = vpop.f32.mrb[26].mxu1  ;;  %v2207_v26 = vrot.slane %v2070_v56, 4 }
 0x434   : > { %v2224_v1 = vadd.f32 %v2208_v42, %v5435_v18  ;;  %v2073_v2 = vpop.f32.mrb[27].mxu0  ;;  %v2114_v36 = vpop.f32.mrb[27].mxu1  ;;  %v2222_v0 = vadd.f32 %v2206_v43, %v5433_v25 }
 0x435   : > { %v2225_v41 = vadd.f32 %v2209_v7, %v5440_v13  ;;  %v2223_v32 = vadd.f32 %v2207_v26, %v6634_v20 }
 0x436   : > { %v4065_v48 = vmul.f32 -1.442695, %v2224_v1  ;;  %v4063_v42 = vmul.f32 -1.442695, %v2222_v0 }
 0x437   : > { %v4066_v50 = vmul.f32 -1.442695, %v2225_v41  ;;  %v4064_v2 = vmul.f32 -1.442695, %v2223_v32  ;;  %v2270_v41 = vrot.slane %v5569_v57, 6 }
 0x438   : > { %4281 = vpow2.f32 %v4065_v48  ;;  %v2271_v48 = vrot.slane %v5571_v39, 6 }
 0x439   : > { %4283 = vpow2.f32 %v4066_v50 }
 0x442   : > { %v4282_v49 = vpop.eup %4281 }
 0x443   : > { %v2250_v37 = vadd.f32 1.0, %v4282_v49  ;;  %v4284_v63 = vpop.eup %4283 }
 0x444   : > { %v2251_v58 = vadd.f32 1.0, %v4284_v63 }
 0x445   : > { %4285 = vrcp.f32 %v2250_v37 }
 0x446   : > { %4287 = vrcp.f32 %v2251_v58 }
 0x447   : > { %4289 = vpow2.f32 %v4063_v42 }
 0x448   : > { %4291 = vpow2.f32 %v4064_v2 }
 0x44f   : > { %v4286_v36 = vpop.eup %4285 }
 0x450   : > { %v2274_v50 = vmul.f32 %v4286_v36, %v2270_v41  ;;  %v4288_v51 = vpop.eup %4287 }
 0x451   : > { %v2275_v56 = vmul.f32 %v4288_v51, %v2271_v48  ;;  %v4290_v43 = vpop.eup %4289 }
 0x452   : > { %v4292_v49 = vpop.eup %4291  ;;  %v2248_v7 = vadd.f32 1.0, %v4290_v43 }
 0x453   : > { %v2249_v26 = vadd.f32 1.0, %v4292_v49 }
 0x454   : > { %4293 = vrcp.f32 %v2248_v7 }
 0x455   : > { %4295 = vrcp.f32 %v2249_v26 }
 0x459   : > { %v2150_v1 = vpop.f32.mrb[28].mxu0  ;;  %v2191_v37 = vpop.f32.mrb[28].mxu1 }
 0x45a   : > { %v2210_v63 = vrot.slane %v2150_v1, 4  ;;  %v2212_v0 = vrot.slane %v2191_v37, 4  ;;  %v2152_v32 = vpop.f32.mrb[29].mxu0  ;;  %v2193_v58 = vpop.f32.mrb[29].mxu1 }
 0x45b   : > { %v2211_v42 = vrot.slane %v2152_v32, 4  ;;  %v2213_v2 = vrot.slane %v2193_v58, 4  ;;  %v2154_v20 = vpop.f32.mrb[30].mxu0  ;;  %v2195_v57 = vpop.f32.mrb[30].mxu1 }
 0x45c   : > { %v2226_v39 = vadd.f32 %v2210_v63, %v5445_v4  ;;  %v2228_v41 = vadd.f32 %v2212_v0, %v5447_v40  ;;  %v2155_v36 = vpop.f32.mrb[31].mxu0  ;;  %v2196_v48 = vpop.f32.mrb[31].mxu1 }
 0x45d   : > { %v2227_v51 = vadd.f32 %v2211_v42, %v5449_v15  ;;  %v2229_v43 = vadd.f32 %v2213_v2, %v5451_v34 }
 0x45e   : > { %v4067_v49 = vmul.f32 -1.442695, %v2226_v39  ;;  %4297 = vtanh.f32 %v2228_v41  ;;  %v4294_v20 = vpop.eup %4293 }
 0x45f   : > { %v4068_v1 = vmul.f32 -1.442695, %v2227_v51  ;;  %4299 = vtanh.f32 %v2229_v43  ;;  %v4296_v37 = vpop.eup %4295 }
 0x460   : > { %4301 = vpow2.f32 %v4067_v49 }
 0x461   : > { %4303 = vpow2.f32 %v4068_v1 }
 0x468   : > { %v4298_v7 = vpop.eup %4297 }
 0x469   : > { %v4300_v32 = vpop.eup %4299  ;;  %v2276_v63 = vmul.f32 %v4298_v7, %v4294_v20  ;;  %v6638_v7 = vld [vmem:[#allocation83_spill] sm:$0xff] }
 0x46a   : > { %v4302_v58 = vpop.eup %4301  ;;  %v2277_v0 = vmul.f32 %v4300_v32, %v4296_v37  ;;  %v6637_v37 = vld [vmem:[#allocation82_spill] sm:$0xff]  ;;  %v6639_v32 = vld [vmem:[#allocation17_spill] sm:$0xff] }
 0x46b   : > { %v4304_v57 = vpop.eup %4303  ;;  %v2252_v36 = vadd.f32 1.0, %v4302_v58  ;;  %v5675_v26 = vadd.f32 %v2276_v63, %v2274_v50  ;;  %v6640_v63 = vld [vmem:[#allocation18_spill] sm:$0xff]  ;;  %v6641_v58 = vld [vmem:[#allocation19_spill] sm:$0xff] }
 0x46c   : > { %v2253_v42 = vadd.f32 1.0, %v4304_v57  ;;  %v5677_v48 = vadd.f32 %v2277_v0, %v2275_v56  ;;  %v6642_v0 = vld [vmem:[#allocation20_spill] sm:$0xff]  ;;  %v6643_v57 = vld [vmem:[#allocation21_spill] sm:$0xff] }
 0x46d   : > { %4305 = vrcp.f32 %v2252_v36  ;;  %v6644_v36 = vld [vmem:[#allocation22_spill] sm:$0xff] }
 0x46e   : > { %4307 = vtanh.f32 %v5675_v26 }
 0x46f   : > { %4309 = vrcp.f32 %v2253_v42  ;;  %v6645_v42 = vld [vmem:[#allocation23_spill] sm:$0xff] }
 0x470   : > { %4311 = vtanh.f32 %v5677_v48 }
 0x477   : > { %v4306_v2 = vpop.eup %4305 }
 0x478   : > { %v4308_v39 = vpop.eup %4307 }
 0x479   : > { %v4310_v41 = vpop.eup %4309  ;;  %v2282_v51 = vmul.f32 %v4308_v39, %v4306_v2  ;;  %v6646_v2 = vld [vmem:[#allocation24_spill] sm:$0xff]  ;;  %v6647_v39 = vld [vmem:[#allocation25_spill] sm:$0xff] }
 0x47a   : > { %v4312_v43 = vpop.eup %4311 }
 0x47b   : > { %v2283_v49 = vmul.f32 %v4312_v43, %v4310_v41  ;;  %v5681_v1 = vpack.c.bf16 %v2282_v51, %v2282_v51  ;;  %v6648_v41 = vld [vmem:[#allocation26_spill] sm:$0xff]  ;;  %v6649_v51 = vld [vmem:[#allocation27_spill] sm:$0xff]  ;;  %v6650_v43 = vld [vmem:[#allocation28_spill] sm:$0xff] }
 0x47d   : > { %6635 = vst [vmem:[#allocation61_spill] sm:$0xff] %v5681_v1  ;;  %v5683_v20 = vpack.c.bf16 %v2283_v49, %v2283_v49  ;;  %v2288_v56 = vrot.slane %v5681_v1, 2  ;;  %v6651_v49 = vld [vmem:[#allocation29_spill] sm:$0xff] }
 0x47e   : > { %v6655_v1 = vld [vmem:[#allocation33_spill] sm:$0xff] }
 0x47f   : > { %6636 = vst [vmem:[#allocation62_spill] sm:$0xff] %v5683_v20  ;;  %v2289_v50 = vrot.slane %v5683_v20, 2  ;;  %v6654_v20 = vld [vmem:[#allocation32_spill] sm:$0xff] }
 0x481   : > { %4069 = vmatprep.mubr.msk.bf16.mxu0 %vm890_vm1, %v2289_v50  ;;  %4070 = vmatprep.mubr.msk.bf16.mxu1 %vm890_vm1, %v2289_v50 }
 0x482   : > { %2327 = vmatmul.mubr.bf16.vlgmr.msra.gmra.mrb[32].mxu0 %v2288_v56  ;;  %2368 = vmatmul.mubr.bf16.vlgmr.msra.gmra.mrb[32].mxu1 %v2288_v56 }
 0x483   : > { %2377 = vmatpush1.bf16.msra.mxu0 %v5219_v22  ;;  %2418 = vmatpush1.bf16.msra.mxu1 %v5223_v27 }
 0x484   : > { %4071 = vmatprep.mubr.msk.bf16.mxu0 %vm890_vm1, %v2289_v50  ;;  %4072 = vmatprep.mubr.msk.bf16.mxu1 %vm890_vm1, %v2289_v50  ;;  %v6652_v50 = vld [vmem:[#allocation30_spill] sm:$0xff] }
 0x485   : > { %2378 = vmatprep.subr.bf16.mxu0 %v6538_v9  ;;  %2419 = vmatprep.subr.bf16.mxu1 %v6539_v8 }
 0x487   : > { %2379 = vmatpush1.bf16.msra.mxu0 %v6540_v45  ;;  %2420 = vmatpush1.bf16.msra.mxu1 %v6541_v46 }
 0x488   : > { %2380 = vmatprep.subr.bf16.mxu0 %v6542_v55  ;;  %2421 = vmatprep.subr.bf16.mxu1 %v6543_v29 }
 0x48b   : > { %2381 = vmatpush1.bf16.msra.mxu0 %v6544_v61  ;;  %2422 = vmatpush1.bf16.msra.mxu1 %v6545_v6 }
 0x48c   : > { %2382 = vmatprep.subr.bf16.mxu0 %v6546_v11  ;;  %2423 = vmatprep.subr.bf16.mxu1 %v6547_v30 }
 0x48f   : > { %2383 = vmatpush1.bf16.msra.mxu0 %v6548_v16  ;;  %2424 = vmatpush1.bf16.msra.mxu1 %v6549_v28 }
 0x490   : > { %2384 = vmatprep.subr.bf16.mxu0 %v6550_v33  ;;  %2425 = vmatprep.subr.bf16.mxu1 %v6551_v10 }
 0x493   : > { %2385 = vmatpush1.bf16.msra.mxu0 %v6552_v19  ;;  %2426 = vmatpush1.bf16.msra.mxu1 %v6553_v47 }
 0x494   : > { %2386 = vmatprep.subr.bf16.mxu0 %v6554_v23  ;;  %2427 = vmatprep.subr.bf16.mxu1 %v6555_v24 }
 0x497   : > { %2387 = vmatpush1.bf16.msra.mxu0 %v6556_v59  ;;  %2428 = vmatpush1.bf16.msra.mxu1 %v6557_v44 }
 0x498   : > { %2388 = vmatprep.subr.bf16.mxu0 %v6558_v17  ;;  %2429 = vmatprep.subr.bf16.mxu1 %v6559_v35 }
 0x49b   : > { %2389 = vmatpush1.bf16.msra.mxu0 %v5319_v3  ;;  %2430 = vmatpush1.bf16.msra.mxu1 %v5323_v54 }
 0x49c   : > { %2390 = vmatprep.subr.bf16.mxu0 %v5325_v62  ;;  %2431 = vmatprep.subr.bf16.mxu1 %v6560_v12 }
 0x49f   : > { %2391 = vmatpush1.bf16.msra.mxu0 %v5335_v31  ;;  %2432 = vmatpush1.bf16.msra.mxu1 %v5339_v60 }
 0x4a0   : > { %2392 = vmatprep.subr.bf16.mxu0 %v5341_v21  ;;  %2433 = vmatprep.subr.bf16.mxu1 %v5344_v53 }
 0x4a3   : > { %2393 = vmatpush1.bf16.msra.mxu0 %v5351_v14  ;;  %2434 = vmatpush1.bf16.msra.mxu1 %v5355_v38 }
 0x4a4   : > { %2394 = vmatprep.subr.bf16.mxu0 %v5357_v52  ;;  %2435 = vmatprep.subr.bf16.mxu1 %v5360_v5 }
 0x4a7   : > { %2395 = vmatpush1.bf16.msra.mxu0 %v6637_v37  ;;  %2436 = vmatpush1.bf16.msra.mxu1 %v6638_v7  ;;  %v6681_v37 = vld [vmem:[#allocation92_spill] sm:$0xff] }
 0x4a8   : > { %2554 = vmatprep.subr.bf16.mxu0 %v6639_v32  ;;  %2595 = vmatprep.subr.bf16.mxu1 %v6640_v63 }
 0x4aa   : > { %2409 = vmatmul.mubr.bf16.vlgmr.msra.gmra.mrb[36].mxu0 %v2288_v56  ;;  %2450 = vmatmul.mubr.bf16.vlgmr.msra.gmra.mrb[36].mxu1 %v2288_v56  ;;  %v6653_v56 = vld [vmem:[#allocation31_spill] sm:$0xff] }
 0x4ab   : > { %2555 = vmatpush1.bf16.msra.mxu0 %v6641_v58  ;;  %2596 = vmatpush1.bf16.msra.mxu1 %v6642_v0 }
 0x4ac   : > { %2556 = vmatprep.subr.bf16.mxu0 %v6643_v57  ;;  %2597 = vmatprep.subr.bf16.mxu1 %v6644_v36 }
 0x4af   : > { %2557 = vmatpush1.bf16.msra.mxu0 %v6645_v42  ;;  %2598 = vmatpush1.bf16.msra.mxu1 %v6646_v2  ;;  %v6656_v42 = vld [vmem:[#allocation34_spill] sm:$0xff]  ;;  %v6657_v2 = vld [vmem:[#allocation35_spill] sm:$0xff] }
 0x4b0   : > { %2558 = vmatprep.subr.bf16.mxu0 %v6647_v39  ;;  %2599 = vmatprep.subr.bf16.mxu1 %v6648_v41  ;;  %v6658_v39 = vld [vmem:[#allocation36_spill] sm:$0xff]  ;;  %v6659_v41 = vld [vmem:[#allocation37_spill] sm:$0xff] }
 0x4b3   : > { %2559 = vmatpush1.bf16.msra.mxu0 %v6649_v51  ;;  %2600 = vmatpush1.bf16.msra.mxu1 %v6650_v43  ;;  %v6660_v51 = vld [vmem:[#allocation38_spill] sm:$0xff]  ;;  %v6661_v43 = vld [vmem:[#allocation39_spill] sm:$0xff] }
 0x4b4   : > { %2560 = vmatprep.subr.bf16.mxu0 %v6651_v49  ;;  %2601 = vmatprep.subr.bf16.mxu1 %v6652_v50  ;;  %v6662_v49 = vld [vmem:[#allocation40_spill] sm:$0xff]  ;;  %v6663_v50 = vld [vmem:[#allocation41_spill] sm:$0xff] }
 0x4b7   : > { %2561 = vmatpush1.bf16.msra.mxu0 %v6653_v56  ;;  %2602 = vmatpush1.bf16.msra.mxu1 %v6654_v20  ;;  %v6664_v56 = vld [vmem:[#allocation42_spill] sm:$0xff]  ;;  %v6665_v20 = vld [vmem:[#allocation43_spill] sm:$0xff] }
 0x4b8   : > { %2562 = vmatprep.subr.bf16.mxu0 %v6655_v1  ;;  %2603 = vmatprep.subr.bf16.mxu1 %v6656_v42  ;;  %v6666_v1 = vld [vmem:[#allocation44_spill] sm:$0xff]  ;;  %v6667_v42 = vld [vmem:[#allocation45_spill] sm:$0xff] }
 0x4bb   : > { %2563 = vmatpush1.bf16.msra.mxu0 %v6657_v2  ;;  %2604 = vmatpush1.bf16.msra.mxu1 %v6658_v39  ;;  %v6668_v2 = vld [vmem:[#allocation46_spill] sm:$0xff]  ;;  %v6669_v39 = vld [vmem:[#allocation47_spill] sm:$0xff] }
 0x4bc   : > { %2564 = vmatprep.subr.bf16.mxu0 %v6659_v41  ;;  %2605 = vmatprep.subr.bf16.mxu1 %v6660_v51  ;;  %v6670_v41 = vld [vmem:[#allocation48_spill] sm:$0xff]  ;;  %v6671_v51 = vld [vmem:[#allocation49_spill] sm:$0xff] }
 0x4bf   : > { %2565 = vmatpush1.bf16.msra.mxu0 %v6661_v43  ;;  %2606 = vmatpush1.bf16.msra.mxu1 %v6662_v49  ;;  %v6672_v43 = vld [vmem:[#allocation50_spill] sm:$0xff]  ;;  %v6673_v49 = vld [vmem:[#allocation51_spill] sm:$0xff] }
 0x4c0   : > { %2566 = vmatprep.subr.bf16.mxu0 %v6663_v50  ;;  %2607 = vmatprep.subr.bf16.mxu1 %v6664_v56  ;;  %v6674_v50 = vld [vmem:[#allocation52_spill] sm:$0xff]  ;;  %v6675_v56 = vld [vmem:[#allocation53_spill] sm:$0xff] }
 0x4c3   : > { %2567 = vmatpush1.bf16.msra.mxu0 %v6665_v20  ;;  %2608 = vmatpush1.bf16.msra.mxu1 %v6666_v1  ;;  %v6676_v20 = vld [vmem:[#allocation54_spill] sm:$0xff]  ;;  %v6677_v1 = vld [vmem:[#allocation55_spill] sm:$0xff] }
 0x4c4   : > { %2568 = vmatprep.subr.bf16.mxu0 %v6667_v42  ;;  %2609 = vmatprep.subr.bf16.mxu1 %v6668_v2  ;;  %v6678_v42 = vld [vmem:[#allocation56_spill] sm:$0xff]  ;;  %v6679_v2 = vld [vmem:[#allocation57_spill] sm:$0xff] }
 0x4c7   : > { %2569 = vmatpush1.bf16.msra.mxu0 %v6669_v39  ;;  %2610 = vmatpush1.bf16.msra.mxu1 %v6670_v41  ;;  %v6680_v39 = vld [vmem:[#allocation58_spill] sm:$0xff] }
 0x4c8   : > { %2570 = vmatprep.subr.bf16.mxu0 %v6671_v51  ;;  %2611 = vmatprep.subr.bf16.mxu1 %v6672_v43 }
 0x4cb   : > { %2571 = vmatpush1.bf16.msra.mxu0 %v6673_v49  ;;  %2612 = vmatpush1.bf16.msra.mxu1 %v6674_v50 }
 0x4cc   : > { %2572 = vmatprep.subr.bf16.mxu0 %v6675_v56  ;;  %2613 = vmatprep.subr.bf16.mxu1 %v6676_v20 }
 0x4cf   : > { %2573 = vmatpush1.bf16.msra.mxu0 %v6677_v1  ;;  %2614 = vmatpush1.bf16.msra.mxu1 %v6678_v42 }
 0x4d0   : > { %2636 = vmatprep.subr.bf16.mxu0 %v6679_v2  ;;  %2677 = vmatprep.subr.bf16.mxu1 %v6680_v39 }
 0x555   : > { %v2328_v41 = vpop.f32.mrb[32].mxu0  ;;  %v2369_v51 = vpop.f32.mrb[32].mxu1 }
 0x556   : > { %v2468_v36 = vrot.slane %v2369_v51, 2  ;;  %v2330_v43 = vpop.f32.mrb[33].mxu0  ;;  %v2371_v57 = vpop.f32.mrb[33].mxu1  ;;  %v2466_v2 = vrot.slane %v2328_v41, 2 }
 0x557   : > { %v2469_v49 = vrot.slane %v2371_v57, 2  ;;  %v2332_v0 = vpop.f32.mrb[34].mxu0  ;;  %v2373_v50 = vpop.f32.mrb[34].mxu1  ;;  %v2467_v39 = vrot.slane %v2330_v43, 2 }
 0x558   : > { %v2484_v56 = vadd.f32 %v2468_v36, %v5435_v18  ;;  %v2333_v58 = vpop.f32.mrb[35].mxu0  ;;  %v2374_v20 = vpop.f32.mrb[35].mxu1  ;;  %v2482_v51 = vadd.f32 %v2466_v2, %v5433_v25 }
 0x559   : > { %v2485_v1 = vadd.f32 %v2469_v49, %v5440_v13  ;;  %v2483_v57 = vadd.f32 %v2467_v39, %v6681_v37  ;;  %v2530_v13 = vrot.slane %v5675_v26, 6  ;;  %v2531_v20 = vrot.slane %v5677_v48, 6 }
 0x55a   : > { %v4075_v63 = vmul.f32 -1.442695, %v2484_v56  ;;  %v4073_v18 = vmul.f32 -1.442695, %v2482_v51 }
 0x55b   : > { %v4076_v42 = vmul.f32 -1.442695, %v2485_v1  ;;  %v4074_v58 = vmul.f32 -1.442695, %v2483_v57 }
 0x55c   : > { %4313 = vpow2.f32 %v4075_v63 }
 0x55d   : > { %4315 = vpow2.f32 %v4076_v42 }
 0x566   : > { %v4314_v32 = vpop.eup %4313 }
 0x567   : > { %v2510_v7 = vadd.f32 1.0, %v4314_v32  ;;  %v4316_v0 = vpop.eup %4315 }
 0x568   : > { %v2511_v50 = vadd.f32 1.0, %v4316_v0 }
 0x569   : > { %4317 = vrcp.f32 %v2510_v7 }
 0x56a   : > { %4319 = vrcp.f32 %v2511_v50 }
 0x56b   : > { %4321 = vpow2.f32 %v4073_v18 }
 0x56c   : > { %4323 = vpow2.f32 %v4074_v58 }
 0x573   : > { %v4318_v1 = vpop.eup %4317 }
 0x574   : > { %v2534_v63 = vmul.f32 %v4318_v1, %v2530_v13  ;;  %v4320_v36 = vpop.eup %4319 }
 0x575   : > { %v2535_v42 = vmul.f32 %v4320_v36, %v2531_v20  ;;  %v4322_v25 = vpop.eup %4321 }
 0x576   : > { %v4324_v32 = vpop.eup %4323  ;;  %v2508_v2 = vadd.f32 1.0, %v4322_v25 }
 0x577   : > { %v2509_v37 = vadd.f32 1.0, %v4324_v32 }
 0x578   : > { %4325 = vrcp.f32 %v2508_v2 }
 0x579   : > { %4327 = vrcp.f32 %v2509_v37 }
 0x57d   : > { %v2410_v39 = vpop.f32.mrb[36].mxu0  ;;  %v2451_v7 = vpop.f32.mrb[36].mxu1 }
 0x57e   : > { %v2470_v41 = vrot.slane %v2410_v39, 2  ;;  %v2472_v43 = vrot.slane %v2451_v7, 2  ;;  %v2412_v49 = vpop.f32.mrb[37].mxu0  ;;  %v2453_v56 = vpop.f32.mrb[37].mxu1 }
 0x57f   : > { %v2471_v51 = vrot.slane %v2412_v49, 2  ;;  %v2473_v57 = vrot.slane %v2453_v56, 2  ;;  %v2414_v0 = vpop.f32.mrb[38].mxu0  ;;  %v2455_v26 = vpop.f32.mrb[38].mxu1 }
 0x580   : > { %v2486_v48 = vadd.f32 %v2470_v41, %v5445_v4  ;;  %v2488_v50 = vadd.f32 %v2472_v43, %v5447_v40  ;;  %v2415_v18 = vpop.f32.mrb[39].mxu0  ;;  %v2456_v58 = vpop.f32.mrb[39].mxu1 }
 0x581   : > { %v2487_v13 = vadd.f32 %v2471_v51, %v5449_v15  ;;  %v2489_v1 = vadd.f32 %v2473_v57, %v5451_v34  ;;  %v6684_v18 = vld [vmem:[#allocation82_spill] sm:$0xff]  ;;  %v6685_v58 = vld [vmem:[#allocation83_spill] sm:$0xff] }
 0x582   : > { %v4077_v20 = vmul.f32 -1.442695, %v2486_v48  ;;  %4329 = vtanh.f32 %v2488_v50  ;;  %v4326_v25 = vpop.eup %4325 }
 0x583   : > { %v4078_v36 = vmul.f32 -1.442695, %v2487_v13  ;;  %4331 = vtanh.f32 %v2489_v1  ;;  %v4328_v32 = vpop.eup %4327  ;;  %v6686_v13 = vld [vmem:[#allocation17_spill] sm:$0xff]  ;;  %v6687_v1 = vld [vmem:[#allocation18_spill] sm:$0xff] }
 0x584   : > { %4333 = vpow2.f32 %v4077_v20  ;;  %v6688_v20 = vld [vmem:[#allocation19_spill] sm:$0xff] }
 0x585   : > { %4335 = vpow2.f32 %v4078_v36  ;;  %v6689_v36 = vld [vmem:[#allocation20_spill] sm:$0xff] }
 0x58c   : > { %v4330_v2 = vpop.eup %4329 }
 0x58d   : > { %v4332_v39 = vpop.eup %4331  ;;  %v2536_v4 = vmul.f32 %v4330_v2, %v4326_v25  ;;  %v6690_v25 = vld [vmem:[#allocation21_spill] sm:$0xff]  ;;  %v6692_v2 = vld [vmem:[#allocation23_spill] sm:$0xff] }
 0x58e   : > { %v4334_v7 = vpop.eup %4333  ;;  %v2537_v40 = vmul.f32 %v4332_v39, %v4328_v32  ;;  %v6691_v32 = vld [vmem:[#allocation22_spill] sm:$0xff]  ;;  %v6693_v39 = vld [vmem:[#allocation24_spill] sm:$0xff] }
 0x58f   : > { %v4336_v41 = vpop.eup %4335  ;;  %v2512_v43 = vadd.f32 1.0, %v4334_v7  ;;  %v5781_v37 = vadd.f32 %v2536_v4, %v2534_v63  ;;  %v6694_v4 = vld [vmem:[#allocation25_spill] sm:$0xff]  ;;  %v6695_v7 = vld [vmem:[#allocation26_spill] sm:$0xff] }
 0x590   : > { %v2513_v15 = vadd.f32 1.0, %v4336_v41  ;;  %v5783_v49 = vadd.f32 %v2537_v40, %v2535_v42  ;;  %v6696_v40 = vld [vmem:[#allocation27_spill] sm:$0xff]  ;;  %v6697_v41 = vld [vmem:[#allocation28_spill] sm:$0xff] }
 0x591   : > { %4337 = vrcp.f32 %v2512_v43  ;;  %v6698_v43 = vld [vmem:[#allocation29_spill] sm:$0xff] }
 0x592   : > { %4339 = vtanh.f32 %v5781_v37 }
 0x593   : > { %4341 = vrcp.f32 %v2513_v15  ;;  %v6699_v15 = vld [vmem:[#allocation30_spill] sm:$0xff] }
 0x594   : > { %4343 = vtanh.f32 %v5783_v49 }
 0x59b   : > { %v4338_v34 = vpop.eup %4337 }
 0x59c   : > { %v4340_v56 = vpop.eup %4339 }
 0x59d   : > { %v4342_v51 = vpop.eup %4341  ;;  %v2542_v57 = vmul.f32 %v4340_v56, %v4338_v34  ;;  %v6700_v34 = vld [vmem:[#allocation31_spill] sm:$0xff]  ;;  %v6701_v56 = vld [vmem:[#allocation32_spill] sm:$0xff] }
 0x59e   : > { %v4344_v0 = vpop.eup %4343 }
 0x59f   : > { %v2543_v26 = vmul.f32 %v4344_v0, %v4342_v51  ;;  %v5787_v48 = vpack.c.bf16 %v2542_v57, %v2542_v57  ;;  %v6702_v51 = vld [vmem:[#allocation33_spill] sm:$0xff]  ;;  %v6703_v57 = vld [vmem:[#allocation34_spill] sm:$0xff]  ;;  %v6704_v0 = vld [vmem:[#allocation35_spill] sm:$0xff] }
 0x5a1   : > { %6682 = vst [vmem:[#allocation63_spill] sm:$0xff] %v5787_v48  ;;  %v5789_v50 = vpack.c.bf16 %v2543_v26, %v2543_v26  ;;  %v2548_v42 = vrot.slane %v5787_v48, 3  ;;  %v6705_v26 = vld [vmem:[#allocation36_spill] sm:$0xff] }
 0x5a2   : > { %v6709_v48 = vld [vmem:[#allocation40_spill] sm:$0xff] }
 0x5a3   : > { %6683 = vst [vmem:[#allocation64_spill] sm:$0xff] %v5789_v50  ;;  %v2549_v63 = vrot.slane %v5789_v50, 3  ;;  %v6708_v50 = vld [vmem:[#allocation39_spill] sm:$0xff] }
 0x5a5   : > { %4079 = vmatprep.mubr.msk.bf16.mxu0 %vm890_vm1, %v2549_v63  ;;  %4080 = vmatprep.mubr.msk.bf16.mxu1 %vm890_vm1, %v2549_v63 }
 0x5a6   : > { %2587 = vmatmul.mubr.bf16.vlgmr.msra.gmra.mrb[40].mxu0 %v2548_v42  ;;  %2628 = vmatmul.mubr.bf16.vlgmr.msra.gmra.mrb[40].mxu1 %v2548_v42 }
 0x5a7   : > { %2637 = vmatpush1.bf16.msra.mxu0 %v5219_v22  ;;  %2678 = vmatpush1.bf16.msra.mxu1 %v5223_v27 }
 0x5a8   : > { %4081 = vmatprep.mubr.msk.bf16.mxu0 %vm890_vm1, %v2549_v63  ;;  %4082 = vmatprep.mubr.msk.bf16.mxu1 %vm890_vm1, %v2549_v63  ;;  %v6706_v63 = vld [vmem:[#allocation37_spill] sm:$0xff] }
 0x5a9   : > { %2638 = vmatprep.subr.bf16.mxu0 %v6538_v9  ;;  %2679 = vmatprep.subr.bf16.mxu1 %v6539_v8 }
 0x5ab   : > { %2639 = vmatpush1.bf16.msra.mxu0 %v6540_v45  ;;  %2680 = vmatpush1.bf16.msra.mxu1 %v6541_v46 }
 0x5ac   : > { %2640 = vmatprep.subr.bf16.mxu0 %v6542_v55  ;;  %2681 = vmatprep.subr.bf16.mxu1 %v6543_v29 }
 0x5af   : > { %2641 = vmatpush1.bf16.msra.mxu0 %v6544_v61  ;;  %2682 = vmatpush1.bf16.msra.mxu1 %v6545_v6 }
 0x5b0   : > { %2642 = vmatprep.subr.bf16.mxu0 %v6546_v11  ;;  %2683 = vmatprep.subr.bf16.mxu1 %v6547_v30 }
 0x5b3   : > { %2643 = vmatpush1.bf16.msra.mxu0 %v6548_v16  ;;  %2684 = vmatpush1.bf16.msra.mxu1 %v6549_v28 }
 0x5b4   : > { %2644 = vmatprep.subr.bf16.mxu0 %v6550_v33  ;;  %2685 = vmatprep.subr.bf16.mxu1 %v6551_v10 }
 0x5b7   : > { %2645 = vmatpush1.bf16.msra.mxu0 %v6552_v19  ;;  %2686 = vmatpush1.bf16.msra.mxu1 %v6553_v47 }
 0x5b8   : > { %2646 = vmatprep.subr.bf16.mxu0 %v6554_v23  ;;  %2687 = vmatprep.subr.bf16.mxu1 %v6555_v24 }
 0x5bb   : > { %2647 = vmatpush1.bf16.msra.mxu0 %v6556_v59  ;;  %2688 = vmatpush1.bf16.msra.mxu1 %v6557_v44 }
 0x5bc   : > { %2648 = vmatprep.subr.bf16.mxu0 %v6558_v17  ;;  %2689 = vmatprep.subr.bf16.mxu1 %v6559_v35 }
 0x5bf   : > { %2649 = vmatpush1.bf16.msra.mxu0 %v5319_v3  ;;  %2690 = vmatpush1.bf16.msra.mxu1 %v5323_v54 }
 0x5c0   : > { %2650 = vmatprep.subr.bf16.mxu0 %v5325_v62  ;;  %2691 = vmatprep.subr.bf16.mxu1 %v6560_v12 }
 0x5c3   : > { %2651 = vmatpush1.bf16.msra.mxu0 %v5335_v31  ;;  %2692 = vmatpush1.bf16.msra.mxu1 %v5339_v60 }
 0x5c4   : > { %2652 = vmatprep.subr.bf16.mxu0 %v5341_v21  ;;  %2693 = vmatprep.subr.bf16.mxu1 %v5344_v53 }
 0x5c7   : > { %2653 = vmatpush1.bf16.msra.mxu0 %v5351_v14  ;;  %2694 = vmatpush1.bf16.msra.mxu1 %v5355_v38 }
 0x5c8   : > { %2654 = vmatprep.subr.bf16.mxu0 %v5357_v52  ;;  %2695 = vmatprep.subr.bf16.mxu1 %v5360_v5 }
 0x5cb   : > { %2655 = vmatpush1.bf16.msra.mxu0 %v6684_v18  ;;  %2696 = vmatpush1.bf16.msra.mxu1 %v6685_v58 }
 0x5cc   : > { %2785 = vmatprep.subr.bf16.mxu0 %v6686_v13  ;;  %2826 = vmatprep.subr.bf16.mxu1 %v6687_v1 }
 0x5ce   : > { %2669 = vmatmul.mubr.bf16.vlgmr.msra.gmra.mrb[44].mxu0 %v2548_v42  ;;  %2710 = vmatmul.mubr.bf16.vlgmr.msra.gmra.mrb[44].mxu1 %v2548_v42  ;;  %v6707_v42 = vld [vmem:[#allocation38_spill] sm:$0xff] }
 0x5cf   : > { %2786 = vmatpush1.bf16.msra.mxu0 %v6688_v20  ;;  %2827 = vmatpush1.bf16.msra.mxu1 %v6689_v36 }
 0x5d0   : > { %2787 = vmatprep.subr.bf16.mxu0 %v6690_v25  ;;  %2828 = vmatprep.subr.bf16.mxu1 %v6691_v32  ;;  %v6731_v32 = vld [vmem:[#allocation86_spill] sm:$0xff] }
 0x5d3   : > { %2788 = vmatpush1.bf16.msra.mxu0 %v6692_v2  ;;  %2829 = vmatpush1.bf16.msra.mxu1 %v6693_v39 }
 0x5d4   : > { %2789 = vmatprep.subr.bf16.mxu0 %v6694_v4  ;;  %2830 = vmatprep.subr.bf16.mxu1 %v6695_v7 }
 0x5d7   : > { %2790 = vmatpush1.bf16.msra.mxu0 %v6696_v40  ;;  %2831 = vmatpush1.bf16.msra.mxu1 %v6697_v41  ;;  %v6729_v40 = vld [vmem:[#allocation87_spill] sm:$0xff] }
 0x5d8   : > { %2791 = vmatprep.subr.bf16.mxu0 %v6698_v43  ;;  %2832 = vmatprep.subr.bf16.mxu1 %v6699_v15  ;;  %v6710_v15 = vld [vmem:[#allocation41_spill] sm:$0xff] }
 0x5d9   : > { %v6728_v43 = vld [vmem:[#allocation85_spill] sm:$0xff] }
 0x5db   : > { %2792 = vmatpush1.bf16.msra.mxu0 %v6700_v34  ;;  %2833 = vmatpush1.bf16.msra.mxu1 %v6701_v56  ;;  %v6711_v34 = vld [vmem:[#allocation42_spill] sm:$0xff]  ;;  %v6712_v56 = vld [vmem:[#allocation43_spill] sm:$0xff] }
 0x5dc   : > { %2793 = vmatprep.subr.bf16.mxu0 %v6702_v51  ;;  %2834 = vmatprep.subr.bf16.mxu1 %v6703_v57  ;;  %v6713_v51 = vld [vmem:[#allocation44_spill] sm:$0xff]  ;;  %v6714_v57 = vld [vmem:[#allocation45_spill] sm:$0xff] }
 0x5df   : > { %2794 = vmatpush1.bf16.msra.mxu0 %v6704_v0  ;;  %2835 = vmatpush1.bf16.msra.mxu1 %v6705_v26  ;;  %v6715_v0 = vld [vmem:[#allocation46_spill] sm:$0xff]  ;;  %v6716_v26 = vld [vmem:[#allocation47_spill] sm:$0xff] }
 0x5e0   : > { %2795 = vmatprep.subr.bf16.mxu0 %v6706_v63  ;;  %2836 = vmatprep.subr.bf16.mxu1 %v6707_v42  ;;  %v6717_v63 = vld [vmem:[#allocation48_spill] sm:$0xff]  ;;  %v6718_v42 = vld [vmem:[#allocation49_spill] sm:$0xff] }
 0x5e3   : > { %2796 = vmatpush1.bf16.msra.mxu0 %v6708_v50  ;;  %2837 = vmatpush1.bf16.msra.mxu1 %v6709_v48  ;;  %v6719_v50 = vld [vmem:[#allocation50_spill] sm:$0xff]  ;;  %v6720_v48 = vld [vmem:[#allocation51_spill] sm:$0xff] }
 0x5e4   : > { %2797 = vmatprep.subr.bf16.mxu0 %v6710_v15  ;;  %2838 = vmatprep.subr.bf16.mxu1 %v6711_v34  ;;  %v6721_v15 = vld [vmem:[#allocation52_spill] sm:$0xff]  ;;  %v6722_v34 = vld [vmem:[#allocation53_spill] sm:$0xff] }
 0x5e7   : > { %2798 = vmatpush1.bf16.msra.mxu0 %v6712_v56  ;;  %2839 = vmatpush1.bf16.msra.mxu1 %v6713_v51  ;;  %v6723_v56 = vld [vmem:[#allocation54_spill] sm:$0xff]  ;;  %v6724_v51 = vld [vmem:[#allocation55_spill] sm:$0xff] }
 0x5e8   : > { %2799 = vmatprep.subr.bf16.mxu0 %v6714_v57  ;;  %2840 = vmatprep.subr.bf16.mxu1 %v6715_v0  ;;  %v6725_v57 = vld [vmem:[#allocation56_spill] sm:$0xff]  ;;  %v6726_v0 = vld [vmem:[#allocation57_spill] sm:$0xff] }
 0x5eb   : > { %2800 = vmatpush1.bf16.msra.mxu0 %v6716_v26  ;;  %2841 = vmatpush1.bf16.msra.mxu1 %v6717_v63  ;;  %v6727_v26 = vld [vmem:[#allocation58_spill] sm:$0xff] }
 0x5ec   : > { %2801 = vmatprep.subr.bf16.mxu0 %v6718_v42  ;;  %2842 = vmatprep.subr.bf16.mxu1 %v6719_v50 }
 0x5ef   : > { %2802 = vmatpush1.bf16.msra.mxu0 %v6720_v48  ;;  %2843 = vmatpush1.bf16.msra.mxu1 %v6721_v15 }
 0x5f0   : > { %2803 = vmatprep.subr.bf16.mxu0 %v6722_v34  ;;  %2844 = vmatprep.subr.bf16.mxu1 %v6723_v56 }
 0x5f3   : > { %2804 = vmatpush1.bf16.msra.mxu0 %v6724_v51  ;;  %2845 = vmatpush1.bf16.msra.mxu1 %v6725_v57 }
 0x5f4   : > { %2867 = vmatprep.subr.bf16.mxu0 %v6726_v0  ;;  %2908 = vmatprep.subr.bf16.mxu1 %v6727_v26  ;;  %v6730_v0 = vld [vmem:[#allocation84_spill] sm:$0xff] }
 0x679   : > { %v2588_v63 = vpop.f32.mrb[40].mxu0  ;;  %v2629_v42 = vpop.f32.mrb[40].mxu1 }
 0x67a   : > { %v2720_v50 = vadd.f32 %v2629_v42, %v6728_v43  ;;  %v2590_v41 = vpop.f32.mrb[41].mxu0  ;;  %v2631_v48 = vpop.f32.mrb[41].mxu1  ;;  %v2718_v2 = vadd.f32 %v2588_v63, %v6730_v0 }
 0x67b   : > { %v2721_v15 = vadd.f32 %v2631_v48, %v6729_v40  ;;  %v2592_v7 = vpop.f32.mrb[42].mxu0  ;;  %v2633_v34 = vpop.f32.mrb[42].mxu1  ;;  %v2719_v25 = vadd.f32 %v2590_v41, %v6731_v32  ;;  %v2766_v48 = vrot.slane %v5781_v37, 6  ;;  %v6734_v37 = vld [vmem:[#allocation90_spill] sm:$0xff] }
 0x67c   : > { %v4085_v4 = vmul.f32 -1.442695, %v2720_v50  ;;  %v2593_v56 = vpop.f32.mrb[43].mxu0  ;;  %v2634_v39 = vpop.f32.mrb[43].mxu1  ;;  %v4083_v43 = vmul.f32 -1.442695, %v2718_v2 }
 0x67d   : > { %v4086_v51 = vmul.f32 -1.442695, %v2721_v15  ;;  %v4084_v20 = vmul.f32 -1.442695, %v2719_v25  ;;  %v6733_v2 = vld [vmem:[#allocation89_spill] sm:$0xff] }
 0x67e   : > { %4345 = vpow2.f32 %v4085_v4  ;;  %v2767_v4 = vrot.slane %v5783_v49, 6 }
 0x67f   : > { %4347 = vpow2.f32 %v4086_v51 }
 0x688   : > { %v4346_v57 = vpop.eup %4345 }
 0x689   : > { %v2746_v26 = vadd.f32 1.0, %v4346_v57  ;;  %v4348_v36 = vpop.eup %4347 }
 0x68a   : > { %v2747_v42 = vadd.f32 1.0, %v4348_v36  ;;  %v6732_v36 = vld [vmem:[#allocation88_spill] sm:$0xff] }
 0x68b   : > { %4349 = vrcp.f32 %v2746_v26 }
 0x68c   : > { %4351 = vrcp.f32 %v2747_v42 }
 0x68d   : > { %4353 = vpow2.f32 %v4083_v43 }
 0x68e   : > { %4355 = vpow2.f32 %v4084_v20 }
 0x695   : > { %v4350_v50 = vpop.eup %4349 }
 0x696   : > { %v2770_v39 = vmul.f32 %v4350_v50, %v2766_v48  ;;  %v4352_v7 = vpop.eup %4351  ;;  %v6735_v48 = vld [vmem:[#allocation91_spill] sm:$0xff] }
 0x697   : > { %v2771_v15 = vmul.f32 %v4352_v7, %v2767_v4  ;;  %v4354_v34 = vpop.eup %4353 }
 0x698   : > { %v4356_v56 = vpop.eup %4355  ;;  %v2744_v51 = vadd.f32 1.0, %v4354_v34 }
 0x699   : > { %v2745_v41 = vadd.f32 1.0, %v4356_v56 }
 0x69a   : > { %4357 = vrcp.f32 %v2744_v51 }
 0x69b   : > { %4359 = vrcp.f32 %v2745_v41 }
 0x6a1   : > { %v2670_v57 = vpop.f32.mrb[44].mxu0  ;;  %v2711_v26 = vpop.f32.mrb[44].mxu1 }
 0x6a2   : > { %v2722_v25 = vadd.f32 %v2670_v57, %v6732_v36  ;;  %v2724_v43 = vadd.f32 %v2711_v26, %v6733_v2  ;;  %v2672_v20 = vpop.f32.mrb[45].mxu0  ;;  %v2713_v63 = vpop.f32.mrb[45].mxu1 }
 0x6a3   : > { %v2723_v42 = vadd.f32 %v2672_v20, %v6734_v37  ;;  %v2725_v49 = vadd.f32 %v2713_v63, %v6735_v48  ;;  %v2674_v50 = vpop.f32.mrb[46].mxu0  ;;  %v2715_v4 = vpop.f32.mrb[46].mxu1 }
 0x6a4   : > { %v4087_v7 = vmul.f32 -1.442695, %v2722_v25  ;;  %4361 = vtanh.f32 %v2724_v43  ;;  %v2675_v34 = vpop.f32.mrb[47].mxu0  ;;  %v2716_v56 = vpop.f32.mrb[47].mxu1 }
 0x6a5   : > { %v4088_v32 = vmul.f32 -1.442695, %v2723_v42  ;;  %4363 = vtanh.f32 %v2725_v49  ;;  %v4358_v51 = vpop.eup %4357  ;;  %v6743_v56 = vld [vmem:[#allocation24_spill] sm:$0xff] }
 0x6a6   : > { %4365 = vpow2.f32 %v4087_v7  ;;  %v4360_v57 = vpop.eup %4359 }
 0x6a7   : > { %4367 = vpow2.f32 %v4088_v32 }
 0x6ae   : > { %v4362_v26 = vpop.eup %4361 }
 0x6af   : > { %v4364_v2 = vpop.eup %4363  ;;  %v2772_v36 = vmul.f32 %v4362_v26, %v4358_v51  ;;  %v6744_v51 = vld [vmem:[#allocation25_spill] sm:$0xff]  ;;  %v6746_v26 = vld [vmem:[#allocation27_spill] sm:$0xff] }
 0x6b0   : > { %v4366_v41 = vpop.eup %4365  ;;  %v2773_v0 = vmul.f32 %v4364_v2, %v4360_v57  ;;  %v6745_v57 = vld [vmem:[#allocation26_spill] sm:$0xff] }
 0x6b1   : > { %v4368_v20 = vpop.eup %4367  ;;  %v2748_v37 = vadd.f32 1.0, %v4366_v41  ;;  %v5887_v63 = vadd.f32 %v2772_v36, %v2770_v39  ;;  %v6739_v39 = vld [vmem:[#allocation20_spill] sm:$0xff]  ;;  %v6741_v36 = vld [vmem:[#allocation22_spill] sm:$0xff] }
 0x6b2   : > { %v2749_v50 = vadd.f32 1.0, %v4368_v20  ;;  %v5889_v25 = vadd.f32 %v2773_v0, %v2771_v15  ;;  %v6738_v0 = vld [vmem:[#allocation19_spill] sm:$0xff]  ;;  %v6740_v15 = vld [vmem:[#allocation21_spill] sm:$0xff]  ;;  %v6747_v41 = vld [vmem:[#allocation28_spill] sm:$0xff] }
 0x6b3   : > { %4369 = vrcp.f32 %v2748_v37  ;;  %v6742_v37 = vld [vmem:[#allocation23_spill] sm:$0xff]  ;;  %v6748_v20 = vld [vmem:[#allocation29_spill] sm:$0xff] }
 0x6b4   : > { %4371 = vtanh.f32 %v5887_v63 }
 0x6b5   : > { %4373 = vrcp.f32 %v2749_v50  ;;  %v6749_v50 = vld [vmem:[#allocation30_spill] sm:$0xff] }
 0x6b6   : > { %4375 = vtanh.f32 %v5889_v25 }
 0x6bd   : > { %v4370_v32 = vpop.eup %4369 }
 0x6be   : > { %v4372_v43 = vpop.eup %4371 }
 0x6bf   : > { %v4374_v42 = vpop.eup %4373  ;;  %v2778_v49 = vmul.f32 %v4372_v43, %v4370_v32  ;;  %v6750_v32 = vld [vmem:[#allocation31_spill] sm:$0xff]  ;;  %v6751_v43 = vld [vmem:[#allocation32_spill] sm:$0xff] }
 0x6c0   : > { %v4376_v4 = vpop.eup %4375 }
 0x6c1   : > { %v2779_v7 = vmul.f32 %v4376_v4, %v4374_v42  ;;  %v5895_v34 = vpack.c.bf16 %v2778_v49, %v2778_v49  ;;  %v6752_v42 = vld [vmem:[#allocation33_spill] sm:$0xff]  ;;  %v6753_v49 = vld [vmem:[#allocation34_spill] sm:$0xff]  ;;  %v6754_v4 = vld [vmem:[#allocation35_spill] sm:$0xff] }
 0x6c3   : > { %v5893_v2 = vpack.c.bf16 %v2779_v7, %v2779_v7  ;;  %6737 = vst [vmem:[#allocation66_spill] sm:$0xff] %v5895_v34  ;;  %v6755_v7 = vld [vmem:[#allocation36_spill] sm:$0xff] }
 0x6c5   : > { %6736 = vst [vmem:[#allocation65_spill] sm:$0xff] %v5893_v2  ;;  %4089 = vmatprep.mubr.msk.bf16.mxu0 %vm890_vm1, %v5893_v2  ;;  %4090 = vmatprep.mubr.msk.bf16.mxu1 %vm890_vm1, %v5893_v2 }
 0x6c6   : > { %2818 = vmatmul.mubr.bf16.vlgmr.msra.gmra.mrb[48].mxu0 %v5895_v34  ;;  %2859 = vmatmul.mubr.bf16.vlgmr.msra.gmra.mrb[48].mxu1 %v5895_v34 }
 0x6c7   : > { %2868 = vmatpush1.bf16.msra.mxu0 %v5219_v22  ;;  %2909 = vmatpush1.bf16.msra.mxu1 %v5223_v27 }
 0x6c8   : > { %4091 = vmatprep.mubr.msk.bf16.mxu0 %vm890_vm1, %v5893_v2  ;;  %4092 = vmatprep.mubr.msk.bf16.mxu1 %vm890_vm1, %v5893_v2  ;;  %v6756_v2 = vld [vmem:[#allocation37_spill] sm:$0xff] }
 0x6c9   : > { %2869 = vmatprep.subr.bf16.mxu0 %v6538_v9  ;;  %2910 = vmatprep.subr.bf16.mxu1 %v6539_v8 }
 0x6cb   : > { %2870 = vmatpush1.bf16.msra.mxu0 %v6540_v45  ;;  %2911 = vmatpush1.bf16.msra.mxu1 %v6541_v46 }
 0x6cc   : > { %2871 = vmatprep.subr.bf16.mxu0 %v6542_v55  ;;  %2912 = vmatprep.subr.bf16.mxu1 %v6543_v29 }
 0x6cf   : > { %2872 = vmatpush1.bf16.msra.mxu0 %v6544_v61  ;;  %2913 = vmatpush1.bf16.msra.mxu1 %v6545_v6 }
 0x6d0   : > { %2873 = vmatprep.subr.bf16.mxu0 %v6546_v11  ;;  %2914 = vmatprep.subr.bf16.mxu1 %v6547_v30 }
 0x6d3   : > { %2874 = vmatpush1.bf16.msra.mxu0 %v6548_v16  ;;  %2915 = vmatpush1.bf16.msra.mxu1 %v6549_v28 }
 0x6d4   : > { %2875 = vmatprep.subr.bf16.mxu0 %v6550_v33  ;;  %2916 = vmatprep.subr.bf16.mxu1 %v6551_v10 }
 0x6d7   : > { %2876 = vmatpush1.bf16.msra.mxu0 %v6552_v19  ;;  %2917 = vmatpush1.bf16.msra.mxu1 %v6553_v47 }
 0x6d8   : > { %2877 = vmatprep.subr.bf16.mxu0 %v6554_v23  ;;  %2918 = vmatprep.subr.bf16.mxu1 %v6555_v24 }
 0x6db   : > { %2878 = vmatpush1.bf16.msra.mxu0 %v6556_v59  ;;  %2919 = vmatpush1.bf16.msra.mxu1 %v6557_v44 }
 0x6dc   : > { %2879 = vmatprep.subr.bf16.mxu0 %v6558_v17  ;;  %2920 = vmatprep.subr.bf16.mxu1 %v6559_v35 }
 0x6df   : > { %2880 = vmatpush1.bf16.msra.mxu0 %v5319_v3  ;;  %2921 = vmatpush1.bf16.msra.mxu1 %v5323_v54 }
 0x6e0   : > { %2881 = vmatprep.subr.bf16.mxu0 %v5325_v62  ;;  %2922 = vmatprep.subr.bf16.mxu1 %v6560_v12 }
 0x6e3   : > { %2882 = vmatpush1.bf16.msra.mxu0 %v5335_v31  ;;  %2923 = vmatpush1.bf16.msra.mxu1 %v5339_v60 }
 0x6e4   : > { %2883 = vmatprep.subr.bf16.mxu0 %v5341_v21  ;;  %2924 = vmatprep.subr.bf16.mxu1 %v5344_v53 }
 0x6e7   : > { %2884 = vmatpush1.bf16.msra.mxu0 %v5351_v14  ;;  %2925 = vmatpush1.bf16.msra.mxu1 %v5355_v38 }
 0x6e8   : > { %2885 = vmatprep.subr.bf16.mxu0 %v5357_v52  ;;  %2926 = vmatprep.subr.bf16.mxu1 %v5360_v5 }
 0x6eb   : > { %2886 = vmatpush1.bf16.msra.mxu0 %v6684_v18  ;;  %2927 = vmatpush1.bf16.msra.mxu1 %v6685_v58 }
 0x6ec   : > { %3045 = vmatprep.subr.bf16.mxu0 %v6686_v13  ;;  %3086 = vmatprep.subr.bf16.mxu1 %v6687_v1  ;;  %v6780_v1 = vld [vmem:[#allocation86_spill] sm:$0xff] }
 0x6ee   : > { %2900 = vmatmul.mubr.bf16.vlgmr.msra.gmra.mrb[52].mxu0 %v5895_v34  ;;  %2941 = vmatmul.mubr.bf16.vlgmr.msra.gmra.mrb[52].mxu1 %v5895_v34  ;;  %v6757_v34 = vld [vmem:[#allocation38_spill] sm:$0xff] }
 0x6ef   : > { %3046 = vmatpush1.bf16.msra.mxu0 %v6738_v0  ;;  %3087 = vmatpush1.bf16.msra.mxu1 %v6739_v39  ;;  %v6779_v39 = vld [vmem:[#allocation84_spill] sm:$0xff] }
 0x6f0   : > { %3047 = vmatprep.subr.bf16.mxu0 %v6740_v15  ;;  %3088 = vmatprep.subr.bf16.mxu1 %v6741_v36 }
 0x6f3   : > { %3048 = vmatpush1.bf16.msra.mxu0 %v6742_v37  ;;  %3089 = vmatpush1.bf16.msra.mxu1 %v6743_v56  ;;  %v6778_v56 = vld [vmem:[#allocation85_spill] sm:$0xff] }
 0x6f4   : > { %3049 = vmatprep.subr.bf16.mxu0 %v6744_v51  ;;  %3090 = vmatprep.subr.bf16.mxu1 %v6745_v57 }
 0x6f7   : > { %3050 = vmatpush1.bf16.msra.mxu0 %v6746_v26  ;;  %3091 = vmatpush1.bf16.msra.mxu1 %v6747_v41  ;;  %v6758_v41 = vld [vmem:[#allocation39_spill] sm:$0xff] }
 0x6f8   : > { %3051 = vmatprep.subr.bf16.mxu0 %v6748_v20  ;;  %3092 = vmatprep.subr.bf16.mxu1 %v6749_v50  ;;  %v6759_v20 = vld [vmem:[#allocation40_spill] sm:$0xff]  ;;  %v6760_v50 = vld [vmem:[#allocation41_spill] sm:$0xff] }
 0x6fb   : > { %3052 = vmatpush1.bf16.msra.mxu0 %v6750_v32  ;;  %3093 = vmatpush1.bf16.msra.mxu1 %v6751_v43  ;;  %v6761_v32 = vld [vmem:[#allocation42_spill] sm:$0xff]  ;;  %v6762_v43 = vld [vmem:[#allocation43_spill] sm:$0xff] }
 0x6fc   : > { %3053 = vmatprep.subr.bf16.mxu0 %v6752_v42  ;;  %3094 = vmatprep.subr.bf16.mxu1 %v6753_v49  ;;  %v6763_v42 = vld [vmem:[#allocation44_spill] sm:$0xff]  ;;  %v6764_v49 = vld [vmem:[#allocation45_spill] sm:$0xff] }
 0x6ff   : > { %3054 = vmatpush1.bf16.msra.mxu0 %v6754_v4  ;;  %3095 = vmatpush1.bf16.msra.mxu1 %v6755_v7  ;;  %v6765_v4 = vld [vmem:[#allocation46_spill] sm:$0xff]  ;;  %v6766_v7 = vld [vmem:[#allocation47_spill] sm:$0xff] }
 0x700   : > { %3055 = vmatprep.subr.bf16.mxu0 %v6756_v2  ;;  %3096 = vmatprep.subr.bf16.mxu1 %v6757_v34  ;;  %v6767_v2 = vld [vmem:[#allocation48_spill] sm:$0xff]  ;;  %v6768_v34 = vld [vmem:[#allocation49_spill] sm:$0xff] }
 0x703   : > { %3056 = vmatpush1.bf16.msra.mxu0 %v6758_v41  ;;  %3097 = vmatpush1.bf16.msra.mxu1 %v6759_v20  ;;  %v6769_v41 = vld [vmem:[#allocation50_spill] sm:$0xff]  ;;  %v6770_v20 = vld [vmem:[#allocation51_spill] sm:$0xff] }
 0x704   : > { %3057 = vmatprep.subr.bf16.mxu0 %v6760_v50  ;;  %3098 = vmatprep.subr.bf16.mxu1 %v6761_v32  ;;  %v6771_v50 = vld [vmem:[#allocation52_spill] sm:$0xff]  ;;  %v6772_v32 = vld [vmem:[#allocation53_spill] sm:$0xff] }
 0x707   : > { %3058 = vmatpush1.bf16.msra.mxu0 %v6762_v43  ;;  %3099 = vmatpush1.bf16.msra.mxu1 %v6763_v42  ;;  %v6773_v43 = vld [vmem:[#allocation54_spill] sm:$0xff]  ;;  %v6774_v42 = vld [vmem:[#allocation55_spill] sm:$0xff] }
 0x708   : > { %3059 = vmatprep.subr.bf16.mxu0 %v6764_v49  ;;  %3100 = vmatprep.subr.bf16.mxu1 %v6765_v4  ;;  %v6775_v49 = vld [vmem:[#allocation56_spill] sm:$0xff]  ;;  %v6776_v4 = vld [vmem:[#allocation57_spill] sm:$0xff] }
 0x70b   : > { %3060 = vmatpush1.bf16.msra.mxu0 %v6766_v7  ;;  %3101 = vmatpush1.bf16.msra.mxu1 %v6767_v2  ;;  %v6777_v7 = vld [vmem:[#allocation58_spill] sm:$0xff] }
 0x70c   : > { %3061 = vmatprep.subr.bf16.mxu0 %v6768_v34  ;;  %3102 = vmatprep.subr.bf16.mxu1 %v6769_v41 }
 0x70f   : > { %3062 = vmatpush1.bf16.msra.mxu0 %v6770_v20  ;;  %3103 = vmatpush1.bf16.msra.mxu1 %v6771_v50 }
 0x710   : > { %3063 = vmatprep.subr.bf16.mxu0 %v6772_v32  ;;  %3104 = vmatprep.subr.bf16.mxu1 %v6773_v43 }
 0x713   : > { %3064 = vmatpush1.bf16.msra.mxu0 %v6774_v42  ;;  %3105 = vmatpush1.bf16.msra.mxu1 %v6775_v49 }
 0x714   : > { %3127 = vmatprep.subr.bf16.mxu0 %v6776_v4  ;;  %3168 = vmatprep.subr.bf16.mxu1 %v6777_v7 }
 0x799   : > { %v2819_v2 = vpop.f32.mrb[48].mxu0  ;;  %v2860_v34 = vpop.f32.mrb[48].mxu1 }
 0x79a   : > { %v2959_v26 = vrot.slane %v2860_v34, 6  ;;  %v2821_v41 = vpop.f32.mrb[49].mxu0  ;;  %v2862_v57 = vpop.f32.mrb[49].mxu1  ;;  %v2957_v4 = vrot.slane %v2819_v2, 6  ;;  %v3022_v2 = vrot.slane %v5889_v25, 6 }
 0x79b   : > { %v2960_v20 = vrot.slane %v2862_v57, 6  ;;  %v2823_v51 = vpop.f32.mrb[50].mxu0  ;;  %v2864_v50 = vpop.f32.mrb[50].mxu1  ;;  %v2958_v7 = vrot.slane %v2821_v41, 6 }
 0x79c   : > { %v2975_v32 = vadd.f32 %v2959_v26, %v6778_v56  ;;  %v2824_v37 = vpop.f32.mrb[51].mxu0  ;;  %v2865_v43 = vpop.f32.mrb[51].mxu1  ;;  %v2973_v34 = vadd.f32 %v2957_v4, %v6779_v39  ;;  %v6781_v39 = vld [vmem:[#allocation88_spill] sm:$0xff] }
 0x79d   : > { %v2976_v42 = vadd.f32 %v2960_v20, %v6729_v40  ;;  %v2974_v57 = vadd.f32 %v2958_v7, %v6780_v1  ;;  %v3021_v20 = vrot.slane %v5887_v63, 6 }
 0x79e   : > { %v4095_v36 = vmul.f32 -1.442695, %v2975_v32  ;;  %v4093_v26 = vmul.f32 -1.442695, %v2973_v34 }
 0x79f   : > { %v4096_v49 = vmul.f32 -1.442695, %v2976_v42  ;;  %v4094_v37 = vmul.f32 -1.442695, %v2974_v57 }
 0x7a0   : > { %4377 = vpow2.f32 %v4095_v36 }
 0x7a1   : > { %4379 = vpow2.f32 %v4096_v49 }
 0x7aa   : > { %v4378_v15 = vpop.eup %4377 }
 0x7ab   : > { %v3001_v0 = vadd.f32 1.0, %v4378_v15  ;;  %v4380_v51 = vpop.eup %4379 }
 0x7ac   : > { %v3002_v50 = vadd.f32 1.0, %v4380_v51 }
 0x7ad   : > { %4381 = vrcp.f32 %v3001_v0 }
 0x7ae   : > { %4383 = vrcp.f32 %v3002_v50 }
 0x7af   : > { %4385 = vpow2.f32 %v4093_v26 }
 0x7b0   : > { %4387 = vpow2.f32 %v4094_v37 }
 0x7b7   : > { %v4382_v36 = vpop.eup %4381 }
 0x7b8   : > { %v3025_v41 = vmul.f32 %v4382_v36, %v3021_v20  ;;  %v4384_v32 = vpop.eup %4383  ;;  %v6782_v20 = vld [vmem:[#allocation89_spill] sm:$0xff] }
 0x7b9   : > { %v3026_v43 = vmul.f32 %v4384_v32, %v3022_v2  ;;  %v4386_v42 = vpop.eup %4385 }
 0x7ba   : > { %v4388_v15 = vpop.eup %4387  ;;  %v2999_v49 = vadd.f32 1.0, %v4386_v42  ;;  %v6783_v42 = vld [vmem:[#allocation90_spill] sm:$0xff] }
 0x7bb   : > { %v3000_v4 = vadd.f32 1.0, %v4388_v15 }
 0x7bc   : > { %4389 = vrcp.f32 %v2999_v49 }
 0x7bd   : > { %4391 = vrcp.f32 %v3000_v4 }
 0x7c1   : > { %v2901_v7 = vpop.f32.mrb[52].mxu0  ;;  %v2942_v0 = vpop.f32.mrb[52].mxu1 }
 0x7c2   : > { %v2961_v51 = vrot.slane %v2901_v7, 6  ;;  %v2963_v34 = vrot.slane %v2942_v0, 6  ;;  %v2903_v57 = vpop.f32.mrb[53].mxu0  ;;  %v2944_v50 = vpop.f32.mrb[53].mxu1 }
 0x7c3   : > { %v2962_v26 = vrot.slane %v2903_v57, 6  ;;  %v2964_v37 = vrot.slane %v2944_v50, 6  ;;  %v2905_v1 = vpop.f32.mrb[54].mxu0  ;;  %v2946_v63 = vpop.f32.mrb[54].mxu1 }
 0x7c4   : > { %v2977_v25 = vadd.f32 %v2961_v51, %v6781_v39  ;;  %v2979_v36 = vadd.f32 %v2963_v34, %v6782_v20  ;;  %v2906_v2 = vpop.f32.mrb[55].mxu0  ;;  %v2947_v32 = vpop.f32.mrb[55].mxu1 }
 0x7c5   : > { %v2978_v15 = vadd.f32 %v2962_v26, %v6783_v42  ;;  %v2980_v40 = vadd.f32 %v2964_v37, %v6735_v48 }
 0x7c6   : > { %v4097_v7 = vmul.f32 -1.442695, %v2977_v25  ;;  %4393 = vtanh.f32 %v2979_v36  ;;  %v4390_v1 = vpop.eup %4389 }
 0x7c7   : > { %v4098_v0 = vmul.f32 -1.442695, %v2978_v15  ;;  %4395 = vtanh.f32 %v2980_v40  ;;  %v4392_v57 = vpop.eup %4391 }
 0x7c8   : > { %4397 = vpow2.f32 %v4097_v7 }
 0x7c9   : > { %4399 = vpow2.f32 %v4098_v0 }
 0x7d0   : > { %v4394_v49 = vpop.eup %4393 }
 0x7d1   : > { %v4396_v50 = vpop.eup %4395  ;;  %v3027_v51 = vmul.f32 %v4394_v49, %v4390_v1  ;;  %v6787_v49 = vld [vmem:[#allocation19_spill] sm:$0xff] }
 0x7d2   : > { %v4398_v63 = vpop.eup %4397  ;;  %v3028_v34 = vmul.f32 %v4396_v50, %v4392_v57  ;;  %v6786_v57 = vld [vmem:[#allocation18_spill] sm:$0xff]  ;;  %v6788_v50 = vld [vmem:[#allocation20_spill] sm:$0xff] }
 0x7d3   : > { %v4400_v2 = vpop.eup %4399  ;;  %v3003_v32 = vadd.f32 1.0, %v4398_v63  ;;  %v5999_v4 = vadd.f32 %v3027_v51, %v3025_v41  ;;  %v6789_v51 = vld [vmem:[#allocation21_spill] sm:$0xff]  ;;  %v6790_v63 = vld [vmem:[#allocation22_spill] sm:$0xff] }
 0x7d4   : > { %v3004_v26 = vadd.f32 1.0, %v4400_v2  ;;  %v6001_v42 = vadd.f32 %v3028_v34, %v3026_v43  ;;  %v6791_v34 = vld [vmem:[#allocation23_spill] sm:$0xff]  ;;  %v6792_v2 = vld [vmem:[#allocation24_spill] sm:$0xff] }
 0x7d5   : > { %4401 = vrcp.f32 %v3003_v32  ;;  %v6793_v32 = vld [vmem:[#allocation25_spill] sm:$0xff] }
 0x7d6   : > { %4403 = vtanh.f32 %v5999_v4 }
 0x7d7   : > { %4405 = vrcp.f32 %v3004_v26  ;;  %v6794_v26 = vld [vmem:[#allocation26_spill] sm:$0xff] }
 0x7d8   : > { %4407 = vtanh.f32 %v6001_v42 }
 0x7df   : > { %v4402_v40 = vpop.eup %4401 }
 0x7e0   : > { %v4404_v37 = vpop.eup %4403 }
 0x7e1   : > { %v4406_v25 = vpop.eup %4405  ;;  %v3033_v36 = vmul.f32 %v4404_v37, %v4402_v40  ;;  %v6796_v40 = vld [vmem:[#allocation28_spill] sm:$0xff]  ;;  %v6797_v37 = vld [vmem:[#allocation29_spill] sm:$0xff] }
 0x7e2   : > { %v4408_v15 = vpop.eup %4407 }
 0x7e3   : > { %v3034_v7 = vmul.f32 %v4408_v15, %v4406_v25  ;;  %v6005_v0 = vpack.c.bf16 %v3033_v36, %v3033_v36  ;;  %v6798_v25 = vld [vmem:[#allocation30_spill] sm:$0xff]  ;;  %v6799_v36 = vld [vmem:[#allocation31_spill] sm:$0xff]  ;;  %v6800_v15 = vld [vmem:[#allocation32_spill] sm:$0xff] }
 0x7e5   : > { %6784 = vst [vmem:[#allocation67_spill] sm:$0xff] %v6005_v0  ;;  %v6007_v1 = vpack.c.bf16 %v3034_v7, %v3034_v7  ;;  %v3039_v43 = vrot.slane %v6005_v0, 1  ;;  %v6801_v7 = vld [vmem:[#allocation33_spill] sm:$0xff] }
 0x7e7   : > { %6785 = vst [vmem:[#allocation68_spill] sm:$0xff] %v6007_v1  ;;  %v3040_v41 = vrot.slane %v6007_v1, 1  ;;  %v6828_v1 = vld [vmem:[#allocation84_spill] sm:$0xff] }
 0x7e9   : > { %4099 = vmatprep.mubr.msk.bf16.mxu0 %vm890_vm1, %v3040_v41  ;;  %4100 = vmatprep.mubr.msk.bf16.mxu1 %vm890_vm1, %v3040_v41 }
 0x7ea   : > { %3078 = vmatmul.mubr.bf16.vlgmr.msra.gmra.mrb[56].mxu0 %v3039_v43  ;;  %3119 = vmatmul.mubr.bf16.vlgmr.msra.gmra.mrb[56].mxu1 %v3039_v43 }
 0x7eb   : > { %3128 = vmatpush1.bf16.msra.mxu0 %v5219_v22  ;;  %3169 = vmatpush1.bf16.msra.mxu1 %v5223_v27 }
 0x7ec   : > { %4101 = vmatprep.mubr.msk.bf16.mxu0 %vm890_vm1, %v3040_v41  ;;  %4102 = vmatprep.mubr.msk.bf16.mxu1 %vm890_vm1, %v3040_v41  ;;  %v6802_v41 = vld [vmem:[#allocation34_spill] sm:$0xff] }
 0x7ed   : > { %3129 = vmatprep.subr.bf16.mxu0 %v6538_v9  ;;  %3170 = vmatprep.subr.bf16.mxu1 %v6539_v8 }
 0x7ef   : > { %3130 = vmatpush1.bf16.msra.mxu0 %v6540_v45  ;;  %3171 = vmatpush1.bf16.msra.mxu1 %v6541_v46 }
 0x7f0   : > { %3131 = vmatprep.subr.bf16.mxu0 %v6542_v55  ;;  %3172 = vmatprep.subr.bf16.mxu1 %v6543_v29 }
 0x7f3   : > { %3132 = vmatpush1.bf16.msra.mxu0 %v6544_v61  ;;  %3173 = vmatpush1.bf16.msra.mxu1 %v6545_v6 }
 0x7f4   : > { %3133 = vmatprep.subr.bf16.mxu0 %v6546_v11  ;;  %3174 = vmatprep.subr.bf16.mxu1 %v6547_v30 }
 0x7f7   : > { %3134 = vmatpush1.bf16.msra.mxu0 %v6548_v16  ;;  %3175 = vmatpush1.bf16.msra.mxu1 %v6549_v28 }
 0x7f8   : > { %3135 = vmatprep.subr.bf16.mxu0 %v6550_v33  ;;  %3176 = vmatprep.subr.bf16.mxu1 %v6551_v10 }
 0x7fb   : > { %3136 = vmatpush1.bf16.msra.mxu0 %v6552_v19  ;;  %3177 = vmatpush1.bf16.msra.mxu1 %v6553_v47 }
 0x7fc   : > { %3137 = vmatprep.subr.bf16.mxu0 %v6554_v23  ;;  %3178 = vmatprep.subr.bf16.mxu1 %v6555_v24 }
 0x7ff   : > { %3138 = vmatpush1.bf16.msra.mxu0 %v6556_v59  ;;  %3179 = vmatpush1.bf16.msra.mxu1 %v6557_v44 }
 0x800   : > { %3139 = vmatprep.subr.bf16.mxu0 %v6558_v17  ;;  %3180 = vmatprep.subr.bf16.mxu1 %v6559_v35 }
 0x803   : > { %3140 = vmatpush1.bf16.msra.mxu0 %v5319_v3  ;;  %3181 = vmatpush1.bf16.msra.mxu1 %v5323_v54 }
 0x804   : > { %3141 = vmatprep.subr.bf16.mxu0 %v5325_v62  ;;  %3182 = vmatprep.subr.bf16.mxu1 %v6560_v12 }
 0x807   : > { %3142 = vmatpush1.bf16.msra.mxu0 %v5335_v31  ;;  %3183 = vmatpush1.bf16.msra.mxu1 %v5339_v60 }
 0x808   : > { %3143 = vmatprep.subr.bf16.mxu0 %v5341_v21  ;;  %3184 = vmatprep.subr.bf16.mxu1 %v5344_v53 }
 0x80b   : > { %3144 = vmatpush1.bf16.msra.mxu0 %v5351_v14  ;;  %3185 = vmatpush1.bf16.msra.mxu1 %v5355_v38 }
 0x80c   : > { %3145 = vmatprep.subr.bf16.mxu0 %v5357_v52  ;;  %3186 = vmatprep.subr.bf16.mxu1 %v5360_v5 }
 0x80f   : > { %3146 = vmatpush1.bf16.msra.mxu0 %v6684_v18  ;;  %3187 = vmatpush1.bf16.msra.mxu1 %v6685_v58  ;;  %v6829_v58 = vld [vmem:[#allocation86_spill] sm:$0xff] }
 0x810   : > { %3305 = vmatprep.subr.bf16.mxu0 %v6686_v13  ;;  %3346 = vmatprep.subr.bf16.mxu1 %v6786_v57  ;;  %v6795_v13 = vld [vmem:[#allocation27_spill] sm:$0xff]  ;;  %v6804_v57 = vld [vmem:[#allocation36_spill] sm:$0xff] }
 0x812   : > { %3160 = vmatmul.mubr.bf16.vlgmr.msra.gmra.mrb[60].mxu0 %v3039_v43  ;;  %3201 = vmatmul.mubr.bf16.vlgmr.msra.gmra.mrb[60].mxu1 %v3039_v43  ;;  %v6803_v43 = vld [vmem:[#allocation35_spill] sm:$0xff] }
 0x813   : > { %3306 = vmatpush1.bf16.msra.mxu0 %v6787_v49  ;;  %3347 = vmatpush1.bf16.msra.mxu1 %v6788_v50  ;;  %v6805_v49 = vld [vmem:[#allocation37_spill] sm:$0xff]  ;;  %v6806_v50 = vld [vmem:[#allocation38_spill] sm:$0xff] }
 0x814   : > { %3307 = vmatprep.subr.bf16.mxu0 %v6789_v51  ;;  %3348 = vmatprep.subr.bf16.mxu1 %v6790_v63  ;;  %v6807_v51 = vld [vmem:[#allocation39_spill] sm:$0xff]  ;;  %v6808_v63 = vld [vmem:[#allocation40_spill] sm:$0xff] }
 0x817   : > { %3308 = vmatpush1.bf16.msra.mxu0 %v6791_v34  ;;  %3349 = vmatpush1.bf16.msra.mxu1 %v6792_v2  ;;  %v6809_v34 = vld [vmem:[#allocation41_spill] sm:$0xff]  ;;  %v6810_v2 = vld [vmem:[#allocation42_spill] sm:$0xff] }
 0x818   : > { %3309 = vmatprep.subr.bf16.mxu0 %v6793_v32  ;;  %3350 = vmatprep.subr.bf16.mxu1 %v6794_v26  ;;  %v6811_v32 = vld [vmem:[#allocation43_spill] sm:$0xff]  ;;  %v6812_v26 = vld [vmem:[#allocation44_spill] sm:$0xff] }
 0x81b   : > { %3310 = vmatpush1.bf16.msra.mxu0 %v6795_v13  ;;  %3351 = vmatpush1.bf16.msra.mxu1 %v6796_v40  ;;  %v6813_v13 = vld [vmem:[#allocation45_spill] sm:$0xff]  ;;  %v6814_v40 = vld [vmem:[#allocation46_spill] sm:$0xff] }
 0x81c   : > { %3311 = vmatprep.subr.bf16.mxu0 %v6797_v37  ;;  %3352 = vmatprep.subr.bf16.mxu1 %v6798_v25  ;;  %v6815_v37 = vld [vmem:[#allocation47_spill] sm:$0xff]  ;;  %v6816_v25 = vld [vmem:[#allocation48_spill] sm:$0xff] }
 0x81f   : > { %3312 = vmatpush1.bf16.msra.mxu0 %v6799_v36  ;;  %3353 = vmatpush1.bf16.msra.mxu1 %v6800_v15  ;;  %v6817_v36 = vld [vmem:[#allocation49_spill] sm:$0xff]  ;;  %v6818_v15 = vld [vmem:[#allocation50_spill] sm:$0xff] }
 0x820   : > { %3313 = vmatprep.subr.bf16.mxu0 %v6801_v7  ;;  %3354 = vmatprep.subr.bf16.mxu1 %v6802_v41  ;;  %v6819_v7 = vld [vmem:[#allocation51_spill] sm:$0xff]  ;;  %v6820_v41 = vld [vmem:[#allocation52_spill] sm:$0xff] }
 0x823   : > { %3314 = vmatpush1.bf16.msra.mxu0 %v6803_v43  ;;  %3355 = vmatpush1.bf16.msra.mxu1 %v6804_v57  ;;  %v6821_v43 = vld [vmem:[#allocation53_spill] sm:$0xff]  ;;  %v6822_v57 = vld [vmem:[#allocation54_spill] sm:$0xff] }
 0x824   : > { %3315 = vmatprep.subr.bf16.mxu0 %v6805_v49  ;;  %3356 = vmatprep.subr.bf16.mxu1 %v6806_v50  ;;  %v6823_v49 = vld [vmem:[#allocation55_spill] sm:$0xff]  ;;  %v6824_v50 = vld [vmem:[#allocation56_spill] sm:$0xff] }
 0x827   : > { %3316 = vmatpush1.bf16.msra.mxu0 %v6807_v51  ;;  %3357 = vmatpush1.bf16.msra.mxu1 %v6808_v63  ;;  %v6825_v51 = vld [vmem:[#allocation57_spill] sm:$0xff]  ;;  %v6826_v63 = vld [vmem:[#allocation58_spill] sm:$0xff] }
 0x828   : > { %3317 = vmatprep.subr.bf16.mxu0 %v6809_v34  ;;  %3358 = vmatprep.subr.bf16.mxu1 %v6810_v2 }
 0x82b   : > { %3318 = vmatpush1.bf16.msra.mxu0 %v6811_v32  ;;  %3359 = vmatpush1.bf16.msra.mxu1 %v6812_v26 }
 0x82c   : > { %3319 = vmatprep.subr.bf16.mxu0 %v6813_v13  ;;  %3360 = vmatprep.subr.bf16.mxu1 %v6814_v40 }
 0x82f   : > { %3320 = vmatpush1.bf16.msra.mxu0 %v6815_v37  ;;  %3361 = vmatpush1.bf16.msra.mxu1 %v6816_v25 }
 0x830   : > { %3321 = vmatprep.subr.bf16.mxu0 %v6817_v36  ;;  %3362 = vmatprep.subr.bf16.mxu1 %v6818_v15 }
 0x833   : > { %3322 = vmatpush1.bf16.msra.mxu0 %v6819_v7  ;;  %3363 = vmatpush1.bf16.msra.mxu1 %v6820_v41  ;;  %v6827_v41 = vld [vmem:[#allocation87_spill] sm:$0xff] }
 0x834   : > { %3323 = vmatprep.subr.bf16.mxu0 %v6821_v43  ;;  %3364 = vmatprep.subr.bf16.mxu1 %v6822_v57 }
 0x837   : > { %3324 = vmatpush1.bf16.msra.mxu0 %v6823_v49  ;;  %3365 = vmatpush1.bf16.msra.mxu1 %v6824_v50 }
 0x838   : > { %3387 = vmatprep.subr.bf16.mxu0 %v6825_v51  ;;  %3428 = vmatprep.subr.bf16.mxu1 %v6826_v63 }
 0x8bd   : > { %v3079_v34 = vpop.f32.mrb[56].mxu0  ;;  %v3120_v2 = vpop.f32.mrb[56].mxu1 }
 0x8be   : > { %v3219_v32 = vrot.slane %v3120_v2, 4  ;;  %v3081_v26 = vpop.f32.mrb[57].mxu0  ;;  %v3122_v13 = vpop.f32.mrb[57].mxu1  ;;  %v3217_v50 = vrot.slane %v3079_v34, 4  ;;  %v3282_v34 = vrot.slane %v6001_v42, 6 }
 0x8bf   : > { %v3220_v40 = vrot.slane %v3122_v13, 4  ;;  %v3083_v37 = vpop.f32.mrb[58].mxu0  ;;  %v3124_v25 = vpop.f32.mrb[58].mxu1  ;;  %v3218_v51 = vrot.slane %v3081_v26, 4 }
 0x8c0   : > { %v3235_v36 = vadd.f32 %v3219_v32, %v6778_v56  ;;  %v3084_v15 = vpop.f32.mrb[59].mxu0  ;;  %v3125_v7 = vpop.f32.mrb[59].mxu1  ;;  %v3233_v2 = vadd.f32 %v3217_v50, %v6828_v1 }
 0x8c1   : > { %v3236_v43 = vadd.f32 %v3220_v40, %v6827_v41  ;;  %v3234_v13 = vadd.f32 %v3218_v51, %v6829_v58  ;;  %v3281_v40 = vrot.slane %v5999_v4, 6 }
 0x8c2   : > { %v4105_v57 = vmul.f32 -1.442695, %v3235_v36  ;;  %v4103_v32 = vmul.f32 -1.442695, %v3233_v2 }
 0x8c3   : > { %v4106_v49 = vmul.f32 -1.442695, %v3236_v43  ;;  %v4104_v15 = vmul.f32 -1.442695, %v3234_v13 }
 0x8c4   : > { %4409 = vpow2.f32 %v4105_v57 }
 0x8c5   : > { %4411 = vpow2.f32 %v4106_v49 }
 0x8ce   : > { %v4410_v63 = vpop.eup %4409 }
 0x8cf   : > { %v3261_v0 = vadd.f32 1.0, %v4410_v63  ;;  %v4412_v37 = vpop.eup %4411 }
 0x8d0   : > { %v3262_v25 = vadd.f32 1.0, %v4412_v37 }
 0x8d1   : > { %4413 = vrcp.f32 %v3261_v0 }
 0x8d2   : > { %4415 = vrcp.f32 %v3262_v25 }
 0x8d3   : > { %4417 = vpow2.f32 %v4103_v32 }
 0x8d4   : > { %4419 = vpow2.f32 %v4104_v15 }
 0x8db   : > { %v4414_v36 = vpop.eup %4413 }
 0x8dc   : > { %v3285_v26 = vmul.f32 %v4414_v36, %v3281_v40  ;;  %v4416_v7 = vpop.eup %4415 }
 0x8dd   : > { %v3286_v43 = vmul.f32 %v4416_v7, %v3282_v34  ;;  %v4418_v57 = vpop.eup %4417  ;;  %v6830_v7 = vld [vmem:[#allocation90_spill] sm:$0xff] }
 0x8de   : > { %v4420_v49 = vpop.eup %4419  ;;  %v3259_v50 = vadd.f32 1.0, %v4418_v57 }
 0x8df   : > { %v3260_v51 = vadd.f32 1.0, %v4420_v49 }
 0x8e0   : > { %4421 = vrcp.f32 %v3259_v50 }
 0x8e1   : > { %4423 = vrcp.f32 %v3260_v51 }
 0x8e5   : > { %v3161_v63 = vpop.f32.mrb[60].mxu0  ;;  %v3202_v0 = vpop.f32.mrb[60].mxu1 }
 0x8e6   : > { %v3221_v37 = vrot.slane %v3161_v63, 4  ;;  %v3223_v2 = vrot.slane %v3202_v0, 4  ;;  %v3163_v13 = vpop.f32.mrb[61].mxu0  ;;  %v3204_v25 = vpop.f32.mrb[61].mxu1 }
 0x8e7   : > { %v3222_v32 = vrot.slane %v3163_v13, 4  ;;  %v3224_v15 = vrot.slane %v3204_v25, 4  ;;  %v3165_v58 = vpop.f32.mrb[62].mxu0  ;;  %v3206_v4 = vpop.f32.mrb[62].mxu1 }
 0x8e8   : > { %v3237_v42 = vadd.f32 %v3221_v37, %v6781_v39  ;;  %v3239_v40 = vadd.f32 %v3223_v2, %v6782_v20  ;;  %v3166_v36 = vpop.f32.mrb[63].mxu0  ;;  %v3207_v34 = vpop.f32.mrb[63].mxu1 }
 0x8e9   : > { %v3238_v57 = vadd.f32 %v3222_v32, %v6830_v7  ;;  %v3240_v49 = vadd.f32 %v3224_v15, %v6735_v48 }
 0x8ea   : > { %v4107_v63 = vmul.f32 -1.442695, %v3237_v42  ;;  %4425 = vtanh.f32 %v3239_v40  ;;  %v4422_v58 = vpop.eup %4421 }
 0x8eb   : > { %v4108_v0 = vmul.f32 -1.442695, %v3238_v57  ;;  %4427 = vtanh.f32 %v3240_v49  ;;  %v4424_v13 = vpop.eup %4423 }
 0x8ec   : > { %4429 = vpow2.f32 %v4107_v63 }
 0x8ed   : > { %4431 = vpow2.f32 %v4108_v0 }
 0x8f4   : > { %v4426_v50 = vpop.eup %4425 }
 0x8f5   : > { %v4428_v25 = vpop.eup %4427  ;;  %v3287_v37 = vmul.f32 %v4426_v50, %v4422_v58 }
 0x8f6   : > { %v4430_v4 = vpop.eup %4429  ;;  %v3288_v2 = vmul.f32 %v4428_v25, %v4424_v13 }
 0x8f7   : > { %v4432_v36 = vpop.eup %4431  ;;  %v3263_v34 = vadd.f32 1.0, %v4430_v4  ;;  %v6105_v51 = vadd.f32 %v3287_v37, %v3285_v26 }
 0x8f8   : > { %v3264_v32 = vadd.f32 1.0, %v4432_v36  ;;  %v6107_v7 = vadd.f32 %v3288_v2, %v3286_v43 }
 0x8f9   : > { %4433 = vrcp.f32 %v3263_v34 }
 0x8fa   : > { %4435 = vtanh.f32 %v6105_v51 }
 0x8fb   : > { %4437 = vrcp.f32 %v3264_v32  ;;  %v6833_v32 = vld [vmem:[#allocation90_spill] sm:$0xff] }
 0x8fc   : > { %4439 = vtanh.f32 %v6107_v7 }
 0x903   : > { %v4434_v15 = vpop.eup %4433 }
 0x904   : > { %v4436_v42 = vpop.eup %4435 }
 0x905   : > { %v4438_v40 = vpop.eup %4437  ;;  %v3293_v57 = vmul.f32 %v4436_v42, %v4434_v15 }
 0x906   : > { %v4440_v49 = vpop.eup %4439 }
 0x907   : > { %v3294_v63 = vmul.f32 %v4440_v49, %v4438_v40  ;;  %v6111_v0 = vpack.c.bf16 %v3293_v57, %v3293_v57 }
 0x909   : > { %v6113_v58 = vpack.c.bf16 %v3294_v63, %v3294_v63  ;;  %v3299_v43 = vrot.slane %v6111_v0, 2 }
 0x90b   : > { %v3300_v26 = vrot.slane %v6113_v58, 2 }
 0x90d   : > { %4109 = vmatprep.mubr.msk.bf16.mxu0 %vm890_vm1, %v3300_v26  ;;  %4110 = vmatprep.mubr.msk.bf16.mxu1 %vm890_vm1, %v3300_v26 }
 0x90e   : > { %3338 = vmatmul.mubr.bf16.vlgmr.msra.gmra.mrb[64].mxu0 %v3299_v43  ;;  %3379 = vmatmul.mubr.bf16.vlgmr.msra.gmra.mrb[64].mxu1 %v3299_v43 }
 0x90f   : > { %3388 = vmatpush1.bf16.msra.mxu0 %v5219_v22  ;;  %3429 = vmatpush1.bf16.msra.mxu1 %v5223_v27 }
 0x910   : > { %4111 = vmatprep.mubr.msk.bf16.mxu0 %vm890_vm1, %v3300_v26  ;;  %4112 = vmatprep.mubr.msk.bf16.mxu1 %vm890_vm1, %v3300_v26 }
 0x911   : > { %3389 = vmatprep.subr.bf16.mxu0 %v6538_v9  ;;  %3430 = vmatprep.subr.bf16.mxu1 %v6539_v8 }
 0x913   : > { %3390 = vmatpush1.bf16.msra.mxu0 %v6540_v45  ;;  %3431 = vmatpush1.bf16.msra.mxu1 %v6541_v46 }
 0x914   : > { %3391 = vmatprep.subr.bf16.mxu0 %v6542_v55  ;;  %3432 = vmatprep.subr.bf16.mxu1 %v6543_v29  ;;  %v6832_v55 = vld [vmem:[#allocation86_spill] sm:$0xff] }
 0x917   : > { %3392 = vmatpush1.bf16.msra.mxu0 %v6544_v61  ;;  %3433 = vmatpush1.bf16.msra.mxu1 %v6545_v6 }
 0x918   : > { %3393 = vmatprep.subr.bf16.mxu0 %v6546_v11  ;;  %3434 = vmatprep.subr.bf16.mxu1 %v6547_v30 }
 0x91b   : > { %3394 = vmatpush1.bf16.msra.mxu0 %v6548_v16  ;;  %3435 = vmatpush1.bf16.msra.mxu1 %v6549_v28  ;;  %v3541_v16 = vrot.slane %v6105_v51, 6 }
 0x91c   : > { %3395 = vmatprep.subr.bf16.mxu0 %v6550_v33  ;;  %3436 = vmatprep.subr.bf16.mxu1 %v6551_v10  ;;  %v3542_v33 = vrot.slane %v6107_v7, 6 }
 0x91f   : > { %3396 = vmatpush1.bf16.msra.mxu0 %v6552_v19  ;;  %3437 = vmatpush1.bf16.msra.mxu1 %v6553_v47 }
 0x920   : > { %3397 = vmatprep.subr.bf16.mxu0 %v6554_v23  ;;  %3438 = vmatprep.subr.bf16.mxu1 %v6555_v24 }
 0x923   : > { %3398 = vmatpush1.bf16.msra.mxu0 %v6556_v59  ;;  %3439 = vmatpush1.bf16.msra.mxu1 %v6557_v44 }
 0x924   : > { %3399 = vmatprep.subr.bf16.mxu0 %v6558_v17  ;;  %3440 = vmatprep.subr.bf16.mxu1 %v6559_v35  ;;  %v6831_v35 = vld [vmem:[#allocation83_spill] sm:$0xff] }
 0x927   : > { %3400 = vmatpush1.bf16.msra.mxu0 %v5319_v3  ;;  %3441 = vmatpush1.bf16.msra.mxu1 %v5323_v54 }
 0x928   : > { %3401 = vmatprep.subr.bf16.mxu0 %v5325_v62  ;;  %3442 = vmatprep.subr.bf16.mxu1 %v6560_v12 }
 0x92b   : > { %3402 = vmatpush1.bf16.msra.mxu0 %v5335_v31  ;;  %3443 = vmatpush1.bf16.msra.mxu1 %v5339_v60 }
 0x92c   : > { %3403 = vmatprep.subr.bf16.mxu0 %v5341_v21  ;;  %3444 = vmatprep.subr.bf16.mxu1 %v5344_v53 }
 0x92f   : > { %3404 = vmatpush1.bf16.msra.mxu0 %v5351_v14  ;;  %3445 = vmatpush1.bf16.msra.mxu1 %v5355_v38 }
 0x930   : > { %3405 = vmatprep.subr.bf16.mxu0 %v5357_v52  ;;  %3446 = vmatprep.subr.bf16.mxu1 %v5360_v5 }
 0x933   : > { %3406 = vmatpush1.bf16.msra.mxu0 %v6684_v18  ;;  %3447 = vmatpush1.bf16.msra.mxu1 %v6831_v35 }
 0x936   : > { %3420 = vmatmul.mubr.bf16.vlgmr.msra.gmra.mrb[68].mxu0 %v3299_v43  ;;  %3461 = vmatmul.mubr.bf16.vlgmr.msra.gmra.mrb[68].mxu1 %v3299_v43 }
 0x9e1   : > { %v3339_v22 = vpop.f32.mrb[64].mxu0  ;;  %v3380_v27 = vpop.f32.mrb[64].mxu1 }
 0x9e2   : > { %v3479_v3 = vrot.slane %v3380_v27, 2  ;;  %v3341_v31 = vpop.f32.mrb[65].mxu0  ;;  %v3382_v54 = vpop.f32.mrb[65].mxu1  ;;  %v3477_v17 = vrot.slane %v3339_v22, 2 }
 0x9e3   : > { %v3480_v53 = vrot.slane %v3382_v54, 2  ;;  %v3343_v62 = vpop.f32.mrb[66].mxu0  ;;  %v3384_v60 = vpop.f32.mrb[66].mxu1  ;;  %v3478_v9 = vrot.slane %v3341_v31, 2 }
 0x9e4   : > { %v3495_v21 = vadd.f32 %v3479_v3, %v6778_v56  ;;  %v3344_v14 = vpop.f32.mrb[67].mxu0  ;;  %v3385_v38 = vpop.f32.mrb[67].mxu1  ;;  %v3493_v45 = vadd.f32 %v3477_v17, %v6828_v1  ;;  %v6835_v17 = vld [vmem:[#allocation67_spill] sm:$0xff] (!%p4119_p10) }
 0x9e5   : > { %v3496_v52 = vadd.f32 %v3480_v53, %v6827_v41  ;;  %v3494_v29 = vadd.f32 %v3478_v9, %v6832_v55  ;;  %v3565_v9 = vrot.slane (!%p4119_p10), %v6835_v17, 4 }
 0x9e6   : > { %v4115_v5 = vmul.f32 -1.442695, %v3495_v21  ;;  %v4113_v11 = vmul.f32 -1.442695, %v3493_v45  ;;  %v6836_v45 = vld [vmem:[#allocation59_spill] sm:$0xff] (!%p4119_p10) }
 0x9e7   : > { %v4116_v12 = vmul.f32 -1.442695, %v3496_v52  ;;  %v4114_v30 = vmul.f32 -1.442695, %v3494_v29 }
 0x9e8   : > { %4441 = vpow2.f32 %v4115_v5  ;;  %v6834_v5 = vld [vmem:[#allocation66_spill] sm:$0xff] (!%p4119_p10) }
 0x9e9   : > { %4443 = vpow2.f32 %v4116_v12  ;;  %v3563_v12 = vrot.slane (!%p4119_p10), %v6834_v5, 4 }
 0x9f2   : > { %v4442_v8 = vpop.eup %4441 }
 0x9f3   : > { %v3521_v46 = vadd.f32 1.0, %v4442_v8  ;;  %v4444_v61 = vpop.eup %4443  ;;  %v3567_v8 = vrot.slane (!%p4119_p10), %v6111_v0, 4  ;;  %v6843_v0 = vld [vmem:[#allocation93_spill] sm:$0xff] (!%p4119_p10) }
 0x9f4   : > { %v3522_v6 = vadd.f32 1.0, %v4444_v61  ;;  %v6838_v61 = vld [vmem:[#allocation61_spill] sm:$0xff] (!%p4119_p10) }
 0x9f5   : > { %4445 = vrcp.f32 %v3521_v46  ;;  %v6837_v46 = vld [vmem:[#allocation94_spill] sm:$0xff] (!%p4119_p10) }
 0x9f6   : > { %4447 = vrcp.f32 %v3522_v6  ;;  %v3576_v55 = vsel (!%p4119_p10), %vm3573_vm2, %v6837_v46, %v6836_v45 }
 0x9f7   : > { %4449 = vpow2.f32 %v4113_v11  ;;  %v3581_v6 = vsel (!%p4119_p10), %vm3579_vm3, %v3576_v55, %v6838_v61  ;;  %v6839_v11 = vld [vmem:[#allocation65_spill] sm:$0xff] (!%p4119_p10) }
 0x9f8   : > { %4451 = vpow2.f32 %v4114_v30  ;;  %v3564_v30 = vrot.slane (!%p4119_p10), %v6839_v11, 4 }
 0x9ff   : > { %v4446_v28 = vpop.eup %4445 }
 0xa00   : > { %v3545_v10 = vmul.f32 %v4446_v28, %v3541_v16  ;;  %v4448_v19 = vpop.eup %4447  ;;  %v6840_v16 = vld [vmem:[#allocation63_spill] sm:$0xff] (!%p4119_p10) }
 0xa01   : > { %v3546_v47 = vmul.f32 %v4448_v19, %v3542_v33  ;;  %v4450_v23 = vpop.eup %4449  ;;  %v3586_v28 = vsel (!%p4119_p10), %vm3584_vm4, %v3581_v6, %v6840_v16  ;;  %v6841_v33 = vld [vmem:[#allocation68_spill] sm:$0xff] (!%p4119_p10) }
 0xa02   : > { %v4452_v24 = vpop.eup %4451  ;;  %v3519_v59 = vadd.f32 1.0, %v4450_v23  ;;  %v6842_v19 = vld [vmem:[#allocation60_spill] sm:$0xff] (!%p4119_p10)  ;;  %v3591_v23 = vsel (!%p4119_p10), %vm3589_vm5, %v3586_v28, %v3563_v12 }
 0xa03   : > { %v3520_v44 = vadd.f32 1.0, %v4452_v24  ;;  %v3568_v24 = vrot.slane (!%p4119_p10), %v6113_v58, 4 }
 0xa04   : > { %4453 = vrcp.f32 %v3519_v59  ;;  %v6844_v59 = vld [vmem:[#allocation62_spill] sm:$0xff] (!%p4119_p10) }
 0xa05   : > { %4455 = vrcp.f32 %v3520_v44 }
 0xa09   : > { %v3421_v18 = vpop.f32.mrb[68].mxu0  ;;  %v3462_v56 = vpop.f32.mrb[68].mxu1 }
 0xa0a   : > { %v3481_v1 = vrot.slane %v3421_v18, 2  ;;  %v3483_v41 = vrot.slane %v3462_v56, 2  ;;  %v3423_v13 = vpop.f32.mrb[69].mxu0  ;;  %v3464_v50 = vpop.f32.mrb[69].mxu1  ;;  %v3596_v18 = vsel (!%p4119_p10), %vm3594_vm6, %v3591_v23, %v3565_v9 }
 0xa0b   : > { %v3482_v25 = vrot.slane %v3423_v13, 2  ;;  %v3484_v37 = vrot.slane %v3464_v50, 2  ;;  %v3425_v4 = vpop.f32.mrb[70].mxu0  ;;  %v3466_v2 = vpop.f32.mrb[70].mxu1  ;;  %v3601_v13 = vsel (!%p4119_p10), %vm3599_vm7, %v3596_v18, %v3567_v8 }
 0xa0c   : > { %v3497_v7 = vadd.f32 %v3481_v1, %v6781_v39  ;;  %v3499_v36 = vadd.f32 %v3483_v41, %v6782_v20  ;;  %v3426_v34 = vpop.f32.mrb[71].mxu0  ;;  %v3467_v51 = vpop.f32.mrb[71].mxu1  ;;  %v6845_v1 = vld [vmem:[#allocation64_spill] sm:$0xff] (!%p4119_p10) }
 0xa0d   : > { %v3498_v15 = vadd.f32 %v3482_v25, %v6833_v32  ;;  %v3500_v42 = vadd.f32 %v3484_v37, %v6735_v48 }
 0xa0e   : > { %v4117_v40 = vmul.f32 -1.442695, %v3497_v7  ;;  %4457 = vtanh.f32 %v3499_v36  ;;  %v4454_v49 = vpop.eup %4453 }
 0xa0f   : > { %v4118_v57 = vmul.f32 -1.442695, %v3498_v15  ;;  %4459 = vtanh.f32 %v3500_v42  ;;  %v4456_v63 = vpop.eup %4455 }
 0xa10   : > { %4461 = vpow2.f32 %v4117_v40 }
 0xa11   : > { %4463 = vpow2.f32 %v4118_v57 }
 0xa18   : > { %v4458_v26 = vpop.eup %4457 }
 0xa19   : > { %v4460_v43 = vpop.eup %4459  ;;  %v3547_v39 = vmul.f32 %v4458_v26, %v4454_v49 }
 0xa1a   : > { %v4462_v35 = vpop.eup %4461  ;;  %v3548_v20 = vmul.f32 %v4460_v43, %v4456_v63 }
 0xa1b   : > { %v4464_v22 = vpop.eup %4463  ;;  %v3523_v27 = vadd.f32 1.0, %v4462_v35  ;;  %v3549_v3 = vadd.f32 %v3547_v39, %v3545_v10  ;;  %v3566_v10 = vrot.slane (!%p4119_p10), %v6841_v33, 4 }
 0xa1c   : > { %v3524_v31 = vadd.f32 1.0, %v4464_v22  ;;  %v3550_v54 = vadd.f32 %v3548_v20, %v3546_v47  ;;  %v3578_v47 = vsel (!%p4119_p10), %vm3573_vm2, %v6843_v0, %v6842_v19 }
 0xa1d   : > { %4465 = vrcp.f32 %v3523_v27  ;;  %v3583_v44 = vsel (!%p4119_p10), %vm3579_vm3, %v3578_v47, %v6844_v59 }
 0xa1e   : > { %4467 = vtanh.f32 %v3549_v3  ;;  %v3588_v41 = vsel (!%p4119_p10), %vm3584_vm4, %v3583_v44, %v6845_v1 }
 0xa1f   : > { %4469 = vrcp.f32 %v3524_v31  ;;  %v3593_v50 = vsel (!%p4119_p10), %vm3589_vm5, %v3588_v41, %v3564_v30 }
 0xa20   : > { %4471 = vtanh.f32 %v3550_v54  ;;  %v3598_v37 = vsel (!%p4119_p10), %vm3594_vm6, %v3593_v50, %v3566_v10 }
 0xa21   : > { %v3603_v4 = vsel (!%p4119_p10), %vm3599_vm7, %v3598_v37, %v3568_v24 }
 0xa27   : > { %v4466_v48 = vpop.eup %4465  ;;  %3560 = sbr.rel (%p4119_p10) target bundleno = 2611 (0xa33), region = 68 }
 0xa28   : > { %v4468_v53 = vpop.eup %4467 }
 0xa29   : > { %v4470_v62 = vpop.eup %4469  ;;  %v3553_v60 = vmul.f32 %v4468_v53, %v4466_v48 }
 0xa2a   : > { %v4472_v21 = vpop.eup %4471 }
 0xa2b   : > { %v6169_v14 = vpack.c.bf16 %v3553_v60, %v3553_v60  ;;  %v3554_v38 = vmul.f32 %v4472_v21, %v4470_v62 }
 0xa2d   : > { %v3556_v52 = vpack.c.bf16 %v3554_v38, %v3554_v38  ;;  %v3571_v29 = vrot.slane (!%p4119_p10), %v6169_v14, 4 }
 0xa2f   : > { %v3572_v56 = vrot.slane %v3556_v52, 4  ;;  %v3606_v25 = vsel %vm3604_vm8, %v3601_v13, %v3571_v29 }
 0xa30   : > { %3611 = vst [vmem:[#allocation2] sm:$0xff] %v3606_v25 }
 0xa31   : > { %v3609_v2 = vsel %vm3604_vm8, %v3603_v4, %v3572_v56 }
 0xa32   : > { %3612 = vst.msk [vmem:[#allocation2 + $0x8] sm:$0xff] %vm890_vm1, %v3609_v2 }
 0xa33 PF: > { %p4120_p9 = scmp.ne.s32.totalorder %s4807_s19, 5 }
 0xa34   : > { %v4473_v58 = vld [vmem:[%s6269_s4] sm:$0xff] (!%p4120_p9)   ;;  %v4682_v7 = vmov (!%p4120_p9), 0   ;;  %v3647_v36 = vrot.slane (!%p4120_p9), %v3556_v52, 3  ;;  %v4474_v34 = vld [vmem:[%s6269_s4 + $0x8] sm:$0xff] (!%p4120_p9)   ;;  %v4475_v51 = vld [vmem:[%s6269_s4 + $0x10] sm:$0xff] (!%p4120_p9)   ;;  %v3646_v26 = vrot.slane (!%p4120_p9), %v6169_v14, 3 }
 0xa35   : > { %3616 = sbr.rel (%p4120_p9) target bundleno = 2868 (0xb34), region = 72  ;;  %3712 = vmatprep.subr.bf16.mxu0 (!%p4120_p9), %v4682_v7  ;;  %v4476_v32 = vld [vmem:[%s6269_s4 + $0x18] sm:$0xff] (!%p4120_p9)   ;;  %v4477_v15 = vld [vmem:[%s6269_s4 + $0x20] sm:$0xff] (!%p4120_p9)   ;;  %v4478_v42 = vld [vmem:[%s6269_s4 + $0x28] sm:$0xff] (!%p4120_p9)   ;;  %vm3752_vm9 = vcmask (!%p4120_p9), 123904  }
 0xa36   : > { %3713 = vmatpush1.bf16.msra.mxu0 (!%p4120_p9), %v4473_v58  ;;  %4132 = vmatprep.mubr.msk.bf16.mxu0 (!%p4120_p9), %vm890_vm1, %v3647_v36  ;;  %v4479_v40 = vld [vmem:[%s6269_s4 + $0x30] sm:$0xff] (!%p4120_p9)   ;;  %v4480_v57 = vld [vmem:[%s6269_s4 + $0x38] sm:$0xff] (!%p4120_p9)   ;;  %v4481_v49 = vld [vmem:[%s6269_s4 + $0x40] sm:$0xff] (!%p4120_p9)  }
 0xa37   : > { %3714 = vmatprep.subr.bf16.mxu0 (!%p4120_p9), %v4682_v7  ;;  %v4482_v63 = vld [vmem:[%s6269_s4 + $0x48] sm:$0xff] (!%p4120_p9)   ;;  %v4121_v43 = vld [vmem:[#allocation9] ss:$0 sm:$0xff] (!%p4120_p9) }
 0xa3a   : > { %3715 = vmatpush1.bf16.msra.mxu0 (!%p4120_p9), %v4474_v34 }
 0xa3b   : > { %3716 = vmatprep.subr.bf16.mxu0 (!%p4120_p9), %v4682_v7 }
 0xa3e   : > { %3717 = vmatpush1.bf16.msra.mxu0 %v4475_v51 }
 0xa3f   : > { %3718 = vmatprep.subr.bf16.mxu0 %v4682_v7 }
 0xa42   : > { %3719 = vmatpush1.bf16.msra.mxu0 %v4476_v32 }
 0xa43   : > { %3720 = vmatprep.subr.bf16.mxu0 %v4682_v7 }
 0xa46   : > { %3721 = vmatpush1.bf16.msra.mxu0 %v4477_v15 }
 0xa47   : > { %3722 = vmatprep.subr.bf16.mxu0 %v4682_v7 }
 0xa4a   : > { %3723 = vmatpush1.bf16.msra.mxu0 %v4478_v42 }
 0xa4b   : > { %3724 = vmatprep.subr.bf16.mxu0 %v4682_v7 }
 0xa4e   : > { %3725 = vmatpush1.bf16.msra.mxu0 %v4479_v40 }
 0xa4f   : > { %3726 = vmatprep.subr.bf16.mxu0 %v4682_v7 }
 0xa52   : > { %3727 = vmatpush1.bf16.msra.mxu0 %v4480_v57 }
 0xa53   : > { %3728 = vmatprep.subr.bf16.mxu0 %v4682_v7 }
 0xa56   : > { %3729 = vmatpush1.bf16.msra.mxu0 %v4481_v49 }
 0xa57   : > { %3730 = vmatprep.subr.bf16.mxu0 %v4682_v7 }
 0xa5a   : > { %3731 = vmatpush1.bf16.msra.mxu0 %v4482_v63 }
 0xa5d   : > { %3745 = vmatmul.mubr.bf16.vlgmr.msra.gmra.mrb[0].mxu0 %v3646_v26 }
 0xb30   : > { %v3746_v39 = vpop.f32.mrb[0].mxu0 }
 0xb31   : > { %v3747_v35 = vadd.f32 %v4121_v43, %v3746_v39  ;;  %v3748_v20 = vpop.f32.mrb[1].mxu0 }
 0xb32   : > { %v3749_v22 = vpop.f32.mrb[2].mxu0 }
 0xb33   : > { %3753 = vst.msk [vmem:[#allocation11] sm:$0x3] %vm3752_vm9, %v3747_v35  ;;  %v3750_v27 = vpop.f32.mrb[3].mxu0 }
 0xb34 PF: > { %p4174_p13 = scmp.eq.s32.totalorder %s4807_s19, 5  ;;  %s4683_s13 = smov [#allocation11]  }
 0xb35   : > { %s3761_s20 = sshll.u32 %s4683_s13, 4  ;;  %s3762_s20 = int_to_ptr.vmem [resolvable:$true] %s3761_s20 }
 0xb36   : > { %s4601_s10 = scalar_lea.vmem %s3762_s20, 32  ;;  %p4608_p6 = scmp.lt.s32.totalorder %s3762_s20, %s3762_s20 }
 0xb37   : > { %p4602_p12 = scmp.ne.s32.totalorder %s3762_s20, %s4601_s10  ;;  %p4609_p0 = scmp.lt.s32.totalorder %s4601_s10, %s4601_s10 }
 0xb39   : > { %p4603_p3 = pnand %p4602_p12, %p4174_p13  ;;  %p4610_p1 = por %p4609_p0, %p4608_p6 }
 0xb3b   : > { %p4604_p2 = pneg %p4603_p3 }
 0xb3d   : > { %p4611_p11 = pnand %p4610_p1, %p4604_p2 }
 0xb3f   : > { %4614 = shalt.err (!%p4611_p11)
}
 0xb40   : > { %s4615_s21 = scalar_lea.hbm %s6271_s6, 32 }
 0xb41   : > { %p4616_p7 = scmp.ne.s32.totalorder %s6271_s6, %s4615_s21  ;;  %p4621_p8 = scmp.lt.u32.totalorder %s4615_s21, %s6271_s6 }
 0xb43   : > { %p4617_p5 = pnand %p4616_p7, %p4174_p13 }
 0xb45   : > { %p4618_p4 = pneg %p4617_p5 }
 0xb47   : > { %p4623_p10 = pnand %p4621_p8, %p4618_p4 }
 0xb49   : > { %4626 = shalt.err (!%p4623_p10)
}
 0xb4a   : > { %4154 = dma.vmem_to_hbm [thread:$0]  (%p4174_p13), %s3762_s20, 32, %s6271_s6, [#allocation5]  }
 0xb4b   : > { %4656 = dma.done.wait (%p4174_p13), [#allocation5], 32  }
 0xb4c   : > { %4658 = vsyncadd (%p4174_p13), [#allocation5], 4294967264 }
 0xb4d PF: > { %s6846_s28 = sld [smem:[#allocation16_spill]]  ;;  %p21_p9 = scmp.ge.s32.totalorder %s4740_s25, 8  }
 0xb4e   : > { %s6847_s21 = smov %s4665_s22  ;;  %s6848_s22 = smov %s4669_s23 }
 0xb4f   : > { %s6850_s24 = smov %s4740_s25  ;;  %23 = sbr.rel (!%p21_p9) target bundleno = 10 (0xa), region = 121 }
 0xb53   : > { %s6849_s23 = smov %s6846_s28 }
 0xb56   :  { %3774 = vsyncpa [#allocation4], 1 }
 0xb57   :  { %3776 = vsyncpa [#allocation4 + $0x1], 1 }
 0xb58   :  { %3777 = vsyncpa [#allocation7], 1 }
 0xb59   :  { %3779 = vsyncpa [#allocation7 + $0x1], 1 }
 0xb5a   :  { %3780 = vsyncpa [#allocation10], 1 }
 0xb5b   :  { %3781 = vsyncpa [#allocation5], 1 }
 0xb5c   :  { %3783 = vsyncpa [#allocation5 + $0x1], 1 }

</bundles_post_ra>
